<compile_context>
chip_gen: v7x
topology: tpu7x:2x2x1
jax: 0.10.0
libtpu: 0.0.40
codegen_flags: <defaults>
</compile_context>

<pallas_src>
import math
import functools
import numpy as np

import jax
import jax.numpy as jnp
from jax.experimental import pallas as pl
from jax.experimental.pallas import tpu as pltpu

# ----------------------------- configuration --------------------------------
CFG = dict(
    embed_dim=32,
    num_heads=4,
    num_layers=2,
    block_size=8,
    dropout=0.0,          # eval semantics: dropout is identity
    bias=True,
    embed_map=dict(node_type=6, degree_type=5, edge_type=4, special_type=3),
    target_sizes=dict(node=6, edge=4, special=3),
)

NEG_INF = -1e30


# ------------------------------ kernel helpers -------------------------------
def _gelu(x):
    # TODO(synk): torch nn.GELU() default is the exact erf form; tanh
    # approximation is used here for a Mosaic-friendly lowering.
    c = math.sqrt(2.0 / math.pi)
    return 0.5 * x * (1.0 + jnp.tanh(c * (x + 0.044715 * x * x * x)))


def _layer_norm(v, g, b, eps=1e-5):
    mu = jnp.mean(v, axis=-1, keepdims=True)
    var = jnp.mean((v - mu) ** 2, axis=-1, keepdims=True)
    return (v - mu) * jax.lax.rsqrt(var + eps) * g + b


def _bf16(x):
    return x.astype(jnp.bfloat16)


def _matmul(a, w_bf16):
    # bf16 MXU inputs, f32 accumulation
    return jnp.dot(_bf16(a), w_bf16, preferred_element_type=jnp.float32)


def _full_spec(shape):
    # every array in this model is 2-D and block == full array
    assert len(shape) == 2
    return pl.BlockSpec(shape, lambda i: (0, 0))


# ------------------ ONE fused kernel: transformer + heads --------------------
def _fused_kernel(
        # transformer inputs
        node_ids_ref, node_embed_ref, bias_ref,
        ln1_g_ref, ln1_b_ref, w_qkv_ref, b_qkv_ref,
        w_ap_ref, b_ap_ref, ln2_g_ref, ln2_b_ref,
        w_fc_ref, b_fc_ref, w_mp_ref, b_mp_ref,
        lnf_g_ref, lnf_b_ref,
        # classifier inputs
        sel_ref,
        nw1_ref, nb1_ref, ng_ref, nb_ref, nw2_ref,
        sw1_ref, sb1_ref, sg_ref, sb_ref, sw2_ref,
        ew1_ref, eb1_ref, eg_ref, eb_ref, ew2_ref,
        node_tgt_ref, node_mask_ref, spec_tgt_ref, spec_mask_ref,
        edge_tgt_ref, edge_mask_ref,
        # output
        out_ref,
        *, num_layers, batch, seq, heads, dim, r_pad, e_pad):
    hd = dim // heads
    bt = batch * seq
    s_tot = batch * heads * seq                 # stacked attention rows (B*H*T)
    scale = 1.0 / math.sqrt(hd)

    # ---- GraphEmbedding: node-type lookup as a one-hot matmul (exact f32) ----
    n_types = node_embed_ref.shape[0]
    ids = node_ids_ref[...]                                        # (BT, 1) int32
    type_iota = jax.lax.broadcasted_iota(jnp.int32, (bt, n_types), 1)
    x0 = jnp.dot((type_iota == ids).astype(jnp.float32), node_embed_ref[...],
                 preferred_element_type=jnp.float32)               # (BT, D)
    x = x0                                                         # residual stream

    # ---- transformer stack (fully unrolled; L=2) ----
    # TODO(synk): reference `Block` implementation not provided; standard pre-LN
    # causal self-attention with Graphormer-style additive per-head edge bias.
    for l in range(num_layers):
        # ---------------- attention (block-diagonal over (b, h)) -------------
        h = _layer_norm(x, ln1_g_ref[pl.ds(l, 1), :], ln1_b_ref[pl.ds(l, 1), :])
        qkv = _matmul(h, w_qkv_ref[pl.ds(l * dim, dim), :]) + b_qkv_ref[pl.ds(l, 1), :]
        # stack heads along rows: row r = hh*B*T + b*T + t
        qs = jnp.concatenate(
            [qkv[:, hh * hd:(hh + 1) * hd] for hh in range(heads)], axis=0)
        ks = jnp.concatenate(
            [qkv[:, dim + hh * hd:dim + (hh + 1) * hd] for hh in range(heads)], axis=0)
        vs = jnp.concatenate(
            [qkv[:, 2 * dim + hh * hd:2 * dim + (hh + 1) * hd] for hh in range(heads)], axis=0)
        s = jax.lax.dot_general(_bf16(qs), _bf16(ks), (((1,), (1,)), ((), ())),
                                preferred_element_type=jnp.float32) * scale
        # edge bias with block/causal mask (-1e30) already folded in outside
        s = s + bias_ref[pl.ds(l * s_tot, s_tot), :]
        m = jnp.max(s, axis=-1, keepdims=True)
        p = jnp.exp(s - m)
        p = p * pl.reciprocal(jnp.sum(p, axis=-1, keepdims=True), approx=True)
        attn_s = jnp.dot(_bf16(p), _bf16(vs),
                         preferred_element_type=jnp.float32)       # (S, hd)
        attn = jnp.concatenate(
            [attn_s[hh * bt:(hh + 1) * bt, :] for hh in range(heads)], axis=1)
        x = x + _matmul(attn, w_ap_ref[pl.ds(l * dim, dim), :]) + b_ap_ref[pl.ds(l, 1), :]

        # ---------------- MLP ----------------
        h = _layer_norm(x, ln2_g_ref[pl.ds(l, 1), :], ln2_b_ref[pl.ds(l, 1), :])
        h = _gelu(_matmul(h, w_fc_ref[pl.ds(l * dim, dim), :]) + b_fc_ref[pl.ds(l, 1), :])
        x = x + _matmul(h, w_mp_ref[pl.ds(l * 4 * dim, 4 * dim), :]) + b_mp_ref[pl.ds(l, 1), :]

    x = _layer_norm(x, lnf_g_ref[...], lnf_b_ref[...])             # (BT, D)

    # ---- ragged row gathers (real / x_v / x_w / node-emb) as ONE matmul ----
    src = jnp.concatenate([x, x0], axis=0)                         # (2*BT, D)
    gathered = jnp.dot(sel_ref[...], src, preferred_element_type=jnp.float32)
    real_x = gathered[0:r_pad]                                     # (R, D)
    x_v = gathered[r_pad:r_pad + e_pad]                            # (E, D)
    x_w = gathered[r_pad + e_pad:r_pad + 2 * e_pad]                # (E, D)
    nt_emb = gathered[r_pad + 2 * e_pad:r_pad + 3 * e_pad]         # (E, D) from x0
    x_edge = jnp.concatenate([x_v, x_w, nt_emb], axis=1)           # (E, 3D)

    # ---- classifier heads: Linear -> GELU -> LayerNorm -> Linear(no bias) ----
    def head(xin, w1, b1, g, b, w2):
        t = _gelu(_matmul(xin, w1[...]) + b1[...])
        t = _layer_norm(t, g[...], b[...])
        return _matmul(t, w2[...])

    z_node = head(real_x, nw1_ref, nb1_ref, ng_ref, nb_ref, nw2_ref)   # (R, 6)
    z_spec = head(real_x, sw1_ref, sb1_ref, sg_ref, sb_ref, sw2_ref)   # (R, 3)
    z_edge = head(x_edge, ew1_ref, eb1_ref, eg_ref, eb_ref, ew2_ref)   # (E, 4)

    # ---- masked cross-entropy + accuracy + first-argmax ----
    def ce_acc(z, tgt, mask):
        n_cls = z.shape[-1]
        col = jax.lax.broadcasted_iota(jnp.int32, z.shape, 1)
        onehot = (col == tgt).astype(jnp.float32) * mask           # mask both sides
        m = jnp.max(z, axis=-1, keepdims=True)
        lse = jnp.log(jnp.sum(jnp.exp(z - m), axis=-1, keepdims=True)) + m
        ll = jnp.sum(z * onehot, axis=-1, keepdims=True)
        per_row = (lse * mask) - ll
        colf = col.astype(jnp.float32)
        pred = jnp.min(jnp.where(z >= m, colf, float(n_cls)), axis=-1, keepdims=True)
        correct = (pred == tgt.astype(jnp.float32)).astype(jnp.float32) * mask
        denom = jnp.sum(mask)
        return jnp.sum(per_row) / denom, jnp.sum(correct) / denom, pred

    edge_loss, edge_acc, edge_pred = ce_acc(z_edge, edge_tgt_ref[...], edge_mask_ref[...])
    node_loss, node_acc, _ = ce_acc(z_node, node_tgt_ref[...], node_mask_ref[...])
    spec_loss, spec_acc, _ = ce_acc(z_spec, spec_tgt_ref[...], spec_mask_ref[...])

    # ---- single lane-dense output slab: row 0 = metrics, row 1 = edge preds ----
    lanes = out_ref.shape[1]
    col_out = jax.lax.broadcasted_iota(jnp.int32, (1, lanes), 1)
    metrics = jnp.zeros((1, lanes), jnp.float32)
    for i, v in enumerate((edge_loss, node_loss, spec_loss,
                           edge_acc, node_acc, spec_acc)):
        metrics = metrics + jnp.where(col_out == i, v, 0.0)
    eident = (jax.lax.broadcasted_iota(jnp.int32, (e_pad, e_pad), 0)
              == jax.lax.broadcasted_iota(jnp.int32, (e_pad, e_pad), 1))
    pred_row = jnp.sum(jnp.where(eident, edge_pred, 0.0), axis=0, keepdims=True)
    pred_row = jnp.concatenate(
        [pred_row, jnp.zeros((1, lanes - e_pad), jnp.float32)], axis=1)
    out_ref[...] = jnp.concatenate(
        [metrics, pred_row,
         jnp.zeros((out_ref.shape[0] - 2, lanes), jnp.float32)], axis=0)


# ------------------------------ parameter init -------------------------------
def init_params(key):
    D = CFG['embed_dim']; H = CFG['num_heads']; L = CFG['num_layers']
    em = CFG['embed_map']; ts = CFG['target_sizes']
    state = [key]

    def nxt():
        state[0], sub = jax.random.split(state[0])
        return sub

    def normal(shape, std=0.02):
        return std * jax.random.normal(nxt(), shape, jnp.float32)

    c_proj_std = 0.02 / math.sqrt(2 * L)
    params = {
        'node_type_embed': normal((em['node_type'], D)),
        'degree_embed': normal((em['degree_type'], D)),   # unused by forward (matches reference)
        'pos_embed': normal((CFG['block_size'], D)),       # unused by forward_idx (matches reference)
        # per-layer transformer weights, stacked along rows (layer l = row-block l)
        'ln1_g': jnp.ones((L, D), jnp.float32), 'ln1_b': jnp.zeros((L, D), jnp.float32),
        'w_qkv': normal((L * D, 3 * D)), 'b_qkv': jnp.zeros((L, 3 * D), jnp.float32),
        'w_attn_proj': normal((L * D, D), c_proj_std), 'b_attn_proj': jnp.zeros((L, D), jnp.float32),
        'ln2_g': jnp.ones((L, D), jnp.float32), 'ln2_b': jnp.zeros((L, D), jnp.float32),
        'w_fc': normal((L * D, 4 * D)), 'b_fc': jnp.zeros((L, 4 * D), jnp.float32),
        'w_mlp_proj': normal((L * 4 * D, D), c_proj_std), 'b_mlp_proj': jnp.zeros((L, D), jnp.float32),
        'edge_bias_embed': normal((L, em['edge_type'], H)),
        'ln_f_g': jnp.ones((1, D), jnp.float32), 'ln_f_b': jnp.zeros((1, D), jnp.float32),
    }

    def head(d_in, d_out):
        return {'w1': normal((d_in, D)), 'b1': jnp.zeros((1, D), jnp.float32),
                'g': jnp.ones((1, D), jnp.float32), 'b': jnp.zeros((1, D), jnp.float32),
                'w2': normal((D, d_out))}

    params['node_head'] = head(D, ts['node'])
    params['special_head'] = head(D, ts['special'])
    params['edge_head'] = head(3 * D, ts['edge'])
    return params


# ----------------------- host-side ragged index bookkeeping ------------------
def precompute_indices(num_nodes_batch, block_size):
    """Ragged index bookkeeping -> dense selection matrix, masks and padded
    gather indices.  Host numpy, computed ONCE per graph-size configuration."""
    nn = np.asarray(num_nodes_batch, np.int64)
    B = int(nn.shape[0]); T = int(block_size); BT = B * T

    real_rows, node_tgt_b, node_tgt_t, keep = [], [], [], []
    for b in range(B):
        n = int(nn[b])
        for t in range(n):
            real_rows.append(b * T + t)
            node_tgt_b.append(b)
            node_tgt_t.append(min(t + 1, T - 1))
            keep.append(0.0 if t == n - 1 else 1.0)   # node loss drops last row of each graph
    v_rows, w_rows, nt_rows = [], [], []
    for b in range(B):
        n = int(nn[b])
        for j in range(1, n):
            for c in range(j):
                v_rows.append(b * T + (j - 1))        # repeat_interleave(edge_x, ...)
                w_rows.append(b * T + c)              # x_w[final_mask]
                nt_rows.append(b * T + j)             # node-type emb of the new node
    n_real, n_edge = len(real_rows), len(v_rows)
    r_pad = max(8, -(-n_real // 8) * 8)
    e_pad = max(8, -(-n_edge // 8) * 8)
    assert e_pad <= 128, "edge count must fit in one output row"

    # selection matrix: rows [real | v | w | nt]; source = concat([x, x0], axis=0)
    sel = np.zeros((r_pad + 3 * e_pad, 2 * BT), np.float32)
    for i, r in enumerate(real_rows):
        sel[i, r] = 1.0
    for i, r in enumerate(v_rows):
        sel[r_pad + i, r] = 1.0
    for i, r in enumerate(w_rows):
        sel[r_pad + e_pad + i, r] = 1.0
    for i, r in enumerate(nt_rows):
        sel[r_pad + 2 * e_pad + i, BT + r] = 1.0      # gathers from the x0 half

    node_mask = np.zeros((r_pad, 1), np.float32); node_mask[:n_real, 0] = keep
    spec_mask = np.zeros((r_pad, 1), np.float32); spec_mask[:n_real, 0] = 1.0
    edge_mask = np.zeros((e_pad, 1), np.float32); edge_mask[:n_edge, 0] = 1.0
    ntb = np.zeros((r_pad,), np.int32); ntb[:n_real] = node_tgt_b
    ntt = np.zeros((r_pad,), np.int32); ntt[:n_real] = node_tgt_t

    return dict(sel=sel, node_tgt_b=ntb, node_tgt_t=ntt, node_mask=node_mask,
                spec_mask=spec_mask, edge_mask=edge_mask,
                n_real=n_real, n_edge=n_edge, r_pad=r_pad, e_pad=e_pad)


def _macro_f1(y_true, y_pred, num_classes):
    # sklearn f1_score(..., average='macro') over classes present in y_true|y_pred,
    # computed on-device (no host sync).
    f1s, present = [], []
    for c in range(num_classes):
        is_t = (y_true == c); is_p = (y_pred == c)
        tp = jnp.sum(is_p & is_t).astype(jnp.float32)
        fp = jnp.sum(is_p & ~is_t).astype(jnp.float32)
        fn = jnp.sum(~is_p & is_t).astype(jnp.float32)
        prec = tp / jnp.maximum(tp + fp, 1.0)
        rec = tp / jnp.maximum(tp + fn, 1.0)
        f1 = jnp.where(prec + rec > 0, 2 * prec * rec / jnp.maximum(prec + rec, 1e-12), 0.0)
        f1s.append(f1)
        present.append(jnp.any(is_t | is_p).astype(jnp.float32))
    f1s = jnp.stack(f1s); present = jnp.stack(present)
    return jnp.sum(f1s * present) / jnp.maximum(jnp.sum(present), 1.0)


# ------------------------------ model forward --------------------------------
@functools.partial(jax.jit, static_argnames=("r_pad", "e_pad", "n_real", "n_edge"))
def _forward_device(params, tokens, bias_matrix, special_target, edge_type_target,
                    sel, node_tgt_b, node_tgt_t, node_mask, spec_mask, edge_mask,
                    r_pad, e_pad, n_real, n_edge):
    D = CFG['embed_dim']; H = CFG['num_heads']; L = CFG['num_layers']
    ts = CFG['target_sizes']
    B, T, _ = tokens.shape
    BT = B * T
    S = B * H * T
    bf = jnp.bfloat16

    # --- tiny upstream XLA glue feeding the single fused kernel ---
    node_ids = tokens[:, :, 0].reshape(BT, 1).astype(jnp.int32)

    # per-layer per-head additive edge bias in stacked (h, b, t_q) row order,
    # tiled along lanes to the stacked width S, with the block-diagonal causal
    # mask folded in (-1e30 where attention is not allowed).
    bias = jnp.take(params['edge_bias_embed'], bias_matrix, axis=1)     # (L,B,T,T,H)
    bias = bias.transpose(0, 4, 1, 2, 3).reshape(L, S, T).astype(jnp.float32)
    bias = jnp.tile(bias, (1, 1, S // T))                               # (L, S, S)
    blk_mask = np.kron(np.eye(B * H), np.tril(np.ones((T, T)))).astype(bool)
    bias = jnp.where(blk_mask[None], bias, NEG_INF).reshape(L * S, S)

    node_tgt = tokens[node_tgt_b, node_tgt_t, 0].reshape(r_pad, 1).astype(jnp.int32)
    spec_tgt = jnp.pad(special_target.astype(jnp.int32),
                       (0, r_pad - n_real)).reshape(r_pad, 1)
    edge_tgt = jnp.pad(edge_type_target.astype(jnp.int32),
                       (0, e_pad - n_edge)).reshape(e_pad, 1)

    def head_inputs(hp):
        return [hp['w1'].astype(bf), hp['b1'], hp['g'], hp['b'], hp['w2'].astype(bf)]

    inputs = ([node_ids, params['node_type_embed'], bias,
               params['ln1_g'], params['ln1_b'],
               params['w_qkv'].astype(bf), params['b_qkv'],
               params['w_attn_proj'].astype(bf), params['b_attn_proj'],
               params['ln2_g'], params['ln2_b'],
               params['w_fc'].astype(bf), params['b_fc'],
               params['w_mlp_proj'].astype(bf), params['b_mlp_proj'],
               params['ln_f_g'], params['ln_f_b'],
               sel]
              + head_inputs(params['node_head'])
              + head_inputs(params['special_head'])
              + head_inputs(params['edge_head'])
              + [node_tgt, node_mask, spec_tgt, spec_mask, edge_tgt, edge_mask])

    out = pl.pallas_call(
        functools.partial(_fused_kernel, num_layers=L, batch=B, seq=T,
                          heads=H, dim=D, r_pad=r_pad, e_pad=e_pad),
        out_shape=jax.ShapeDtypeStruct((8, 128), jnp.float32),
        grid=(1,),
        in_specs=[_full_spec(a.shape) for a in inputs],
        out_specs=_full_spec((8, 128)),
        compiler_params=pltpu.CompilerParams(dimension_semantics=("arbitrary",)),
    )(*inputs)

    mt_loss = {'edge_type': out[0, 0], 'node_type': out[0, 1], 'special_type': out[0, 2]}
    acc = {'edge_type': out[0, 3], 'node_type': out[0, 4], 'special_type': out[0, 5]}
    edge_pred = out[1, :n_edge].astype(jnp.int32)
    f1 = _macro_f1(edge_type_target, edge_pred, ts['edge'])
    return mt_loss, acc, f1


def forward(params, tokens, num_nodes_batch, bias_matrix,
            special_target, edge_type_target, idx=None):
    if idx is None:
        idx = precompute_indices(num_nodes_batch, CFG['block_size'])
    return _forward_device(
        params, tokens, bias_matrix, special_target, edge_type_target,
        idx['sel'], idx['node_tgt_b'], idx['node_tgt_t'],
        idx['node_mask'], idx['spec_mask'], idx['edge_mask'],
        r_pad=idx['r_pad'], e_pad=idx['e_pad'],
        n_real=idx['n_real'], n_edge=idx['n_edge'])


# ----------------------------------- main ------------------------------------
if __name__ == "__main__":
    key = jax.random.PRNGKey(0)
    pkey, dkey = jax.random.split(key)
    params = init_params(pkey)

    B, T = 2, CFG['block_size']
    em = CFG['embed_map']; ts = CFG['target_sizes']
    num_nodes_batch = np.array([5, 4], np.int32)

    k1, k2, k3, k4, k5 = jax.random.split(dkey, 5)
    node_tok = jax.random.randint(k1, (B, T), 0, em['node_type'])
    deg_tok = jax.random.randint(k2, (B, T), 0, 5)          # degrees in [0, 4]
    tokens = jnp.stack([node_tok, deg_tok], axis=-1).astype(jnp.int32)   # (B,T,2)
    bias_matrix = jax.random.randint(k3, (B, T, T), 0, em['edge_type']).astype(jnp.int32)

    n_real = int(num_nodes_batch.sum())                                  # 9
    n_edges = int((num_nodes_batch * (num_nodes_batch - 1) // 2).sum())  # 16
    special_target = jax.random.randint(k4, (n_real,), 0, ts['special']).astype(jnp.int32)
    edge_type_target = jax.random.randint(k5, (n_edges,), 0, ts['edge']).astype(jnp.int32)

    # ragged index bookkeeping computed once per graph-size configuration
    idx = precompute_indices(num_nodes_batch, T)

    mt_loss, acc, macro_f1_edge = forward(
        params, tokens, num_nodes_batch, bias_matrix,
        special_target, edge_type_target, idx=idx)
    jax.block_until_ready((mt_loss, acc, macro_f1_edge))
    print("KERNEL_OK")
</pallas_src>

<mosaic_0001>
module attributes {stable_mosaic.version = 11 : i64} {
  func.func @_fused_kernel(%arg0: i32, %arg1: memref<16x1xi32, #tpu.memory_space<vmem>>, %arg2: memref<6x32xf32, #tpu.memory_space<vmem>>, %arg3: memref<128x64xf32, #tpu.memory_space<vmem>>, %arg4: memref<2x32xf32, #tpu.memory_space<vmem>>, %arg5: memref<2x32xf32, #tpu.memory_space<vmem>>, %arg6: memref<64x96xbf16, #tpu.memory_space<vmem>>, %arg7: memref<2x96xf32, #tpu.memory_space<vmem>>, %arg8: memref<64x32xbf16, #tpu.memory_space<vmem>>, %arg9: memref<2x32xf32, #tpu.memory_space<vmem>>, %arg10: memref<2x32xf32, #tpu.memory_space<vmem>>, %arg11: memref<2x32xf32, #tpu.memory_space<vmem>>, %arg12: memref<64x128xbf16, #tpu.memory_space<vmem>>, %arg13: memref<2x128xf32, #tpu.memory_space<vmem>>, %arg14: memref<256x32xbf16, #tpu.memory_space<vmem>>, %arg15: memref<2x32xf32, #tpu.memory_space<vmem>>, %arg16: memref<1x32xf32, #tpu.memory_space<vmem>>, %arg17: memref<1x32xf32, #tpu.memory_space<vmem>>, %arg18: memref<64x32xf32, #tpu.memory_space<vmem>>, %arg19: memref<32x32xbf16, #tpu.memory_space<vmem>>, %arg20: memref<1x32xf32, #tpu.memory_space<vmem>>, %arg21: memref<1x32xf32, #tpu.memory_space<vmem>>, %arg22: memref<1x32xf32, #tpu.memory_space<vmem>>, %arg23: memref<32x6xbf16, #tpu.memory_space<vmem>>, %arg24: memref<32x32xbf16, #tpu.memory_space<vmem>>, %arg25: memref<1x32xf32, #tpu.memory_space<vmem>>, %arg26: memref<1x32xf32, #tpu.memory_space<vmem>>, %arg27: memref<1x32xf32, #tpu.memory_space<vmem>>, %arg28: memref<32x3xbf16, #tpu.memory_space<vmem>>, %arg29: memref<96x32xbf16, #tpu.memory_space<vmem>>, %arg30: memref<1x32xf32, #tpu.memory_space<vmem>>, %arg31: memref<1x32xf32, #tpu.memory_space<vmem>>, %arg32: memref<1x32xf32, #tpu.memory_space<vmem>>, %arg33: memref<32x4xbf16, #tpu.memory_space<vmem>>, %arg34: memref<16x1xi32, #tpu.memory_space<vmem>>, %arg35: memref<16x1xf32, #tpu.memory_space<vmem>>, %arg36: memref<16x1xi32, #tpu.memory_space<vmem>>, %arg37: memref<16x1xf32, #tpu.memory_space<vmem>>, %arg38: memref<16x1xi32, #tpu.memory_space<vmem>>, %arg39: memref<16x1xf32, #tpu.memory_space<vmem>>, %arg40: memref<8x128xf32, #tpu.memory_space<vmem>>) attributes {dimension_semantics = [#tpu.dimension_semantics<arbitrary>], iteration_bounds = array<i64: 1>, scalar_prefetch = 0 : i64, scratch_operands = 0 : i64, tpu.core_type = #tpu.core_type<tc>, window_params = [{pipeline_mode = #tpu.pipeline_mode<synchronous>, transform_indices = @transform_0, window_bounds = array<i64: 16, 1>}, {pipeline_mode = #tpu.pipeline_mode<synchronous>, transform_indices = @transform_1, window_bounds = array<i64: 6, 32>}, {pipeline_mode = #tpu.pipeline_mode<synchronous>, transform_indices = @transform_2, window_bounds = array<i64: 128, 64>}, {pipeline_mode = #tpu.pipeline_mode<synchronous>, transform_indices = @transform_3, window_bounds = array<i64: 2, 32>}, {pipeline_mode = #tpu.pipeline_mode<synchronous>, transform_indices = @transform_4, window_bounds = array<i64: 2, 32>}, {pipeline_mode = #tpu.pipeline_mode<synchronous>, transform_indices = @transform_5, window_bounds = array<i64: 64, 96>}, {pipeline_mode = #tpu.pipeline_mode<synchronous>, transform_indices = @transform_6, window_bounds = array<i64: 2, 96>}, {pipeline_mode = #tpu.pipeline_mode<synchronous>, transform_indices = @transform_7, window_bounds = array<i64: 64, 32>}, {pipeline_mode = #tpu.pipeline_mode<synchronous>, transform_indices = @transform_8, window_bounds = array<i64: 2, 32>}, {pipeline_mode = #tpu.pipeline_mode<synchronous>, transform_indices = @transform_9, window_bounds = array<i64: 2, 32>}, {pipeline_mode = #tpu.pipeline_mode<synchronous>, transform_indices = @transform_10, window_bounds = array<i64: 2, 32>}, {pipeline_mode = #tpu.pipeline_mode<synchronous>, transform_indices = @transform_11, window_bounds = array<i64: 64, 128>}, {pipeline_mode = #tpu.pipeline_mode<synchronous>, transform_indices = @transform_12, window_bounds = array<i64: 2, 128>}, {pipeline_mode = #tpu.pipeline_mode<synchronous>, transform_indices = @transform_13, window_bounds = array<i64: 256, 32>}, {pipeline_mode = #tpu.pipeline_mode<synchronous>, transform_indices = @transform_14, window_bounds = array<i64: 2, 32>}, {pipeline_mode = #tpu.pipeline_mode<synchronous>, transform_indices = @transform_15, window_bounds = array<i64: 1, 32>}, {pipeline_mode = #tpu.pipeline_mode<synchronous>, transform_indices = @transform_16, window_bounds = array<i64: 1, 32>}, {pipeline_mode = #tpu.pipeline_mode<synchronous>, transform_indices = @transform_17, window_bounds = array<i64: 64, 32>}, {pipeline_mode = #tpu.pipeline_mode<synchronous>, transform_indices = @transform_18, window_bounds = array<i64: 32, 32>}, {pipeline_mode = #tpu.pipeline_mode<synchronous>, transform_indices = @transform_19, window_bounds = array<i64: 1, 32>}, {pipeline_mode = #tpu.pipeline_mode<synchronous>, transform_indices = @transform_20, window_bounds = array<i64: 1, 32>}, {pipeline_mode = #tpu.pipeline_mode<synchronous>, transform_indices = @transform_21, window_bounds = array<i64: 1, 32>}, {pipeline_mode = #tpu.pipeline_mode<synchronous>, transform_indices = @transform_22, window_bounds = array<i64: 32, 6>}, {pipeline_mode = #tpu.pipeline_mode<synchronous>, transform_indices = @transform_23, window_bounds = array<i64: 32, 32>}, {pipeline_mode = #tpu.pipeline_mode<synchronous>, transform_indices = @transform_24, window_bounds = array<i64: 1, 32>}, {pipeline_mode = #tpu.pipeline_mode<synchronous>, transform_indices = @transform_25, window_bounds = array<i64: 1, 32>}, {pipeline_mode = #tpu.pipeline_mode<synchronous>, transform_indices = @transform_26, window_bounds = array<i64: 1, 32>}, {pipeline_mode = #tpu.pipeline_mode<synchronous>, transform_indices = @transform_27, window_bounds = array<i64: 32, 3>}, {pipeline_mode = #tpu.pipeline_mode<synchronous>, transform_indices = @transform_28, window_bounds = array<i64: 96, 32>}, {pipeline_mode = #tpu.pipeline_mode<synchronous>, transform_indices = @transform_29, window_bounds = array<i64: 1, 32>}, {pipeline_mode = #tpu.pipeline_mode<synchronous>, transform_indices = @transform_30, window_bounds = array<i64: 1, 32>}, {pipeline_mode = #tpu.pipeline_mode<synchronous>, transform_indices = @transform_31, window_bounds = array<i64: 1, 32>}, {pipeline_mode = #tpu.pipeline_mode<synchronous>, transform_indices = @transform_32, window_bounds = array<i64: 32, 4>}, {pipeline_mode = #tpu.pipeline_mode<synchronous>, transform_indices = @transform_33, window_bounds = array<i64: 16, 1>}, {pipeline_mode = #tpu.pipeline_mode<synchronous>, transform_indices = @transform_34, window_bounds = array<i64: 16, 1>}, {pipeline_mode = #tpu.pipeline_mode<synchronous>, transform_indices = @transform_35, window_bounds = array<i64: 16, 1>}, {pipeline_mode = #tpu.pipeline_mode<synchronous>, transform_indices = @transform_36, window_bounds = array<i64: 16, 1>}, {pipeline_mode = #tpu.pipeline_mode<synchronous>, transform_indices = @transform_37, window_bounds = array<i64: 16, 1>}, {pipeline_mode = #tpu.pipeline_mode<synchronous>, transform_indices = @transform_38, window_bounds = array<i64: 16, 1>}, {pipeline_mode = #tpu.pipeline_mode<synchronous>, transform_indices = @transform_39, window_bounds = array<i64: 8, 128>}]} {
    %c0 = arith.constant 0 : index
    %c0_0 = arith.constant 0 : index
    %0 = vector.load %arg1[%c0, %c0_0] : memref<16x1xi32, #tpu.memory_space<vmem>>, vector<16x1xi32>
    %1 = tpu.iota {dimensions = array<i32: 1>} : vector<16x6xi32>
    %2 = vector.broadcast %0 : vector<16x1xi32> to vector<16x6xi32>
    %3 = arith.cmpi eq, %1, %2 : vector<16x6xi32>
    %4 = arith.extui %3 : vector<16x6xi1> to vector<16x6xi32>
    %5 = arith.sitofp %4 : vector<16x6xi32> to vector<16x6xf32>
    %c0_1 = arith.constant 0 : index
    %c0_2 = arith.constant 0 : index
    %6 = vector.load %arg2[%c0_1, %c0_2] : memref<6x32xf32, #tpu.memory_space<vmem>>, vector<6x32xf32>
    %cst = arith.constant dense<0.000000e+00> : vector<16x32xf32>
    %7 = tpu.matmul %5, %6, %cst {dimension_numbers = #tpu.dot_dimension_numbers<[1], [0], [0], [1], [0, 0, 1, 1], [], []>} : vector<16x6xf32>, vector<6x32xf32>, vector<16x32xf32> -> vector<16x32xf32>
    %c0_3 = arith.constant 0 : index
    %c0_4 = arith.constant 0 : index
    %8 = vector.load %arg4[%c0_3, %c0_4] : memref<2x32xf32, #tpu.memory_space<vmem>>, vector<1x32xf32>
    %c0_5 = arith.constant 0 : index
    %c0_6 = arith.constant 0 : index
    %9 = vector.load %arg5[%c0_5, %c0_6] : memref<2x32xf32, #tpu.memory_space<vmem>>, vector<1x32xf32>
    %cst_7 = arith.constant dense<0.000000e+00> : vector<16xf32>
    %10 = vector.multi_reduction <add>, %7, %cst_7 [1] : vector<16x32xf32> to vector<16xf32>
    %11 = vector.shape_cast %10 : vector<16xf32> to vector<16x1xf32>
    %cst_8 = arith.constant 3.200000e+01 : f32
    %12 = vector.broadcast %cst_8 : f32 to vector<16x1xf32>
    %13 = arith.divf %11, %12 : vector<16x1xf32>
    %14 = vector.broadcast %13 : vector<16x1xf32> to vector<16x32xf32>
    %15 = arith.subf %7, %14 : vector<16x32xf32>
    %16 = arith.mulf %15, %15 : vector<16x32xf32>
    %cst_9 = arith.constant dense<0.000000e+00> : vector<16xf32>
    %17 = vector.multi_reduction <add>, %16, %cst_9 [1] : vector<16x32xf32> to vector<16xf32>
    %18 = vector.shape_cast %17 : vector<16xf32> to vector<16x1xf32>
    %cst_10 = arith.constant 3.200000e+01 : f32
    %19 = vector.broadcast %cst_10 : f32 to vector<16x1xf32>
    %20 = arith.divf %18, %19 : vector<16x1xf32>
    %21 = vector.broadcast %13 : vector<16x1xf32> to vector<16x32xf32>
    %22 = arith.subf %7, %21 : vector<16x32xf32>
    %cst_11 = arith.constant 9.99999974E-6 : f32
    %23 = vector.broadcast %cst_11 : f32 to vector<16x1xf32>
    %24 = arith.addf %20, %23 : vector<16x1xf32>
    %25 = math.rsqrt %24 : vector<16x1xf32>
    %26 = vector.broadcast %25 : vector<16x1xf32> to vector<16x32xf32>
    %27 = arith.mulf %22, %26 : vector<16x32xf32>
    %28 = vector.broadcast %8 : vector<1x32xf32> to vector<16x32xf32>
    %29 = arith.mulf %27, %28 : vector<16x32xf32>
    %30 = vector.broadcast %9 : vector<1x32xf32> to vector<16x32xf32>
    %31 = arith.addf %29, %30 : vector<16x32xf32>
    %c0_12 = arith.constant 0 : index
    %c0_13 = arith.constant 0 : index
    %32 = vector.load %arg6[%c0_12, %c0_13] : memref<64x96xbf16, #tpu.memory_space<vmem>>, vector<32x96xbf16>
    %33 = arith.truncf %31 : vector<16x32xf32> to vector<16x32xbf16>
    %cst_14 = arith.constant dense<0.000000e+00> : vector<16x96xf32>
    %34 = tpu.matmul %33, %32, %cst_14 {dimension_numbers = #tpu.dot_dimension_numbers<[1], [0], [0], [1], [0, 0, 1, 1], [], []>} : vector<16x32xbf16>, vector<32x96xbf16>, vector<16x96xf32> -> vector<16x96xf32>
    %c0_15 = arith.constant 0 : index
    %c0_16 = arith.constant 0 : index
    %35 = vector.load %arg7[%c0_15, %c0_16] : memref<2x96xf32, #tpu.memory_space<vmem>>, vector<1x96xf32>
    %36 = vector.broadcast %35 : vector<1x96xf32> to vector<16x96xf32>
    %37 = arith.addf %34, %36 : vector<16x96xf32>
    %38 = vector.extract_strided_slice %37 {offsets = [0, 0], sizes = [16, 8], strides = [1, 1]} : vector<16x96xf32> to vector<16x8xf32>
    %39 = vector.extract_strided_slice %37 {offsets = [0, 8], sizes = [16, 8], strides = [1, 1]} : vector<16x96xf32> to vector<16x8xf32>
    %40 = vector.extract_strided_slice %37 {offsets = [0, 16], sizes = [16, 8], strides = [1, 1]} : vector<16x96xf32> to vector<16x8xf32>
    %41 = vector.extract_strided_slice %37 {offsets = [0, 24], sizes = [16, 8], strides = [1, 1]} : vector<16x96xf32> to vector<16x8xf32>
    %42 = tpu.concatenate %38, %39, %40, %41 in 0 : vector<16x8xf32>, vector<16x8xf32>, vector<16x8xf32>, vector<16x8xf32> -> vector<64x8xf32>
    %43 = vector.extract_strided_slice %37 {offsets = [0, 32], sizes = [16, 8], strides = [1, 1]} : vector<16x96xf32> to vector<16x8xf32>
    %44 = vector.extract_strided_slice %37 {offsets = [0, 40], sizes = [16, 8], strides = [1, 1]} : vector<16x96xf32> to vector<16x8xf32>
    %45 = vector.extract_strided_slice %37 {offsets = [0, 48], sizes = [16, 8], strides = [1, 1]} : vector<16x96xf32> to vector<16x8xf32>
    %46 = vector.extract_strided_slice %37 {offsets = [0, 56], sizes = [16, 8], strides = [1, 1]} : vector<16x96xf32> to vector<16x8xf32>
    %47 = tpu.concatenate %43, %44, %45, %46 in 0 : vector<16x8xf32>, vector<16x8xf32>, vector<16x8xf32>, vector<16x8xf32> -> vector<64x8xf32>
    %48 = vector.extract_strided_slice %37 {offsets = [0, 64], sizes = [16, 8], strides = [1, 1]} : vector<16x96xf32> to vector<16x8xf32>
    %49 = vector.extract_strided_slice %37 {offsets = [0, 72], sizes = [16, 8], strides = [1, 1]} : vector<16x96xf32> to vector<16x8xf32>
    %50 = vector.extract_strided_slice %37 {offsets = [0, 80], sizes = [16, 8], strides = [1, 1]} : vector<16x96xf32> to vector<16x8xf32>
    %51 = vector.extract_strided_slice %37 {offsets = [0, 88], sizes = [16, 8], strides = [1, 1]} : vector<16x96xf32> to vector<16x8xf32>
    %52 = tpu.concatenate %48, %49, %50, %51 in 0 : vector<16x8xf32>, vector<16x8xf32>, vector<16x8xf32>, vector<16x8xf32> -> vector<64x8xf32>
    %53 = arith.truncf %42 : vector<64x8xf32> to vector<64x8xbf16>
    %54 = arith.truncf %47 : vector<64x8xf32> to vector<64x8xbf16>
    %cst_17 = arith.constant dense<0.000000e+00> : vector<64x64xf32>
    %55 = tpu.matmul %53, %54, %cst_17 {dimension_numbers = #tpu.dot_dimension_numbers<[1], [1], [0], [0], [0, 0, 1, 0], [], []>} : vector<64x8xbf16>, vector<64x8xbf16>, vector<64x64xf32> -> vector<64x64xf32>
    %cst_18 = arith.constant 0.353553385 : f32
    %56 = vector.broadcast %cst_18 : f32 to vector<64x64xf32>
    %57 = arith.mulf %55, %56 : vector<64x64xf32>
    %c0_19 = arith.constant 0 : index
    %c0_20 = arith.constant 0 : index
    %58 = vector.load %arg3[%c0_19, %c0_20] : memref<128x64xf32, #tpu.memory_space<vmem>>, vector<64x64xf32>
    %59 = arith.addf %57, %58 : vector<64x64xf32>
    %cst_21 = arith.constant dense<0xFF800000> : vector<64xf32>
    %60 = vector.multi_reduction <maximumf>, %59, %cst_21 [1] : vector<64x64xf32> to vector<64xf32>
    %61 = vector.shape_cast %60 : vector<64xf32> to vector<64x1xf32>
    %62 = vector.broadcast %61 : vector<64x1xf32> to vector<64x64xf32>
    %63 = arith.subf %59, %62 : vector<64x64xf32>
    %64 = math.exp %63 : vector<64x64xf32>
    %cst_22 = arith.constant dense<0.000000e+00> : vector<64xf32>
    %65 = vector.multi_reduction <add>, %64, %cst_22 [1] : vector<64x64xf32> to vector<64xf32>
    %66 = vector.shape_cast %65 : vector<64xf32> to vector<64x1xf32>
    %67 = tpu.reciprocal %66 {approx = true} : vector<64x1xf32> -> vector<64x1xf32>
    %68 = vector.broadcast %67 : vector<64x1xf32> to vector<64x64xf32>
    %69 = arith.mulf %64, %68 : vector<64x64xf32>
    %70 = arith.truncf %69 : vector<64x64xf32> to vector<64x64xbf16>
    %71 = arith.truncf %52 : vector<64x8xf32> to vector<64x8xbf16>
    %cst_23 = arith.constant dense<0.000000e+00> : vector<64x8xf32>
    %72 = tpu.matmul %70, %71, %cst_23 {dimension_numbers = #tpu.dot_dimension_numbers<[1], [0], [0], [1], [0, 0, 1, 1], [], []>} : vector<64x64xbf16>, vector<64x8xbf16>, vector<64x8xf32> -> vector<64x8xf32>
    %73 = vector.extract_strided_slice %72 {offsets = [0, 0], sizes = [16, 8], strides = [1, 1]} : vector<64x8xf32> to vector<16x8xf32>
    %74 = vector.extract_strided_slice %72 {offsets = [16, 0], sizes = [16, 8], strides = [1, 1]} : vector<64x8xf32> to vector<16x8xf32>
    %75 = vector.extract_strided_slice %72 {offsets = [32, 0], sizes = [16, 8], strides = [1, 1]} : vector<64x8xf32> to vector<16x8xf32>
    %76 = vector.extract_strided_slice %72 {offsets = [48, 0], sizes = [16, 8], strides = [1, 1]} : vector<64x8xf32> to vector<16x8xf32>
    %77 = tpu.concatenate %73, %74, %75, %76 in 1 : vector<16x8xf32>, vector<16x8xf32>, vector<16x8xf32>, vector<16x8xf32> -> vector<16x32xf32>
    %c0_24 = arith.constant 0 : index
    %c0_25 = arith.constant 0 : index
    %78 = vector.load %arg8[%c0_24, %c0_25] : memref<64x32xbf16, #tpu.memory_space<vmem>>, vector<32x32xbf16>
    %79 = arith.truncf %77 : vector<16x32xf32> to vector<16x32xbf16>
    %cst_26 = arith.constant dense<0.000000e+00> : vector<16x32xf32>
    %80 = tpu.matmul %79, %78, %cst_26 {dimension_numbers = #tpu.dot_dimension_numbers<[1], [0], [0], [1], [0, 0, 1, 1], [], []>} : vector<16x32xbf16>, vector<32x32xbf16>, vector<16x32xf32> -> vector<16x32xf32>
    %81 = arith.addf %7, %80 : vector<16x32xf32>
    %c0_27 = arith.constant 0 : index
    %c0_28 = arith.constant 0 : index
    %82 = vector.load %arg9[%c0_27, %c0_28] : memref<2x32xf32, #tpu.memory_space<vmem>>, vector<1x32xf32>
    %83 = vector.broadcast %82 : vector<1x32xf32> to vector<16x32xf32>
    %84 = arith.addf %81, %83 : vector<16x32xf32>
    %c0_29 = arith.constant 0 : index
    %c0_30 = arith.constant 0 : index
    %85 = vector.load %arg10[%c0_29, %c0_30] : memref<2x32xf32, #tpu.memory_space<vmem>>, vector<1x32xf32>
    %c0_31 = arith.constant 0 : index
    %c0_32 = arith.constant 0 : index
    %86 = vector.load %arg11[%c0_31, %c0_32] : memref<2x32xf32, #tpu.memory_space<vmem>>, vector<1x32xf32>
    %cst_33 = arith.constant dense<0.000000e+00> : vector<16xf32>
    %87 = vector.multi_reduction <add>, %84, %cst_33 [1] : vector<16x32xf32> to vector<16xf32>
    %88 = vector.shape_cast %87 : vector<16xf32> to vector<16x1xf32>
    %cst_34 = arith.constant 3.200000e+01 : f32
    %89 = vector.broadcast %cst_34 : f32 to vector<16x1xf32>
    %90 = arith.divf %88, %89 : vector<16x1xf32>
    %91 = vector.broadcast %90 : vector<16x1xf32> to vector<16x32xf32>
    %92 = arith.subf %84, %91 : vector<16x32xf32>
    %93 = arith.mulf %92, %92 : vector<16x32xf32>
    %cst_35 = arith.constant dense<0.000000e+00> : vector<16xf32>
    %94 = vector.multi_reduction <add>, %93, %cst_35 [1] : vector<16x32xf32> to vector<16xf32>
    %95 = vector.shape_cast %94 : vector<16xf32> to vector<16x1xf32>
    %cst_36 = arith.constant 3.200000e+01 : f32
    %96 = vector.broadcast %cst_36 : f32 to vector<16x1xf32>
    %97 = arith.divf %95, %96 : vector<16x1xf32>
    %98 = vector.broadcast %90 : vector<16x1xf32> to vector<16x32xf32>
    %99 = arith.subf %84, %98 : vector<16x32xf32>
    %cst_37 = arith.constant 9.99999974E-6 : f32
    %100 = vector.broadcast %cst_37 : f32 to vector<16x1xf32>
    %101 = arith.addf %97, %100 : vector<16x1xf32>
    %102 = math.rsqrt %101 : vector<16x1xf32>
    %103 = vector.broadcast %102 : vector<16x1xf32> to vector<16x32xf32>
    %104 = arith.mulf %99, %103 : vector<16x32xf32>
    %105 = vector.broadcast %85 : vector<1x32xf32> to vector<16x32xf32>
    %106 = arith.mulf %104, %105 : vector<16x32xf32>
    %107 = vector.broadcast %86 : vector<1x32xf32> to vector<16x32xf32>
    %108 = arith.addf %106, %107 : vector<16x32xf32>
    %c0_38 = arith.constant 0 : index
    %c0_39 = arith.constant 0 : index
    %109 = vector.load %arg12[%c0_38, %c0_39] : memref<64x128xbf16, #tpu.memory_space<vmem>>, vector<32x128xbf16>
    %110 = arith.truncf %108 : vector<16x32xf32> to vector<16x32xbf16>
    %cst_40 = arith.constant dense<0.000000e+00> : vector<16x128xf32>
    %111 = tpu.matmul %110, %109, %cst_40 {dimension_numbers = #tpu.dot_dimension_numbers<[1], [0], [0], [1], [0, 0, 1, 1], [], []>} : vector<16x32xbf16>, vector<32x128xbf16>, vector<16x128xf32> -> vector<16x128xf32>
    %c0_41 = arith.constant 0 : index
    %c0_42 = arith.constant 0 : index
    %112 = vector.load %arg13[%c0_41, %c0_42] : memref<2x128xf32, #tpu.memory_space<vmem>>, vector<1x128xf32>
    %113 = vector.broadcast %112 : vector<1x128xf32> to vector<16x128xf32>
    %114 = arith.addf %111, %113 : vector<16x128xf32>
    %cst_43 = arith.constant 5.000000e-01 : f32
    %115 = vector.broadcast %cst_43 : f32 to vector<16x128xf32>
    %116 = arith.mulf %115, %114 : vector<16x128xf32>
    %cst_44 = arith.constant 4.471500e-02 : f32
    %117 = vector.broadcast %cst_44 : f32 to vector<16x128xf32>
    %118 = arith.mulf %117, %114 : vector<16x128xf32>
    %119 = arith.mulf %118, %114 : vector<16x128xf32>
    %120 = arith.mulf %119, %114 : vector<16x128xf32>
    %121 = arith.addf %114, %120 : vector<16x128xf32>
    %cst_45 = arith.constant 0.797884583 : f32
    %122 = vector.broadcast %cst_45 : f32 to vector<16x128xf32>
    %123 = arith.mulf %122, %121 : vector<16x128xf32>
    %124 = math.tanh %123 : vector<16x128xf32>
    %cst_46 = arith.constant 1.000000e+00 : f32
    %125 = vector.broadcast %cst_46 : f32 to vector<16x128xf32>
    %126 = arith.addf %125, %124 : vector<16x128xf32>
    %127 = arith.mulf %116, %126 : vector<16x128xf32>
    %c0_47 = arith.constant 0 : index
    %c0_48 = arith.constant 0 : index
    %128 = vector.load %arg14[%c0_47, %c0_48] : memref<256x32xbf16, #tpu.memory_space<vmem>>, vector<128x32xbf16>
    %129 = arith.truncf %127 : vector<16x128xf32> to vector<16x128xbf16>
    %cst_49 = arith.constant dense<0.000000e+00> : vector<16x32xf32>
    %130 = tpu.matmul %129, %128, %cst_49 {dimension_numbers = #tpu.dot_dimension_numbers<[1], [0], [0], [1], [0, 0, 1, 1], [], []>} : vector<16x128xbf16>, vector<128x32xbf16>, vector<16x32xf32> -> vector<16x32xf32>
    %131 = arith.addf %84, %130 : vector<16x32xf32>
    %c0_50 = arith.constant 0 : index
    %c0_51 = arith.constant 0 : index
    %132 = vector.load %arg15[%c0_50, %c0_51] : memref<2x32xf32, #tpu.memory_space<vmem>>, vector<1x32xf32>
    %133 = vector.broadcast %132 : vector<1x32xf32> to vector<16x32xf32>
    %134 = arith.addf %131, %133 : vector<16x32xf32>
    %c1 = arith.constant 1 : index
    %c0_52 = arith.constant 0 : index
    %135 = vector.load %arg4[%c1, %c0_52] : memref<2x32xf32, #tpu.memory_space<vmem>>, vector<1x32xf32>
    %c1_53 = arith.constant 1 : index
    %c0_54 = arith.constant 0 : index
    %136 = vector.load %arg5[%c1_53, %c0_54] : memref<2x32xf32, #tpu.memory_space<vmem>>, vector<1x32xf32>
    %cst_55 = arith.constant dense<0.000000e+00> : vector<16xf32>
    %137 = vector.multi_reduction <add>, %134, %cst_55 [1] : vector<16x32xf32> to vector<16xf32>
    %138 = vector.shape_cast %137 : vector<16xf32> to vector<16x1xf32>
    %cst_56 = arith.constant 3.200000e+01 : f32
    %139 = vector.broadcast %cst_56 : f32 to vector<16x1xf32>
    %140 = arith.divf %138, %139 : vector<16x1xf32>
    %141 = vector.broadcast %140 : vector<16x1xf32> to vector<16x32xf32>
    %142 = arith.subf %134, %141 : vector<16x32xf32>
    %143 = arith.mulf %142, %142 : vector<16x32xf32>
    %cst_57 = arith.constant dense<0.000000e+00> : vector<16xf32>
    %144 = vector.multi_reduction <add>, %143, %cst_57 [1] : vector<16x32xf32> to vector<16xf32>
    %145 = vector.shape_cast %144 : vector<16xf32> to vector<16x1xf32>
    %cst_58 = arith.constant 3.200000e+01 : f32
    %146 = vector.broadcast %cst_58 : f32 to vector<16x1xf32>
    %147 = arith.divf %145, %146 : vector<16x1xf32>
    %148 = vector.broadcast %140 : vector<16x1xf32> to vector<16x32xf32>
    %149 = arith.subf %134, %148 : vector<16x32xf32>
    %cst_59 = arith.constant 9.99999974E-6 : f32
    %150 = vector.broadcast %cst_59 : f32 to vector<16x1xf32>
    %151 = arith.addf %147, %150 : vector<16x1xf32>
    %152 = math.rsqrt %151 : vector<16x1xf32>
    %153 = vector.broadcast %152 : vector<16x1xf32> to vector<16x32xf32>
    %154 = arith.mulf %149, %153 : vector<16x32xf32>
    %155 = vector.broadcast %135 : vector<1x32xf32> to vector<16x32xf32>
    %156 = arith.mulf %154, %155 : vector<16x32xf32>
    %157 = vector.broadcast %136 : vector<1x32xf32> to vector<16x32xf32>
    %158 = arith.addf %156, %157 : vector<16x32xf32>
    %c32 = arith.constant 32 : index
    %c0_60 = arith.constant 0 : index
    %159 = vector.load %arg6[%c32, %c0_60] : memref<64x96xbf16, #tpu.memory_space<vmem>>, vector<32x96xbf16>
    %160 = arith.truncf %158 : vector<16x32xf32> to vector<16x32xbf16>
    %cst_61 = arith.constant dense<0.000000e+00> : vector<16x96xf32>
    %161 = tpu.matmul %160, %159, %cst_61 {dimension_numbers = #tpu.dot_dimension_numbers<[1], [0], [0], [1], [0, 0, 1, 1], [], []>} : vector<16x32xbf16>, vector<32x96xbf16>, vector<16x96xf32> -> vector<16x96xf32>
    %c1_62 = arith.constant 1 : index
    %c0_63 = arith.constant 0 : index
    %162 = vector.load %arg7[%c1_62, %c0_63] : memref<2x96xf32, #tpu.memory_space<vmem>>, vector<1x96xf32>
    %163 = vector.broadcast %162 : vector<1x96xf32> to vector<16x96xf32>
    %164 = arith.addf %161, %163 : vector<16x96xf32>
    %165 = vector.extract_strided_slice %164 {offsets = [0, 0], sizes = [16, 8], strides = [1, 1]} : vector<16x96xf32> to vector<16x8xf32>
    %166 = vector.extract_strided_slice %164 {offsets = [0, 8], sizes = [16, 8], strides = [1, 1]} : vector<16x96xf32> to vector<16x8xf32>
    %167 = vector.extract_strided_slice %164 {offsets = [0, 16], sizes = [16, 8], strides = [1, 1]} : vector<16x96xf32> to vector<16x8xf32>
    %168 = vector.extract_strided_slice %164 {offsets = [0, 24], sizes = [16, 8], strides = [1, 1]} : vector<16x96xf32> to vector<16x8xf32>
    %169 = tpu.concatenate %165, %166, %167, %168 in 0 : vector<16x8xf32>, vector<16x8xf32>, vector<16x8xf32>, vector<16x8xf32> -> vector<64x8xf32>
    %170 = vector.extract_strided_slice %164 {offsets = [0, 32], sizes = [16, 8], strides = [1, 1]} : vector<16x96xf32> to vector<16x8xf32>
    %171 = vector.extract_strided_slice %164 {offsets = [0, 40], sizes = [16, 8], strides = [1, 1]} : vector<16x96xf32> to vector<16x8xf32>
    %172 = vector.extract_strided_slice %164 {offsets = [0, 48], sizes = [16, 8], strides = [1, 1]} : vector<16x96xf32> to vector<16x8xf32>
    %173 = vector.extract_strided_slice %164 {offsets = [0, 56], sizes = [16, 8], strides = [1, 1]} : vector<16x96xf32> to vector<16x8xf32>
    %174 = tpu.concatenate %170, %171, %172, %173 in 0 : vector<16x8xf32>, vector<16x8xf32>, vector<16x8xf32>, vector<16x8xf32> -> vector<64x8xf32>
    %175 = vector.extract_strided_slice %164 {offsets = [0, 64], sizes = [16, 8], strides = [1, 1]} : vector<16x96xf32> to vector<16x8xf32>
    %176 = vector.extract_strided_slice %164 {offsets = [0, 72], sizes = [16, 8], strides = [1, 1]} : vector<16x96xf32> to vector<16x8xf32>
    %177 = vector.extract_strided_slice %164 {offsets = [0, 80], sizes = [16, 8], strides = [1, 1]} : vector<16x96xf32> to vector<16x8xf32>
    %178 = vector.extract_strided_slice %164 {offsets = [0, 88], sizes = [16, 8], strides = [1, 1]} : vector<16x96xf32> to vector<16x8xf32>
    %179 = tpu.concatenate %175, %176, %177, %178 in 0 : vector<16x8xf32>, vector<16x8xf32>, vector<16x8xf32>, vector<16x8xf32> -> vector<64x8xf32>
    %180 = arith.truncf %169 : vector<64x8xf32> to vector<64x8xbf16>
    %181 = arith.truncf %174 : vector<64x8xf32> to vector<64x8xbf16>
    %cst_64 = arith.constant dense<0.000000e+00> : vector<64x64xf32>
    %182 = tpu.matmul %180, %181, %cst_64 {dimension_numbers = #tpu.dot_dimension_numbers<[1], [1], [0], [0], [0, 0, 1, 0], [], []>} : vector<64x8xbf16>, vector<64x8xbf16>, vector<64x64xf32> -> vector<64x64xf32>
    %cst_65 = arith.constant 0.353553385 : f32
    %183 = vector.broadcast %cst_65 : f32 to vector<64x64xf32>
    %184 = arith.mulf %182, %183 : vector<64x64xf32>
    %c64 = arith.constant 64 : index
    %c0_66 = arith.constant 0 : index
    %185 = vector.load %arg3[%c64, %c0_66] : memref<128x64xf32, #tpu.memory_space<vmem>>, vector<64x64xf32>
    %186 = arith.addf %184, %185 : vector<64x64xf32>
    %cst_67 = arith.constant dense<0xFF800000> : vector<64xf32>
    %187 = vector.multi_reduction <maximumf>, %186, %cst_67 [1] : vector<64x64xf32> to vector<64xf32>
    %188 = vector.shape_cast %187 : vector<64xf32> to vector<64x1xf32>
    %189 = vector.broadcast %188 : vector<64x1xf32> to vector<64x64xf32>
    %190 = arith.subf %186, %189 : vector<64x64xf32>
    %191 = math.exp %190 : vector<64x64xf32>
    %cst_68 = arith.constant dense<0.000000e+00> : vector<64xf32>
    %192 = vector.multi_reduction <add>, %191, %cst_68 [1] : vector<64x64xf32> to vector<64xf32>
    %193 = vector.shape_cast %192 : vector<64xf32> to vector<64x1xf32>
    %194 = tpu.reciprocal %193 {approx = true} : vector<64x1xf32> -> vector<64x1xf32>
    %195 = vector.broadcast %194 : vector<64x1xf32> to vector<64x64xf32>
    %196 = arith.mulf %191, %195 : vector<64x64xf32>
    %197 = arith.truncf %196 : vector<64x64xf32> to vector<64x64xbf16>
    %198 = arith.truncf %179 : vector<64x8xf32> to vector<64x8xbf16>
    %cst_69 = arith.constant dense<0.000000e+00> : vector<64x8xf32>
    %199 = tpu.matmul %197, %198, %cst_69 {dimension_numbers = #tpu.dot_dimension_numbers<[1], [0], [0], [1], [0, 0, 1, 1], [], []>} : vector<64x64xbf16>, vector<64x8xbf16>, vector<64x8xf32> -> vector<64x8xf32>
    %200 = vector.extract_strided_slice %199 {offsets = [0, 0], sizes = [16, 8], strides = [1, 1]} : vector<64x8xf32> to vector<16x8xf32>
    %201 = vector.extract_strided_slice %199 {offsets = [16, 0], sizes = [16, 8], strides = [1, 1]} : vector<64x8xf32> to vector<16x8xf32>
    %202 = vector.extract_strided_slice %199 {offsets = [32, 0], sizes = [16, 8], strides = [1, 1]} : vector<64x8xf32> to vector<16x8xf32>
    %203 = vector.extract_strided_slice %199 {offsets = [48, 0], sizes = [16, 8], strides = [1, 1]} : vector<64x8xf32> to vector<16x8xf32>
    %204 = tpu.concatenate %200, %201, %202, %203 in 1 : vector<16x8xf32>, vector<16x8xf32>, vector<16x8xf32>, vector<16x8xf32> -> vector<16x32xf32>
    %c32_70 = arith.constant 32 : index
    %c0_71 = arith.constant 0 : index
    %205 = vector.load %arg8[%c32_70, %c0_71] : memref<64x32xbf16, #tpu.memory_space<vmem>>, vector<32x32xbf16>
    %206 = arith.truncf %204 : vector<16x32xf32> to vector<16x32xbf16>
    %cst_72 = arith.constant dense<0.000000e+00> : vector<16x32xf32>
    %207 = tpu.matmul %206, %205, %cst_72 {dimension_numbers = #tpu.dot_dimension_numbers<[1], [0], [0], [1], [0, 0, 1, 1], [], []>} : vector<16x32xbf16>, vector<32x32xbf16>, vector<16x32xf32> -> vector<16x32xf32>
    %208 = arith.addf %134, %207 : vector<16x32xf32>
    %c1_73 = arith.constant 1 : index
    %c0_74 = arith.constant 0 : index
    %209 = vector.load %arg9[%c1_73, %c0_74] : memref<2x32xf32, #tpu.memory_space<vmem>>, vector<1x32xf32>
    %210 = vector.broadcast %209 : vector<1x32xf32> to vector<16x32xf32>
    %211 = arith.addf %208, %210 : vector<16x32xf32>
    %c1_75 = arith.constant 1 : index
    %c0_76 = arith.constant 0 : index
    %212 = vector.load %arg10[%c1_75, %c0_76] : memref<2x32xf32, #tpu.memory_space<vmem>>, vector<1x32xf32>
    %c1_77 = arith.constant 1 : index
    %c0_78 = arith.constant 0 : index
    %213 = vector.load %arg11[%c1_77, %c0_78] : memref<2x32xf32, #tpu.memory_space<vmem>>, vector<1x32xf32>
    %cst_79 = arith.constant dense<0.000000e+00> : vector<16xf32>
    %214 = vector.multi_reduction <add>, %211, %cst_79 [1] : vector<16x32xf32> to vector<16xf32>
    %215 = vector.shape_cast %214 : vector<16xf32> to vector<16x1xf32>
    %cst_80 = arith.constant 3.200000e+01 : f32
    %216 = vector.broadcast %cst_80 : f32 to vector<16x1xf32>
    %217 = arith.divf %215, %216 : vector<16x1xf32>
    %218 = vector.broadcast %217 : vector<16x1xf32> to vector<16x32xf32>
    %219 = arith.subf %211, %218 : vector<16x32xf32>
    %220 = arith.mulf %219, %219 : vector<16x32xf32>
    %cst_81 = arith.constant dense<0.000000e+00> : vector<16xf32>
    %221 = vector.multi_reduction <add>, %220, %cst_81 [1] : vector<16x32xf32> to vector<16xf32>
    %222 = vector.shape_cast %221 : vector<16xf32> to vector<16x1xf32>
    %cst_82 = arith.constant 3.200000e+01 : f32
    %223 = vector.broadcast %cst_82 : f32 to vector<16x1xf32>
    %224 = arith.divf %222, %223 : vector<16x1xf32>
    %225 = vector.broadcast %217 : vector<16x1xf32> to vector<16x32xf32>
    %226 = arith.subf %211, %225 : vector<16x32xf32>
    %cst_83 = arith.constant 9.99999974E-6 : f32
    %227 = vector.broadcast %cst_83 : f32 to vector<16x1xf32>
    %228 = arith.addf %224, %227 : vector<16x1xf32>
    %229 = math.rsqrt %228 : vector<16x1xf32>
    %230 = vector.broadcast %229 : vector<16x1xf32> to vector<16x32xf32>
    %231 = arith.mulf %226, %230 : vector<16x32xf32>
    %232 = vector.broadcast %212 : vector<1x32xf32> to vector<16x32xf32>
    %233 = arith.mulf %231, %232 : vector<16x32xf32>
    %234 = vector.broadcast %213 : vector<1x32xf32> to vector<16x32xf32>
    %235 = arith.addf %233, %234 : vector<16x32xf32>
    %c32_84 = arith.constant 32 : index
    %c0_85 = arith.constant 0 : index
    %236 = vector.load %arg12[%c32_84, %c0_85] : memref<64x128xbf16, #tpu.memory_space<vmem>>, vector<32x128xbf16>
    %237 = arith.truncf %235 : vector<16x32xf32> to vector<16x32xbf16>
    %cst_86 = arith.constant dense<0.000000e+00> : vector<16x128xf32>
    %238 = tpu.matmul %237, %236, %cst_86 {dimension_numbers = #tpu.dot_dimension_numbers<[1], [0], [0], [1], [0, 0, 1, 1], [], []>} : vector<16x32xbf16>, vector<32x128xbf16>, vector<16x128xf32> -> vector<16x128xf32>
    %c1_87 = arith.constant 1 : index
    %c0_88 = arith.constant 0 : index
    %239 = vector.load %arg13[%c1_87, %c0_88] : memref<2x128xf32, #tpu.memory_space<vmem>>, vector<1x128xf32>
    %240 = vector.broadcast %239 : vector<1x128xf32> to vector<16x128xf32>
    %241 = arith.addf %238, %240 : vector<16x128xf32>
    %cst_89 = arith.constant 5.000000e-01 : f32
    %242 = vector.broadcast %cst_89 : f32 to vector<16x128xf32>
    %243 = arith.mulf %242, %241 : vector<16x128xf32>
    %cst_90 = arith.constant 4.471500e-02 : f32
    %244 = vector.broadcast %cst_90 : f32 to vector<16x128xf32>
    %245 = arith.mulf %244, %241 : vector<16x128xf32>
    %246 = arith.mulf %245, %241 : vector<16x128xf32>
    %247 = arith.mulf %246, %241 : vector<16x128xf32>
    %248 = arith.addf %241, %247 : vector<16x128xf32>
    %cst_91 = arith.constant 0.797884583 : f32
    %249 = vector.broadcast %cst_91 : f32 to vector<16x128xf32>
    %250 = arith.mulf %249, %248 : vector<16x128xf32>
    %251 = math.tanh %250 : vector<16x128xf32>
    %cst_92 = arith.constant 1.000000e+00 : f32
    %252 = vector.broadcast %cst_92 : f32 to vector<16x128xf32>
    %253 = arith.addf %252, %251 : vector<16x128xf32>
    %254 = arith.mulf %243, %253 : vector<16x128xf32>
    %c128 = arith.constant 128 : index
    %c0_93 = arith.constant 0 : index
    %255 = vector.load %arg14[%c128, %c0_93] : memref<256x32xbf16, #tpu.memory_space<vmem>>, vector<128x32xbf16>
    %256 = arith.truncf %254 : vector<16x128xf32> to vector<16x128xbf16>
    %cst_94 = arith.constant dense<0.000000e+00> : vector<16x32xf32>
    %257 = tpu.matmul %256, %255, %cst_94 {dimension_numbers = #tpu.dot_dimension_numbers<[1], [0], [0], [1], [0, 0, 1, 1], [], []>} : vector<16x128xbf16>, vector<128x32xbf16>, vector<16x32xf32> -> vector<16x32xf32>
    %258 = arith.addf %211, %257 : vector<16x32xf32>
    %c1_95 = arith.constant 1 : index
    %c0_96 = arith.constant 0 : index
    %259 = vector.load %arg15[%c1_95, %c0_96] : memref<2x32xf32, #tpu.memory_space<vmem>>, vector<1x32xf32>
    %260 = vector.broadcast %259 : vector<1x32xf32> to vector<16x32xf32>
    %261 = arith.addf %258, %260 : vector<16x32xf32>
    %c0_97 = arith.constant 0 : index
    %c0_98 = arith.constant 0 : index
    %262 = vector.load %arg16[%c0_97, %c0_98] : memref<1x32xf32, #tpu.memory_space<vmem>>, vector<1x32xf32>
    %c0_99 = arith.constant 0 : index
    %c0_100 = arith.constant 0 : index
    %263 = vector.load %arg17[%c0_99, %c0_100] : memref<1x32xf32, #tpu.memory_space<vmem>>, vector<1x32xf32>
    %cst_101 = arith.constant dense<0.000000e+00> : vector<16xf32>
    %264 = vector.multi_reduction <add>, %261, %cst_101 [1] : vector<16x32xf32> to vector<16xf32>
    %265 = vector.shape_cast %264 : vector<16xf32> to vector<16x1xf32>
    %cst_102 = arith.constant 3.200000e+01 : f32
    %266 = vector.broadcast %cst_102 : f32 to vector<16x1xf32>
    %267 = arith.divf %265, %266 : vector<16x1xf32>
    %268 = vector.broadcast %267 : vector<16x1xf32> to vector<16x32xf32>
    %269 = arith.subf %261, %268 : vector<16x32xf32>
    %270 = arith.mulf %269, %269 : vector<16x32xf32>
    %cst_103 = arith.constant dense<0.000000e+00> : vector<16xf32>
    %271 = vector.multi_reduction <add>, %270, %cst_103 [1] : vector<16x32xf32> to vector<16xf32>
    %272 = vector.shape_cast %271 : vector<16xf32> to vector<16x1xf32>
    %cst_104 = arith.constant 3.200000e+01 : f32
    %273 = vector.broadcast %cst_104 : f32 to vector<16x1xf32>
    %274 = arith.divf %272, %273 : vector<16x1xf32>
    %275 = vector.broadcast %267 : vector<16x1xf32> to vector<16x32xf32>
    %276 = arith.subf %261, %275 : vector<16x32xf32>
    %cst_105 = arith.constant 9.99999974E-6 : f32
    %277 = vector.broadcast %cst_105 : f32 to vector<16x1xf32>
    %278 = arith.addf %274, %277 : vector<16x1xf32>
    %279 = math.rsqrt %278 : vector<16x1xf32>
    %280 = vector.broadcast %279 : vector<16x1xf32> to vector<16x32xf32>
    %281 = arith.mulf %276, %280 : vector<16x32xf32>
    %282 = vector.broadcast %262 : vector<1x32xf32> to vector<16x32xf32>
    %283 = arith.mulf %281, %282 : vector<16x32xf32>
    %284 = vector.broadcast %263 : vector<1x32xf32> to vector<16x32xf32>
    %285 = arith.addf %283, %284 : vector<16x32xf32>
    %286 = tpu.concatenate %285, %7 in 0 : vector<16x32xf32>, vector<16x32xf32> -> vector<32x32xf32>
    %c0_106 = arith.constant 0 : index
    %c0_107 = arith.constant 0 : index
    %287 = vector.load %arg18[%c0_106, %c0_107] : memref<64x32xf32, #tpu.memory_space<vmem>>, vector<64x32xf32>
    %cst_108 = arith.constant dense<0.000000e+00> : vector<64x32xf32>
    %288 = tpu.matmul %287, %286, %cst_108 {dimension_numbers = #tpu.dot_dimension_numbers<[1], [0], [0], [1], [0, 0, 1, 1], [], []>} : vector<64x32xf32>, vector<32x32xf32>, vector<64x32xf32> -> vector<64x32xf32>
    %289 = vector.extract_strided_slice %288 {offsets = [0, 0], sizes = [16, 32], strides = [1, 1]} : vector<64x32xf32> to vector<16x32xf32>
    %290 = vector.extract_strided_slice %288 {offsets = [16, 0], sizes = [16, 32], strides = [1, 1]} : vector<64x32xf32> to vector<16x32xf32>
    %291 = vector.extract_strided_slice %288 {offsets = [32, 0], sizes = [16, 32], strides = [1, 1]} : vector<64x32xf32> to vector<16x32xf32>
    %292 = vector.extract_strided_slice %288 {offsets = [48, 0], sizes = [16, 32], strides = [1, 1]} : vector<64x32xf32> to vector<16x32xf32>
    %293 = tpu.concatenate %290, %291, %292 in 1 : vector<16x32xf32>, vector<16x32xf32>, vector<16x32xf32> -> vector<16x96xf32>
    %c0_109 = arith.constant 0 : index
    %c0_110 = arith.constant 0 : index
    %294 = vector.load %arg19[%c0_109, %c0_110] : memref<32x32xbf16, #tpu.memory_space<vmem>>, vector<32x32xbf16>
    %295 = arith.truncf %289 : vector<16x32xf32> to vector<16x32xbf16>
    %cst_111 = arith.constant dense<0.000000e+00> : vector<16x32xf32>
    %296 = tpu.matmul %295, %294, %cst_111 {dimension_numbers = #tpu.dot_dimension_numbers<[1], [0], [0], [1], [0, 0, 1, 1], [], []>} : vector<16x32xbf16>, vector<32x32xbf16>, vector<16x32xf32> -> vector<16x32xf32>
    %c0_112 = arith.constant 0 : index
    %c0_113 = arith.constant 0 : index
    %297 = vector.load %arg20[%c0_112, %c0_113] : memref<1x32xf32, #tpu.memory_space<vmem>>, vector<1x32xf32>
    %298 = vector.broadcast %297 : vector<1x32xf32> to vector<16x32xf32>
    %299 = arith.addf %296, %298 : vector<16x32xf32>
    %cst_114 = arith.constant 5.000000e-01 : f32
    %300 = vector.broadcast %cst_114 : f32 to vector<16x32xf32>
    %301 = arith.mulf %300, %299 : vector<16x32xf32>
    %cst_115 = arith.constant 4.471500e-02 : f32
    %302 = vector.broadcast %cst_115 : f32 to vector<16x32xf32>
    %303 = arith.mulf %302, %299 : vector<16x32xf32>
    %304 = arith.mulf %303, %299 : vector<16x32xf32>
    %305 = arith.mulf %304, %299 : vector<16x32xf32>
    %306 = arith.addf %299, %305 : vector<16x32xf32>
    %cst_116 = arith.constant 0.797884583 : f32
    %307 = vector.broadcast %cst_116 : f32 to vector<16x32xf32>
    %308 = arith.mulf %307, %306 : vector<16x32xf32>
    %309 = math.tanh %308 : vector<16x32xf32>
    %cst_117 = arith.constant 1.000000e+00 : f32
    %310 = vector.broadcast %cst_117 : f32 to vector<16x32xf32>
    %311 = arith.addf %310, %309 : vector<16x32xf32>
    %312 = arith.mulf %301, %311 : vector<16x32xf32>
    %c0_118 = arith.constant 0 : index
    %c0_119 = arith.constant 0 : index
    %313 = vector.load %arg21[%c0_118, %c0_119] : memref<1x32xf32, #tpu.memory_space<vmem>>, vector<1x32xf32>
    %c0_120 = arith.constant 0 : index
    %c0_121 = arith.constant 0 : index
    %314 = vector.load %arg22[%c0_120, %c0_121] : memref<1x32xf32, #tpu.memory_space<vmem>>, vector<1x32xf32>
    %cst_122 = arith.constant dense<0.000000e+00> : vector<16xf32>
    %315 = vector.multi_reduction <add>, %312, %cst_122 [1] : vector<16x32xf32> to vector<16xf32>
    %316 = vector.shape_cast %315 : vector<16xf32> to vector<16x1xf32>
    %cst_123 = arith.constant 3.200000e+01 : f32
    %317 = vector.broadcast %cst_123 : f32 to vector<16x1xf32>
    %318 = arith.divf %316, %317 : vector<16x1xf32>
    %319 = vector.broadcast %318 : vector<16x1xf32> to vector<16x32xf32>
    %320 = arith.subf %312, %319 : vector<16x32xf32>
    %321 = arith.mulf %320, %320 : vector<16x32xf32>
    %cst_124 = arith.constant dense<0.000000e+00> : vector<16xf32>
    %322 = vector.multi_reduction <add>, %321, %cst_124 [1] : vector<16x32xf32> to vector<16xf32>
    %323 = vector.shape_cast %322 : vector<16xf32> to vector<16x1xf32>
    %cst_125 = arith.constant 3.200000e+01 : f32
    %324 = vector.broadcast %cst_125 : f32 to vector<16x1xf32>
    %325 = arith.divf %323, %324 : vector<16x1xf32>
    %326 = vector.broadcast %318 : vector<16x1xf32> to vector<16x32xf32>
    %327 = arith.subf %312, %326 : vector<16x32xf32>
    %cst_126 = arith.constant 9.99999974E-6 : f32
    %328 = vector.broadcast %cst_126 : f32 to vector<16x1xf32>
    %329 = arith.addf %325, %328 : vector<16x1xf32>
    %330 = math.rsqrt %329 : vector<16x1xf32>
    %331 = vector.broadcast %330 : vector<16x1xf32> to vector<16x32xf32>
    %332 = arith.mulf %327, %331 : vector<16x32xf32>
    %333 = vector.broadcast %313 : vector<1x32xf32> to vector<16x32xf32>
    %334 = arith.mulf %332, %333 : vector<16x32xf32>
    %335 = vector.broadcast %314 : vector<1x32xf32> to vector<16x32xf32>
    %336 = arith.addf %334, %335 : vector<16x32xf32>
    %c0_127 = arith.constant 0 : index
    %c0_128 = arith.constant 0 : index
    %337 = vector.load %arg23[%c0_127, %c0_128] : memref<32x6xbf16, #tpu.memory_space<vmem>>, vector<32x6xbf16>
    %338 = arith.truncf %336 : vector<16x32xf32> to vector<16x32xbf16>
    %cst_129 = arith.constant dense<0.000000e+00> : vector<16x6xf32>
    %339 = tpu.matmul %338, %337, %cst_129 {dimension_numbers = #tpu.dot_dimension_numbers<[1], [0], [0], [1], [0, 0, 1, 1], [], []>} : vector<16x32xbf16>, vector<32x6xbf16>, vector<16x6xf32> -> vector<16x6xf32>
    %c0_130 = arith.constant 0 : index
    %c0_131 = arith.constant 0 : index
    %340 = vector.load %arg24[%c0_130, %c0_131] : memref<32x32xbf16, #tpu.memory_space<vmem>>, vector<32x32xbf16>
    %341 = arith.truncf %289 : vector<16x32xf32> to vector<16x32xbf16>
    %cst_132 = arith.constant dense<0.000000e+00> : vector<16x32xf32>
    %342 = tpu.matmul %341, %340, %cst_132 {dimension_numbers = #tpu.dot_dimension_numbers<[1], [0], [0], [1], [0, 0, 1, 1], [], []>} : vector<16x32xbf16>, vector<32x32xbf16>, vector<16x32xf32> -> vector<16x32xf32>
    %c0_133 = arith.constant 0 : index
    %c0_134 = arith.constant 0 : index
    %343 = vector.load %arg25[%c0_133, %c0_134] : memref<1x32xf32, #tpu.memory_space<vmem>>, vector<1x32xf32>
    %344 = vector.broadcast %343 : vector<1x32xf32> to vector<16x32xf32>
    %345 = arith.addf %342, %344 : vector<16x32xf32>
    %cst_135 = arith.constant 5.000000e-01 : f32
    %346 = vector.broadcast %cst_135 : f32 to vector<16x32xf32>
    %347 = arith.mulf %346, %345 : vector<16x32xf32>
    %cst_136 = arith.constant 4.471500e-02 : f32
    %348 = vector.broadcast %cst_136 : f32 to vector<16x32xf32>
    %349 = arith.mulf %348, %345 : vector<16x32xf32>
    %350 = arith.mulf %349, %345 : vector<16x32xf32>
    %351 = arith.mulf %350, %345 : vector<16x32xf32>
    %352 = arith.addf %345, %351 : vector<16x32xf32>
    %cst_137 = arith.constant 0.797884583 : f32
    %353 = vector.broadcast %cst_137 : f32 to vector<16x32xf32>
    %354 = arith.mulf %353, %352 : vector<16x32xf32>
    %355 = math.tanh %354 : vector<16x32xf32>
    %cst_138 = arith.constant 1.000000e+00 : f32
    %356 = vector.broadcast %cst_138 : f32 to vector<16x32xf32>
    %357 = arith.addf %356, %355 : vector<16x32xf32>
    %358 = arith.mulf %347, %357 : vector<16x32xf32>
    %c0_139 = arith.constant 0 : index
    %c0_140 = arith.constant 0 : index
    %359 = vector.load %arg26[%c0_139, %c0_140] : memref<1x32xf32, #tpu.memory_space<vmem>>, vector<1x32xf32>
    %c0_141 = arith.constant 0 : index
    %c0_142 = arith.constant 0 : index
    %360 = vector.load %arg27[%c0_141, %c0_142] : memref<1x32xf32, #tpu.memory_space<vmem>>, vector<1x32xf32>
    %cst_143 = arith.constant dense<0.000000e+00> : vector<16xf32>
    %361 = vector.multi_reduction <add>, %358, %cst_143 [1] : vector<16x32xf32> to vector<16xf32>
    %362 = vector.shape_cast %361 : vector<16xf32> to vector<16x1xf32>
    %cst_144 = arith.constant 3.200000e+01 : f32
    %363 = vector.broadcast %cst_144 : f32 to vector<16x1xf32>
    %364 = arith.divf %362, %363 : vector<16x1xf32>
    %365 = vector.broadcast %364 : vector<16x1xf32> to vector<16x32xf32>
    %366 = arith.subf %358, %365 : vector<16x32xf32>
    %367 = arith.mulf %366, %366 : vector<16x32xf32>
    %cst_145 = arith.constant dense<0.000000e+00> : vector<16xf32>
    %368 = vector.multi_reduction <add>, %367, %cst_145 [1] : vector<16x32xf32> to vector<16xf32>
    %369 = vector.shape_cast %368 : vector<16xf32> to vector<16x1xf32>
    %cst_146 = arith.constant 3.200000e+01 : f32
    %370 = vector.broadcast %cst_146 : f32 to vector<16x1xf32>
    %371 = arith.divf %369, %370 : vector<16x1xf32>
    %372 = vector.broadcast %364 : vector<16x1xf32> to vector<16x32xf32>
    %373 = arith.subf %358, %372 : vector<16x32xf32>
    %cst_147 = arith.constant 9.99999974E-6 : f32
    %374 = vector.broadcast %cst_147 : f32 to vector<16x1xf32>
    %375 = arith.addf %371, %374 : vector<16x1xf32>
    %376 = math.rsqrt %375 : vector<16x1xf32>
    %377 = vector.broadcast %376 : vector<16x1xf32> to vector<16x32xf32>
    %378 = arith.mulf %373, %377 : vector<16x32xf32>
    %379 = vector.broadcast %359 : vector<1x32xf32> to vector<16x32xf32>
    %380 = arith.mulf %378, %379 : vector<16x32xf32>
    %381 = vector.broadcast %360 : vector<1x32xf32> to vector<16x32xf32>
    %382 = arith.addf %380, %381 : vector<16x32xf32>
    %c0_148 = arith.constant 0 : index
    %c0_149 = arith.constant 0 : index
    %383 = vector.load %arg28[%c0_148, %c0_149] : memref<32x3xbf16, #tpu.memory_space<vmem>>, vector<32x3xbf16>
    %384 = arith.truncf %382 : vector<16x32xf32> to vector<16x32xbf16>
    %cst_150 = arith.constant dense<0.000000e+00> : vector<16x3xf32>
    %385 = tpu.matmul %384, %383, %cst_150 {dimension_numbers = #tpu.dot_dimension_numbers<[1], [0], [0], [1], [0, 0, 1, 1], [], []>} : vector<16x32xbf16>, vector<32x3xbf16>, vector<16x3xf32> -> vector<16x3xf32>
    %c0_151 = arith.constant 0 : index
    %c0_152 = arith.constant 0 : index
    %386 = vector.load %arg29[%c0_151, %c0_152] : memref<96x32xbf16, #tpu.memory_space<vmem>>, vector<96x32xbf16>
    %387 = arith.truncf %293 : vector<16x96xf32> to vector<16x96xbf16>
    %cst_153 = arith.constant dense<0.000000e+00> : vector<16x32xf32>
    %388 = tpu.matmul %387, %386, %cst_153 {dimension_numbers = #tpu.dot_dimension_numbers<[1], [0], [0], [1], [0, 0, 1, 1], [], []>} : vector<16x96xbf16>, vector<96x32xbf16>, vector<16x32xf32> -> vector<16x32xf32>
    %c0_154 = arith.constant 0 : index
    %c0_155 = arith.constant 0 : index
    %389 = vector.load %arg30[%c0_154, %c0_155] : memref<1x32xf32, #tpu.memory_space<vmem>>, vector<1x32xf32>
    %390 = vector.broadcast %389 : vector<1x32xf32> to vector<16x32xf32>
    %391 = arith.addf %388, %390 : vector<16x32xf32>
    %cst_156 = arith.constant 5.000000e-01 : f32
    %392 = vector.broadcast %cst_156 : f32 to vector<16x32xf32>
    %393 = arith.mulf %392, %391 : vector<16x32xf32>
    %cst_157 = arith.constant 4.471500e-02 : f32
    %394 = vector.broadcast %cst_157 : f32 to vector<16x32xf32>
    %395 = arith.mulf %394, %391 : vector<16x32xf32>
    %396 = arith.mulf %395, %391 : vector<16x32xf32>
    %397 = arith.mulf %396, %391 : vector<16x32xf32>
    %398 = arith.addf %391, %397 : vector<16x32xf32>
    %cst_158 = arith.constant 0.797884583 : f32
    %399 = vector.broadcast %cst_158 : f32 to vector<16x32xf32>
    %400 = arith.mulf %399, %398 : vector<16x32xf32>
    %401 = math.tanh %400 : vector<16x32xf32>
    %cst_159 = arith.constant 1.000000e+00 : f32
    %402 = vector.broadcast %cst_159 : f32 to vector<16x32xf32>
    %403 = arith.addf %402, %401 : vector<16x32xf32>
    %404 = arith.mulf %393, %403 : vector<16x32xf32>
    %c0_160 = arith.constant 0 : index
    %c0_161 = arith.constant 0 : index
    %405 = vector.load %arg31[%c0_160, %c0_161] : memref<1x32xf32, #tpu.memory_space<vmem>>, vector<1x32xf32>
    %c0_162 = arith.constant 0 : index
    %c0_163 = arith.constant 0 : index
    %406 = vector.load %arg32[%c0_162, %c0_163] : memref<1x32xf32, #tpu.memory_space<vmem>>, vector<1x32xf32>
    %cst_164 = arith.constant dense<0.000000e+00> : vector<16xf32>
    %407 = vector.multi_reduction <add>, %404, %cst_164 [1] : vector<16x32xf32> to vector<16xf32>
    %408 = vector.shape_cast %407 : vector<16xf32> to vector<16x1xf32>
    %cst_165 = arith.constant 3.200000e+01 : f32
    %409 = vector.broadcast %cst_165 : f32 to vector<16x1xf32>
    %410 = arith.divf %408, %409 : vector<16x1xf32>
    %411 = vector.broadcast %410 : vector<16x1xf32> to vector<16x32xf32>
    %412 = arith.subf %404, %411 : vector<16x32xf32>
    %413 = arith.mulf %412, %412 : vector<16x32xf32>
    %cst_166 = arith.constant dense<0.000000e+00> : vector<16xf32>
    %414 = vector.multi_reduction <add>, %413, %cst_166 [1] : vector<16x32xf32> to vector<16xf32>
    %415 = vector.shape_cast %414 : vector<16xf32> to vector<16x1xf32>
    %cst_167 = arith.constant 3.200000e+01 : f32
    %416 = vector.broadcast %cst_167 : f32 to vector<16x1xf32>
    %417 = arith.divf %415, %416 : vector<16x1xf32>
    %418 = vector.broadcast %410 : vector<16x1xf32> to vector<16x32xf32>
    %419 = arith.subf %404, %418 : vector<16x32xf32>
    %cst_168 = arith.constant 9.99999974E-6 : f32
    %420 = vector.broadcast %cst_168 : f32 to vector<16x1xf32>
    %421 = arith.addf %417, %420 : vector<16x1xf32>
    %422 = math.rsqrt %421 : vector<16x1xf32>
    %423 = vector.broadcast %422 : vector<16x1xf32> to vector<16x32xf32>
    %424 = arith.mulf %419, %423 : vector<16x32xf32>
    %425 = vector.broadcast %405 : vector<1x32xf32> to vector<16x32xf32>
    %426 = arith.mulf %424, %425 : vector<16x32xf32>
    %427 = vector.broadcast %406 : vector<1x32xf32> to vector<16x32xf32>
    %428 = arith.addf %426, %427 : vector<16x32xf32>
    %c0_169 = arith.constant 0 : index
    %c0_170 = arith.constant 0 : index
    %429 = vector.load %arg33[%c0_169, %c0_170] : memref<32x4xbf16, #tpu.memory_space<vmem>>, vector<32x4xbf16>
    %430 = arith.truncf %428 : vector<16x32xf32> to vector<16x32xbf16>
    %cst_171 = arith.constant dense<0.000000e+00> : vector<16x4xf32>
    %431 = tpu.matmul %430, %429, %cst_171 {dimension_numbers = #tpu.dot_dimension_numbers<[1], [0], [0], [1], [0, 0, 1, 1], [], []>} : vector<16x32xbf16>, vector<32x4xbf16>, vector<16x4xf32> -> vector<16x4xf32>
    %c0_172 = arith.constant 0 : index
    %c0_173 = arith.constant 0 : index
    %432 = vector.load %arg38[%c0_172, %c0_173] : memref<16x1xi32, #tpu.memory_space<vmem>>, vector<16x1xi32>
    %c0_174 = arith.constant 0 : index
    %c0_175 = arith.constant 0 : index
    %433 = vector.load %arg39[%c0_174, %c0_175] : memref<16x1xf32, #tpu.memory_space<vmem>>, vector<16x1xf32>
    %434 = tpu.iota {dimensions = array<i32: 1>} : vector<16x4xi32>
    %435 = vector.broadcast %432 : vector<16x1xi32> to vector<16x4xi32>
    %436 = arith.cmpi eq, %434, %435 : vector<16x4xi32>
    %437 = arith.extui %436 : vector<16x4xi1> to vector<16x4xi32>
    %438 = arith.sitofp %437 : vector<16x4xi32> to vector<16x4xf32>
    %439 = vector.broadcast %433 : vector<16x1xf32> to vector<16x4xf32>
    %440 = arith.mulf %438, %439 : vector<16x4xf32>
    %cst_176 = arith.constant dense<0xFF800000> : vector<16xf32>
    %441 = vector.multi_reduction <maximumf>, %431, %cst_176 [1] : vector<16x4xf32> to vector<16xf32>
    %442 = vector.shape_cast %441 : vector<16xf32> to vector<16x1xf32>
    %443 = vector.broadcast %442 : vector<16x1xf32> to vector<16x4xf32>
    %444 = arith.subf %431, %443 : vector<16x4xf32>
    %445 = math.exp %444 : vector<16x4xf32>
    %cst_177 = arith.constant dense<0.000000e+00> : vector<16xf32>
    %446 = vector.multi_reduction <add>, %445, %cst_177 [1] : vector<16x4xf32> to vector<16xf32>
    %447 = vector.shape_cast %446 : vector<16xf32> to vector<16x1xf32>
    %448 = math.log %447 : vector<16x1xf32>
    %449 = arith.addf %448, %442 : vector<16x1xf32>
    %450 = arith.mulf %431, %440 : vector<16x4xf32>
    %cst_178 = arith.constant dense<0.000000e+00> : vector<16xf32>
    %451 = vector.multi_reduction <add>, %450, %cst_178 [1] : vector<16x4xf32> to vector<16xf32>
    %452 = vector.shape_cast %451 : vector<16xf32> to vector<16x1xf32>
    %453 = arith.mulf %449, %433 : vector<16x1xf32>
    %454 = arith.subf %453, %452 : vector<16x1xf32>
    %455 = arith.sitofp %434 : vector<16x4xi32> to vector<16x4xf32>
    %456 = vector.broadcast %442 : vector<16x1xf32> to vector<16x4xf32>
    %457 = arith.cmpf oge, %431, %456 : vector<16x4xf32>
    %cst_179 = arith.constant 4.000000e+00 : f32
    %458 = vector.broadcast %cst_179 : f32 to vector<16x4xf32>
    %459 = arith.select %457, %455, %458 : vector<16x4xi1>, vector<16x4xf32>
    %cst_180 = arith.constant dense<0x7F800000> : vector<16xf32>
    %460 = vector.multi_reduction <minimumf>, %459, %cst_180 [1] : vector<16x4xf32> to vector<16xf32>
    %461 = vector.shape_cast %460 : vector<16xf32> to vector<16x1xf32>
    %462 = arith.sitofp %432 : vector<16x1xi32> to vector<16x1xf32>
    %463 = arith.cmpf oeq, %461, %462 : vector<16x1xf32>
    %464 = arith.extui %463 : vector<16x1xi1> to vector<16x1xi32>
    %465 = arith.sitofp %464 : vector<16x1xi32> to vector<16x1xf32>
    %466 = arith.mulf %465, %433 : vector<16x1xf32>
    %467 = vector.shape_cast %433 : vector<16x1xf32> to vector<1x16x1xf32>
    %cst_181 = arith.constant dense<0.000000e+00> : vector<1xf32>
    %468 = vector.multi_reduction <add>, %467, %cst_181 [1, 2] : vector<1x16x1xf32> to vector<1xf32>
    %469 = vector.shape_cast %468 : vector<1xf32> to vector<1x1x1xf32>
    %470 = vector.extract %469[0, 0, 0] : f32 from vector<1x1x1xf32>
    %471 = vector.shape_cast %454 : vector<16x1xf32> to vector<1x16x1xf32>
    %cst_182 = arith.constant dense<0.000000e+00> : vector<1xf32>
    %472 = vector.multi_reduction <add>, %471, %cst_182 [1, 2] : vector<1x16x1xf32> to vector<1xf32>
    %473 = vector.shape_cast %472 : vector<1xf32> to vector<1x1x1xf32>
    %474 = vector.extract %473[0, 0, 0] : f32 from vector<1x1x1xf32>
    %475 = arith.divf %474, %470 : f32
    %476 = vector.shape_cast %466 : vector<16x1xf32> to vector<1x16x1xf32>
    %cst_183 = arith.constant dense<0.000000e+00> : vector<1xf32>
    %477 = vector.multi_reduction <add>, %476, %cst_183 [1, 2] : vector<1x16x1xf32> to vector<1xf32>
    %478 = vector.shape_cast %477 : vector<1xf32> to vector<1x1x1xf32>
    %479 = vector.extract %478[0, 0, 0] : f32 from vector<1x1x1xf32>
    %480 = arith.divf %479, %470 : f32
    %c0_184 = arith.constant 0 : index
    %c0_185 = arith.constant 0 : index
    %481 = vector.load %arg34[%c0_184, %c0_185] : memref<16x1xi32, #tpu.memory_space<vmem>>, vector<16x1xi32>
    %c0_186 = arith.constant 0 : index
    %c0_187 = arith.constant 0 : index
    %482 = vector.load %arg35[%c0_186, %c0_187] : memref<16x1xf32, #tpu.memory_space<vmem>>, vector<16x1xf32>
    %483 = tpu.iota {dimensions = array<i32: 1>} : vector<16x6xi32>
    %484 = vector.broadcast %481 : vector<16x1xi32> to vector<16x6xi32>
    %485 = arith.cmpi eq, %483, %484 : vector<16x6xi32>
    %486 = arith.extui %485 : vector<16x6xi1> to vector<16x6xi32>
    %487 = arith.sitofp %486 : vector<16x6xi32> to vector<16x6xf32>
    %488 = vector.broadcast %482 : vector<16x1xf32> to vector<16x6xf32>
    %489 = arith.mulf %487, %488 : vector<16x6xf32>
    %cst_188 = arith.constant dense<0xFF800000> : vector<16xf32>
    %490 = vector.multi_reduction <maximumf>, %339, %cst_188 [1] : vector<16x6xf32> to vector<16xf32>
    %491 = vector.shape_cast %490 : vector<16xf32> to vector<16x1xf32>
    %492 = vector.broadcast %491 : vector<16x1xf32> to vector<16x6xf32>
    %493 = arith.subf %339, %492 : vector<16x6xf32>
    %494 = math.exp %493 : vector<16x6xf32>
    %cst_189 = arith.constant dense<0.000000e+00> : vector<16xf32>
    %495 = vector.multi_reduction <add>, %494, %cst_189 [1] : vector<16x6xf32> to vector<16xf32>
    %496 = vector.shape_cast %495 : vector<16xf32> to vector<16x1xf32>
    %497 = math.log %496 : vector<16x1xf32>
    %498 = arith.addf %497, %491 : vector<16x1xf32>
    %499 = arith.mulf %339, %489 : vector<16x6xf32>
    %cst_190 = arith.constant dense<0.000000e+00> : vector<16xf32>
    %500 = vector.multi_reduction <add>, %499, %cst_190 [1] : vector<16x6xf32> to vector<16xf32>
    %501 = vector.shape_cast %500 : vector<16xf32> to vector<16x1xf32>
    %502 = arith.mulf %498, %482 : vector<16x1xf32>
    %503 = arith.subf %502, %501 : vector<16x1xf32>
    %504 = arith.sitofp %483 : vector<16x6xi32> to vector<16x6xf32>
    %505 = vector.broadcast %491 : vector<16x1xf32> to vector<16x6xf32>
    %506 = arith.cmpf oge, %339, %505 : vector<16x6xf32>
    %cst_191 = arith.constant 6.000000e+00 : f32
    %507 = vector.broadcast %cst_191 : f32 to vector<16x6xf32>
    %508 = arith.select %506, %504, %507 : vector<16x6xi1>, vector<16x6xf32>
    %cst_192 = arith.constant dense<0x7F800000> : vector<16xf32>
    %509 = vector.multi_reduction <minimumf>, %508, %cst_192 [1] : vector<16x6xf32> to vector<16xf32>
    %510 = vector.shape_cast %509 : vector<16xf32> to vector<16x1xf32>
    %511 = arith.sitofp %481 : vector<16x1xi32> to vector<16x1xf32>
    %512 = arith.cmpf oeq, %510, %511 : vector<16x1xf32>
    %513 = arith.extui %512 : vector<16x1xi1> to vector<16x1xi32>
    %514 = arith.sitofp %513 : vector<16x1xi32> to vector<16x1xf32>
    %515 = arith.mulf %514, %482 : vector<16x1xf32>
    %516 = vector.shape_cast %482 : vector<16x1xf32> to vector<1x16x1xf32>
    %cst_193 = arith.constant dense<0.000000e+00> : vector<1xf32>
    %517 = vector.multi_reduction <add>, %516, %cst_193 [1, 2] : vector<1x16x1xf32> to vector<1xf32>
    %518 = vector.shape_cast %517 : vector<1xf32> to vector<1x1x1xf32>
    %519 = vector.extract %518[0, 0, 0] : f32 from vector<1x1x1xf32>
    %520 = vector.shape_cast %503 : vector<16x1xf32> to vector<1x16x1xf32>
    %cst_194 = arith.constant dense<0.000000e+00> : vector<1xf32>
    %521 = vector.multi_reduction <add>, %520, %cst_194 [1, 2] : vector<1x16x1xf32> to vector<1xf32>
    %522 = vector.shape_cast %521 : vector<1xf32> to vector<1x1x1xf32>
    %523 = vector.extract %522[0, 0, 0] : f32 from vector<1x1x1xf32>
    %524 = arith.divf %523, %519 : f32
    %525 = vector.shape_cast %515 : vector<16x1xf32> to vector<1x16x1xf32>
    %cst_195 = arith.constant dense<0.000000e+00> : vector<1xf32>
    %526 = vector.multi_reduction <add>, %525, %cst_195 [1, 2] : vector<1x16x1xf32> to vector<1xf32>
    %527 = vector.shape_cast %526 : vector<1xf32> to vector<1x1x1xf32>
    %528 = vector.extract %527[0, 0, 0] : f32 from vector<1x1x1xf32>
    %529 = arith.divf %528, %519 : f32
    %c0_196 = arith.constant 0 : index
    %c0_197 = arith.constant 0 : index
    %530 = vector.load %arg36[%c0_196, %c0_197] : memref<16x1xi32, #tpu.memory_space<vmem>>, vector<16x1xi32>
    %c0_198 = arith.constant 0 : index
    %c0_199 = arith.constant 0 : index
    %531 = vector.load %arg37[%c0_198, %c0_199] : memref<16x1xf32, #tpu.memory_space<vmem>>, vector<16x1xf32>
    %532 = tpu.iota {dimensions = array<i32: 1>} : vector<16x3xi32>
    %533 = vector.broadcast %530 : vector<16x1xi32> to vector<16x3xi32>
    %534 = arith.cmpi eq, %532, %533 : vector<16x3xi32>
    %535 = arith.extui %534 : vector<16x3xi1> to vector<16x3xi32>
    %536 = arith.sitofp %535 : vector<16x3xi32> to vector<16x3xf32>
    %537 = vector.broadcast %531 : vector<16x1xf32> to vector<16x3xf32>
    %538 = arith.mulf %536, %537 : vector<16x3xf32>
    %cst_200 = arith.constant dense<0xFF800000> : vector<16xf32>
    %539 = vector.multi_reduction <maximumf>, %385, %cst_200 [1] : vector<16x3xf32> to vector<16xf32>
    %540 = vector.shape_cast %539 : vector<16xf32> to vector<16x1xf32>
    %541 = vector.broadcast %540 : vector<16x1xf32> to vector<16x3xf32>
    %542 = arith.subf %385, %541 : vector<16x3xf32>
    %543 = math.exp %542 : vector<16x3xf32>
    %cst_201 = arith.constant dense<0.000000e+00> : vector<16xf32>
    %544 = vector.multi_reduction <add>, %543, %cst_201 [1] : vector<16x3xf32> to vector<16xf32>
    %545 = vector.shape_cast %544 : vector<16xf32> to vector<16x1xf32>
    %546 = math.log %545 : vector<16x1xf32>
    %547 = arith.addf %546, %540 : vector<16x1xf32>
    %548 = arith.mulf %385, %538 : vector<16x3xf32>
    %cst_202 = arith.constant dense<0.000000e+00> : vector<16xf32>
    %549 = vector.multi_reduction <add>, %548, %cst_202 [1] : vector<16x3xf32> to vector<16xf32>
    %550 = vector.shape_cast %549 : vector<16xf32> to vector<16x1xf32>
    %551 = arith.mulf %547, %531 : vector<16x1xf32>
    %552 = arith.subf %551, %550 : vector<16x1xf32>
    %553 = arith.sitofp %532 : vector<16x3xi32> to vector<16x3xf32>
    %554 = vector.broadcast %540 : vector<16x1xf32> to vector<16x3xf32>
    %555 = arith.cmpf oge, %385, %554 : vector<16x3xf32>
    %cst_203 = arith.constant 3.000000e+00 : f32
    %556 = vector.broadcast %cst_203 : f32 to vector<16x3xf32>
    %557 = arith.select %555, %553, %556 : vector<16x3xi1>, vector<16x3xf32>
    %cst_204 = arith.constant dense<0x7F800000> : vector<16xf32>
    %558 = vector.multi_reduction <minimumf>, %557, %cst_204 [1] : vector<16x3xf32> to vector<16xf32>
    %559 = vector.shape_cast %558 : vector<16xf32> to vector<16x1xf32>
    %560 = arith.sitofp %530 : vector<16x1xi32> to vector<16x1xf32>
    %561 = arith.cmpf oeq, %559, %560 : vector<16x1xf32>
    %562 = arith.extui %561 : vector<16x1xi1> to vector<16x1xi32>
    %563 = arith.sitofp %562 : vector<16x1xi32> to vector<16x1xf32>
    %564 = arith.mulf %563, %531 : vector<16x1xf32>
    %565 = vector.shape_cast %531 : vector<16x1xf32> to vector<1x16x1xf32>
    %cst_205 = arith.constant dense<0.000000e+00> : vector<1xf32>
    %566 = vector.multi_reduction <add>, %565, %cst_205 [1, 2] : vector<1x16x1xf32> to vector<1xf32>
    %567 = vector.shape_cast %566 : vector<1xf32> to vector<1x1x1xf32>
    %568 = vector.extract %567[0, 0, 0] : f32 from vector<1x1x1xf32>
    %569 = vector.shape_cast %552 : vector<16x1xf32> to vector<1x16x1xf32>
    %cst_206 = arith.constant dense<0.000000e+00> : vector<1xf32>
    %570 = vector.multi_reduction <add>, %569, %cst_206 [1, 2] : vector<1x16x1xf32> to vector<1xf32>
    %571 = vector.shape_cast %570 : vector<1xf32> to vector<1x1x1xf32>
    %572 = vector.extract %571[0, 0, 0] : f32 from vector<1x1x1xf32>
    %573 = arith.divf %572, %568 : f32
    %574 = vector.shape_cast %564 : vector<16x1xf32> to vector<1x16x1xf32>
    %cst_207 = arith.constant dense<0.000000e+00> : vector<1xf32>
    %575 = vector.multi_reduction <add>, %574, %cst_207 [1, 2] : vector<1x16x1xf32> to vector<1xf32>
    %576 = vector.shape_cast %575 : vector<1xf32> to vector<1x1x1xf32>
    %577 = vector.extract %576[0, 0, 0] : f32 from vector<1x1x1xf32>
    %578 = arith.divf %577, %568 : f32
    %579 = tpu.iota {dimensions = array<i32: 1>} : vector<1x128xi32>
    %cst_208 = arith.constant 0.000000e+00 : f32
    %580 = vector.broadcast %cst_208 : f32 to vector<1x128xf32>
    %c0_i32 = arith.constant 0 : i32
    %581 = vector.broadcast %c0_i32 : i32 to vector<1x128xi32>
    %582 = arith.cmpi eq, %579, %581 : vector<1x128xi32>
    %cst_209 = arith.constant 0.000000e+00 : f32
    %583 = vector.broadcast %475 : f32 to vector<1x128xf32>
    %584 = vector.broadcast %cst_209 : f32 to vector<1x128xf32>
    %585 = arith.select %582, %583, %584 : vector<1x128xi1>, vector<1x128xf32>
    %586 = arith.addf %580, %585 : vector<1x128xf32>
    %c1_i32 = arith.constant 1 : i32
    %587 = vector.broadcast %c1_i32 : i32 to vector<1x128xi32>
    %588 = arith.cmpi eq, %579, %587 : vector<1x128xi32>
    %cst_210 = arith.constant 0.000000e+00 : f32
    %589 = vector.broadcast %524 : f32 to vector<1x128xf32>
    %590 = vector.broadcast %cst_210 : f32 to vector<1x128xf32>
    %591 = arith.select %588, %589, %590 : vector<1x128xi1>, vector<1x128xf32>
    %592 = arith.addf %586, %591 : vector<1x128xf32>
    %c2_i32 = arith.constant 2 : i32
    %593 = vector.broadcast %c2_i32 : i32 to vector<1x128xi32>
    %594 = arith.cmpi eq, %579, %593 : vector<1x128xi32>
    %cst_211 = arith.constant 0.000000e+00 : f32
    %595 = vector.broadcast %573 : f32 to vector<1x128xf32>
    %596 = vector.broadcast %cst_211 : f32 to vector<1x128xf32>
    %597 = arith.select %594, %595, %596 : vector<1x128xi1>, vector<1x128xf32>
    %598 = arith.addf %592, %597 : vector<1x128xf32>
    %c3_i32 = arith.constant 3 : i32
    %599 = vector.broadcast %c3_i32 : i32 to vector<1x128xi32>
    %600 = arith.cmpi eq, %579, %599 : vector<1x128xi32>
    %cst_212 = arith.constant 0.000000e+00 : f32
    %601 = vector.broadcast %480 : f32 to vector<1x128xf32>
    %602 = vector.broadcast %cst_212 : f32 to vector<1x128xf32>
    %603 = arith.select %600, %601, %602 : vector<1x128xi1>, vector<1x128xf32>
    %604 = arith.addf %598, %603 : vector<1x128xf32>
    %c4_i32 = arith.constant 4 : i32
    %605 = vector.broadcast %c4_i32 : i32 to vector<1x128xi32>
    %606 = arith.cmpi eq, %579, %605 : vector<1x128xi32>
    %cst_213 = arith.constant 0.000000e+00 : f32
    %607 = vector.broadcast %529 : f32 to vector<1x128xf32>
    %608 = vector.broadcast %cst_213 : f32 to vector<1x128xf32>
    %609 = arith.select %606, %607, %608 : vector<1x128xi1>, vector<1x128xf32>
    %610 = arith.addf %604, %609 : vector<1x128xf32>
    %c5_i32 = arith.constant 5 : i32
    %611 = vector.broadcast %c5_i32 : i32 to vector<1x128xi32>
    %612 = arith.cmpi eq, %579, %611 : vector<1x128xi32>
    %cst_214 = arith.constant 0.000000e+00 : f32
    %613 = vector.broadcast %578 : f32 to vector<1x128xf32>
    %614 = vector.broadcast %cst_214 : f32 to vector<1x128xf32>
    %615 = arith.select %612, %613, %614 : vector<1x128xi1>, vector<1x128xf32>
    %616 = arith.addf %610, %615 : vector<1x128xf32>
    %617 = tpu.iota {dimensions = array<i32: 0>} : vector<16x16xi32>
    %618 = tpu.iota {dimensions = array<i32: 1>} : vector<16x16xi32>
    %619 = arith.cmpi eq, %617, %618 : vector<16x16xi32>
    %cst_215 = arith.constant 0.000000e+00 : f32
    %620 = vector.shape_cast %461 : vector<16x1xf32> to vector<16x1xf32>
    %621 = vector.broadcast %620 : vector<16x1xf32> to vector<16x16xf32>
    %622 = vector.broadcast %cst_215 : f32 to vector<16x16xf32>
    %623 = arith.select %619, %621, %622 : vector<16x16xi1>, vector<16x16xf32>
    %cst_216 = arith.constant dense<0.000000e+00> : vector<16xf32>
    %624 = vector.multi_reduction <add>, %623, %cst_216 [0] : vector<16x16xf32> to vector<16xf32>
    %625 = vector.shape_cast %624 : vector<16xf32> to vector<1x16xf32>
    %cst_217 = arith.constant 0.000000e+00 : f32
    %626 = vector.broadcast %cst_217 : f32 to vector<1x112xf32>
    %627 = tpu.concatenate %625, %626 in 1 : vector<1x16xf32>, vector<1x112xf32> -> vector<1x128xf32>
    %cst_218 = arith.constant 0.000000e+00 : f32
    %628 = vector.broadcast %cst_218 : f32 to vector<6x128xf32>
    %629 = tpu.concatenate %616, %627, %628 in 0 : vector<1x128xf32>, vector<1x128xf32>, vector<6x128xf32> -> vector<8x128xf32>
    %c0_219 = arith.constant 0 : index
    %c0_220 = arith.constant 0 : index
    %630 = vector.load %arg40[%c0_219, %c0_220] : memref<8x128xf32, #tpu.memory_space<vmem>>, vector<8x128xf32>
    tpu.vector_store %arg40[%c0_219, %c0_220], %629 {strides = array<i32>} : memref<8x128xf32, #tpu.memory_space<vmem>>, vector<8x128xf32>,
    return
  }
  func.func @transform_0(%arg0: i32) -> (i32, i32) {
    %c0_i32 = arith.constant 0 : i32
    %c0_i32_0 = arith.constant 0 : i32
    %c0_i32_1 = arith.constant 0 : i32
    return %c0_i32, %c0_i32_0 : i32, i32
  }
  func.func @transform_1(%arg0: i32) -> (i32, i32) {
    %c0_i32 = arith.constant 0 : i32
    %c0_i32_0 = arith.constant 0 : i32
    %c0_i32_1 = arith.constant 0 : i32
    return %c0_i32, %c0_i32_0 : i32, i32
  }
  func.func @transform_2(%arg0: i32) -> (i32, i32) {
    %c0_i32 = arith.constant 0 : i32
    %c0_i32_0 = arith.constant 0 : i32
    %c0_i32_1 = arith.constant 0 : i32
    return %c0_i32, %c0_i32_0 : i32, i32
  }
  func.func @transform_3(%arg0: i32) -> (i32, i32) {
    %c0_i32 = arith.constant 0 : i32
    %c0_i32_0 = arith.constant 0 : i32
    %c0_i32_1 = arith.constant 0 : i32
    return %c0_i32, %c0_i32_0 : i32, i32
  }
  func.func @transform_4(%arg0: i32) -> (i32, i32) {
    %c0_i32 = arith.constant 0 : i32
    %c0_i32_0 = arith.constant 0 : i32
    %c0_i32_1 = arith.constant 0 : i32
    return %c0_i32, %c0_i32_0 : i32, i32
  }
  func.func @transform_5(%arg0: i32) -> (i32, i32) {
    %c0_i32 = arith.constant 0 : i32
    %c0_i32_0 = arith.constant 0 : i32
    %c0_i32_1 = arith.constant 0 : i32
    return %c0_i32, %c0_i32_0 : i32, i32
  }
  func.func @transform_6(%arg0: i32) -> (i32, i32) {
    %c0_i32 = arith.constant 0 : i32
    %c0_i32_0 = arith.constant 0 : i32
    %c0_i32_1 = arith.constant 0 : i32
    return %c0_i32, %c0_i32_0 : i32, i32
  }
  func.func @transform_7(%arg0: i32) -> (i32, i32) {
    %c0_i32 = arith.constant 0 : i32
    %c0_i32_0 = arith.constant 0 : i32
    %c0_i32_1 = arith.constant 0 : i32
    return %c0_i32, %c0_i32_0 : i32, i32
  }
  func.func @transform_8(%arg0: i32) -> (i32, i32) {
    %c0_i32 = arith.constant 0 : i32
    %c0_i32_0 = arith.constant 0 : i32
    %c0_i32_1 = arith.constant 0 : i32
    return %c0_i32, %c0_i32_0 : i32, i32
  }
  func.func @transform_9(%arg0: i32) -> (i32, i32) {
    %c0_i32 = arith.constant 0 : i32
    %c0_i32_0 = arith.constant 0 : i32
    %c0_i32_1 = arith.constant 0 : i32
    return %c0_i32, %c0_i32_0 : i32, i32
  }
  func.func @transform_10(%arg0: i32) -> (i32, i32) {
    %c0_i32 = arith.constant 0 : i32
    %c0_i32_0 = arith.constant 0 : i32
    %c0_i32_1 = arith.constant 0 : i32
    return %c0_i32, %c0_i32_0 : i32, i32
  }
  func.func @transform_11(%arg0: i32) -> (i32, i32) {
    %c0_i32 = arith.constant 0 : i32
    %c0_i32_0 = arith.constant 0 : i32
    %c0_i32_1 = arith.constant 0 : i32
    return %c0_i32, %c0_i32_0 : i32, i32
  }
  func.func @transform_12(%arg0: i32) -> (i32, i32) {
    %c0_i32 = arith.constant 0 : i32
    %c0_i32_0 = arith.constant 0 : i32
    %c0_i32_1 = arith.constant 0 : i32
    return %c0_i32, %c0_i32_0 : i32, i32
  }
  func.func @transform_13(%arg0: i32) -> (i32, i32) {
    %c0_i32 = arith.constant 0 : i32
    %c0_i32_0 = arith.constant 0 : i32
    %c0_i32_1 = arith.constant 0 : i32
    return %c0_i32, %c0_i32_0 : i32, i32
  }
  func.func @transform_14(%arg0: i32) -> (i32, i32) {
    %c0_i32 = arith.constant 0 : i32
    %c0_i32_0 = arith.constant 0 : i32
    %c0_i32_1 = arith.constant 0 : i32
    return %c0_i32, %c0_i32_0 : i32, i32
  }
  func.func @transform_15(%arg0: i32) -> (i32, i32) {
    %c0_i32 = arith.constant 0 : i32
    %c0_i32_0 = arith.constant 0 : i32
    %c0_i32_1 = arith.constant 0 : i32
    return %c0_i32, %c0_i32_0 : i32, i32
  }
  func.func @transform_16(%arg0: i32) -> (i32, i32) {
    %c0_i32 = arith.constant 0 : i32
    %c0_i32_0 = arith.constant 0 : i32
    %c0_i32_1 = arith.constant 0 : i32
    return %c0_i32, %c0_i32_0 : i32, i32
  }
  func.func @transform_17(%arg0: i32) -> (i32, i32) {
    %c0_i32 = arith.constant 0 : i32
    %c0_i32_0 = arith.constant 0 : i32
    %c0_i32_1 = arith.constant 0 : i32
    return %c0_i32, %c0_i32_0 : i32, i32
  }
  func.func @transform_18(%arg0: i32) -> (i32, i32) {
    %c0_i32 = arith.constant 0 : i32
    %c0_i32_0 = arith.constant 0 : i32
    %c0_i32_1 = arith.constant 0 : i32
    return %c0_i32, %c0_i32_0 : i32, i32
  }
  func.func @transform_19(%arg0: i32) -> (i32, i32) {
    %c0_i32 = arith.constant 0 : i32
    %c0_i32_0 = arith.constant 0 : i32
    %c0_i32_1 = arith.constant 0 : i32
    return %c0_i32, %c0_i32_0 : i32, i32
  }
  func.func @transform_20(%arg0: i32) -> (i32, i32) {
    %c0_i32 = arith.constant 0 : i32
    %c0_i32_0 = arith.constant 0 : i32
    %c0_i32_1 = arith.constant 0 : i32
    return %c0_i32, %c0_i32_0 : i32, i32
  }
  func.func @transform_21(%arg0: i32) -> (i32, i32) {
    %c0_i32 = arith.constant 0 : i32
    %c0_i32_0 = arith.constant 0 : i32
    %c0_i32_1 = arith.constant 0 : i32
    return %c0_i32, %c0_i32_0 : i32, i32
  }
  func.func @transform_22(%arg0: i32) -> (i32, i32) {
    %c0_i32 = arith.constant 0 : i32
    %c0_i32_0 = arith.constant 0 : i32
    %c0_i32_1 = arith.constant 0 : i32
    return %c0_i32, %c0_i32_0 : i32, i32
  }
  func.func @transform_23(%arg0: i32) -> (i32, i32) {
    %c0_i32 = arith.constant 0 : i32
    %c0_i32_0 = arith.constant 0 : i32
    %c0_i32_1 = arith.constant 0 : i32
    return %c0_i32, %c0_i32_0 : i32, i32
  }
  func.func @transform_24(%arg0: i32) -> (i32, i32) {
    %c0_i32 = arith.constant 0 : i32
    %c0_i32_0 = arith.constant 0 : i32
    %c0_i32_1 = arith.constant 0 : i32
    return %c0_i32, %c0_i32_0 : i32, i32
  }
  func.func @transform_25(%arg0: i32) -> (i32, i32) {
    %c0_i32 = arith.constant 0 : i32
    %c0_i32_0 = arith.constant 0 : i32
    %c0_i32_1 = arith.constant 0 : i32
    return %c0_i32, %c0_i32_0 : i32, i32
  }
  func.func @transform_26(%arg0: i32) -> (i32, i32) {
    %c0_i32 = arith.constant 0 : i32
    %c0_i32_0 = arith.constant 0 : i32
    %c0_i32_1 = arith.constant 0 : i32
    return %c0_i32, %c0_i32_0 : i32, i32
  }
  func.func @transform_27(%arg0: i32) -> (i32, i32) {
    %c0_i32 = arith.constant 0 : i32
    %c0_i32_0 = arith.constant 0 : i32
    %c0_i32_1 = arith.constant 0 : i32
    return %c0_i32, %c0_i32_0 : i32, i32
  }
  func.func @transform_28(%arg0: i32) -> (i32, i32) {
    %c0_i32 = arith.constant 0 : i32
    %c0_i32_0 = arith.constant 0 : i32
    %c0_i32_1 = arith.constant 0 : i32
    return %c0_i32, %c0_i32_0 : i32, i32
  }
  func.func @transform_29(%arg0: i32) -> (i32, i32) {
    %c0_i32 = arith.constant 0 : i32
    %c0_i32_0 = arith.constant 0 : i32
    %c0_i32_1 = arith.constant 0 : i32
    return %c0_i32, %c0_i32_0 : i32, i32
  }
  func.func @transform_30(%arg0: i32) -> (i32, i32) {
    %c0_i32 = arith.constant 0 : i32
    %c0_i32_0 = arith.constant 0 : i32
    %c0_i32_1 = arith.constant 0 : i32
    return %c0_i32, %c0_i32_0 : i32, i32
  }
  func.func @transform_31(%arg0: i32) -> (i32, i32) {
    %c0_i32 = arith.constant 0 : i32
    %c0_i32_0 = arith.constant 0 : i32
    %c0_i32_1 = arith.constant 0 : i32
    return %c0_i32, %c0_i32_0 : i32, i32
  }
  func.func @transform_32(%arg0: i32) -> (i32, i32) {
    %c0_i32 = arith.constant 0 : i32
    %c0_i32_0 = arith.constant 0 : i32
    %c0_i32_1 = arith.constant 0 : i32
    return %c0_i32, %c0_i32_0 : i32, i32
  }
  func.func @transform_33(%arg0: i32) -> (i32, i32) {
    %c0_i32 = arith.constant 0 : i32
    %c0_i32_0 = arith.constant 0 : i32
    %c0_i32_1 = arith.constant 0 : i32
    return %c0_i32, %c0_i32_0 : i32, i32
  }
  func.func @transform_34(%arg0: i32) -> (i32, i32) {
    %c0_i32 = arith.constant 0 : i32
    %c0_i32_0 = arith.constant 0 : i32
    %c0_i32_1 = arith.constant 0 : i32
    return %c0_i32, %c0_i32_0 : i32, i32
  }
  func.func @transform_35(%arg0: i32) -> (i32, i32) {
    %c0_i32 = arith.constant 0 : i32
    %c0_i32_0 = arith.constant 0 : i32
    %c0_i32_1 = arith.constant 0 : i32
    return %c0_i32, %c0_i32_0 : i32, i32
  }
  func.func @transform_36(%arg0: i32) -> (i32, i32) {
    %c0_i32 = arith.constant 0 : i32
    %c0_i32_0 = arith.constant 0 : i32
    %c0_i32_1 = arith.constant 0 : i32
    return %c0_i32, %c0_i32_0 : i32, i32
  }
  func.func @transform_37(%arg0: i32) -> (i32, i32) {
    %c0_i32 = arith.constant 0 : i32
    %c0_i32_0 = arith.constant 0 : i32
    %c0_i32_1 = arith.constant 0 : i32
    return %c0_i32, %c0_i32_0 : i32, i32
  }
  func.func @transform_38(%arg0: i32) -> (i32, i32) {
    %c0_i32 = arith.constant 0 : i32
    %c0_i32_0 = arith.constant 0 : i32
    %c0_i32_1 = arith.constant 0 : i32
    return %c0_i32, %c0_i32_0 : i32, i32
  }
  func.func @transform_39(%arg0: i32) -> (i32, i32) {
    %c0_i32 = arith.constant 0 : i32
    %c0_i32_0 = arith.constant 0 : i32
    %c0_i32_1 = arith.constant 0 : i32
    return %c0_i32, %c0_i32_0 : i32, i32
  }
}

</mosaic_0001>

<bundles_post_ra>
// kernel: squeeze.0
= control target key start
LH: loop header
LB: loop body
LE: loop exit
PB: predicated region body
PF: predicated region fallthrough
CT: control target
= control target key end

     0   :  { %s66_s8 = smov 125   ;;  %vm7_vm0 = vcmask 7168   ;;  %s67_s11 = smov 126   ;;  %s117_s0 = inlined_call_operand.vmem [shape: s32[2,8], index: 0, kind: input, shape index: {}]   ;;  %s118_s1 = inlined_call_operand.vmem [shape: s32[16,1], index: 1, kind: output, shape index: {}]  }
   0x1   :  { %v4_v0 = vld [vmem:[%s117_s0] sm:$0x3]  ;;  %s65_s0 = smov 127   ;;  %s68_s12 = smov 124  }
   0x2   :  { %5 = vst [vmem:[#allocation0] sm:$0x3] %v4_v0  ;;  %s69_s13 = smov 123   ;;  %s70_s14 = smov 122  }
   0x3   :  { %s71_s15 = smov 121  }
   0x9   :  { %v9_v1 = vld [vmem:[#allocation0] sm:$0x3]  }
   0xa   :  { %v21_v2 = vld [vmem:[#allocation0] sm:$0x3]   ;;  %10 = vrot.lane.b32.xlu0 %v9_v1, %s65_s0 }
   0xb   :  { %22 = vrot.lane.b32.xlu1 %v21_v2, %s66_s8  ;;  %v15_v3 = vld [vmem:[#allocation0] sm:$0x3]  }
   0xc   :  { %v27_v4 = vld [vmem:[#allocation0] sm:$0x3]  }
   0xd   :  { %v6_v5 = vld [vmem:[#allocation0] sm:$0x3]  }
   0xe   :  { %8 = vst.msk [vmem:[%s118_s1] ss:$8 sm:$0x3] %vm7_vm0, %v6_v5   ;;  %16 = vrot.lane.b32.xlu0 %v15_v3, %s67_s11  ;;  %v33_v6 = vld [vmem:[#allocation0] sm:$0x3]  }
   0xf   :  { %28 = vrot.lane.b32.xlu1 %v27_v4, %s68_s12  ;;  %v39_v7 = vld [vmem:[#allocation0] sm:$0x3]  }
  0x10   :  { %v45_v8 = vld [vmem:[#allocation0] sm:$0x3]  }
  0x12   :  { %34 = vrot.lane.b32.xlu0 %v33_v6, %s69_s13 }
  0x13   :  { %40 = vrot.lane.b32.xlu1 %v39_v7, %s70_s14 }
  0x16   :  { %46 = vrot.lane.b32.xlu0 %v45_v8, %s71_s15 }
  0x7c   :  { %v11_v9 = vpop.permute.xlu0 %10  }
  0x7d   :  { %v23_v10 = vpop.permute.xlu1 %22   ;;  %51 = vst.msk [vmem:[%s118_s1 + $0x1] ss:$8 sm:$0x3] %vm7_vm0, %v11_v9  }
  0x7e   :  { %53 = vst.msk [vmem:[%s118_s1 + $0x3] ss:$8 sm:$0x3] %vm7_vm0, %v23_v10  }
  0x80   :  { %v17_v11 = vpop.permute.xlu0 %16  }
  0x81   :  { %v29_v12 = vpop.permute.xlu1 %28   ;;  %52 = vst.msk [vmem:[%s118_s1 + $0x2] ss:$8 sm:$0x3] %vm7_vm0, %v17_v11  }
  0x82   :  { %54 = vst.msk [vmem:[%s118_s1 + $0x4] ss:$8 sm:$0x3] %vm7_vm0, %v29_v12  }
  0x84   :  { %v35_v13 = vpop.permute.xlu0 %34  }
  0x85   :  { %v41_v14 = vpop.permute.xlu1 %40   ;;  %55 = vst.msk [vmem:[%s118_s1 + $0x5] ss:$8 sm:$0x3] %vm7_vm0, %v35_v13  }
  0x86   :  { %56 = vst.msk [vmem:[%s118_s1 + $0x6] ss:$8 sm:$0x3] %vm7_vm0, %v41_v14  }
  0x88   :  { %v47_v15 = vpop.permute.xlu0 %46  }
  0x89   :  { %57 = vst.msk [vmem:[%s118_s1 + $0x7] ss:$8 sm:$0x3] %vm7_vm0, %v47_v15  }

// kernel: _forward_device.1
= control target key start
LH: loop header
LB: loop body
LE: loop exit
PB: predicated region body
PF: predicated region fallthrough
CT: control target
= control target key end

     0   :  { %v3916_v0 = vmov 0   ;;  %s3917_s6 = smov 1   ;;  %vm187_vm0 = vcmask 1045504   ;;  %v3918_v4 = vmov 0.0   ;;  %v165_v5 = vlaneseq  ;;  %s3919_s10 = smov 5   ;;  %s4830_s0 = inlined_call_operand.smem [shape: u32[40], index: -1, kind: input, shape index: {}] }
   0x1   :  { %3654 = vset.pattern.permute.xlu0 %v3916_v0  ;;  %s1_s5 = sld [smem:[%s4830_s0]]   ;;  %3725 = vset.pattern.permute.xlu1 %v3916_v0  ;;  %vm180_vm1 = vcmask 48128   ;;  %vm268_vm4 = vcmask 261120   ;;  %vm3920_vm5 = vmmov 0   ;;  %s3921_s14 = smov 3   ;;  %vm410_vm6 = vcmask 64512  }
   0x2   :  { %s3066_s9 = sld [smem:[%s4830_s0 + %s3917_s6]]   ;;  %v3976_v6 = vand.u32 127, %v165_v5  ;;  %s3922_s18 = smov 4   ;;  %vm524_vm7 = vcmask 523264   ;;  %vm732_vm8 = vcmask 130048   ;;  %vm735_vm9 = vcmask 195584  }
   0x3   :  { %s4003_s13 = sld [smem:[%s4830_s0 + %s3919_s10]]   ;;  %s3923_s22 = smov 6   ;;  %vm2457_vm10 = vcmask 785408   ;;  %vm2653_vm11 = vcmask 31744   ;;  %vm2912_vm13 = vcmask 23552   ;;  %vm2711_vm14 = vcmask 7168  }
   0x4   :  { %s4013_s17 = sld [smem:[%s4830_s0 + %s3921_s14]]   ;;  %s3924_s26 = smov 120  }
   0x5   :  { %s4018_s21 = sld [smem:[%s4830_s0 + %s3922_s18]]   ;;  %s3925_s27 = smov 112  }
   0x6   :  { %s4026_s25 = sld [smem:[%s4830_s0 + %s3923_s22]]   ;;  %s3926_s28 = smov 104  }
   0x7   :  { %v163_v1 = vld [vmem:[%s1_s5] sm:$0xff]  ;;  %v164_v2 = vld [vmem:[%s1_s5 + $0x8] sm:$0xff]  ;;  %s3927_s29 = smov 96   ;;  %s3928_s30 = smov 2  }
   0x8   :  { %168 = vperm.xlu0 %3654, %v163_v1   ;;  %v179_v3 = vld [vmem:[%s3066_s9] sm:$0x3f]  ;;  %s4070_s3 = sld [smem:[%s4830_s0 + %s3928_s30]]   ;;  %s3929_s4 = smov 64  }
   0x9   :  { %3334 = vmatprep.subr.msk.mxu1 %vm187_vm0, %v179_v3  ;;  %v3726_v26 = vld [vmem:[%s4003_s13] sm:$0xff]   ;;  %v3727_v27 = vld [vmem:[%s4003_s13 + $0x8] sm:$0xff]   ;;  %s3930_s5 = smov 7   ;;  %s3931_s9 = smov 8  }
   0xa   :  { %3335 = vmatpush3.msk.msra.mxu1 %vm187_vm0, %v179_v3  ;;  %v3110_v36 = vld [vmem:[%s4013_s17] ss:$0 sm:$0xff]  ;;  %s4118_s8 = sld [smem:[%s4830_s0 + %s3930_s5]]   ;;  %s3932_s10 = smov 24  }
   0xb   :  { %3339 = vmatprep.subr.bf16.mxu1 %v3918_v4  ;;  %v3111_v40 = vld [vmem:[%s4018_s21] ss:$0 sm:$0xff]  ;;  %s3933_s11 = smov 16   ;;  %s4140_s15 = sld [smem:[%s4830_s0 + %s3931_s9]]  }
   0xc   :  { %171 = vperm.xlu0 %3654, %v164_v2   ;;  %v3112_v45 = vld [vmem:[%s4026_s25] ss:$0 sm:$0xff]  ;;  %s3934_s16 = smov 11   ;;  %s3935_s22 = smov 9  }
   0xd   :  { %s4160_s20 = sld [smem:[%s4830_s0 + %s3934_s16]]   ;;  %s3936_s1 = smov 10  }
   0xe   :  { %s4169_s30 = sld [smem:[%s4830_s0 + %s3935_s22]]   ;;  %s3937_s7 = smov 13  }
   0xf   :  { %s4174_s6 = sld [smem:[%s4830_s0 + %s3936_s1]]   ;;  %s3938_s18 = smov 12  }
  0x10   :  { %s4184_s16 = sld [smem:[%s4830_s0 + %s3937_s7]]   ;;  %s3939_s24 = smov 14  }
  0x11   :  { %s4204_s23 = sld [smem:[%s4830_s0 + %s3938_s18]]   ;;  %s3950_s12 = smov 37  }
  0x12   :  { %s4210_s5 = sld [smem:[%s4830_s0 + %s3939_s24]]   ;;  %s3951_s18 = smov 20  }
  0x13   :  { %s3085_s24 = sld [smem:[%s4830_s0 + %s3951_s18]]   ;;  %s3952_s1 = smov 21  }
  0x87   :  { %v169_v7 = vpop.permute.xlu0 %168 }
  0x88   :  { %vm173_vm2 = vcmp.eq.s32.totalorder %v3976_v6, %v169_v7 }
  0x89   :  { %v3105_v8 = vsel %vm173_vm2, 1.0, %v3918_v4 }
  0x8a   :  { %3336 = vmatprep.mubr.msk.f32.mxu1 %vm180_vm1, %v3105_v8 }
  0x8b   :  { %v172_v9 = vpop.permute.xlu0 %171 }
  0x8c   :  { %vm174_vm3 = vcmp.eq.s32.totalorder %v3976_v6, %v172_v9 }
  0x8d   :  { %v3106_v10 = vsel %vm174_vm3, 1.0, %v3918_v4 }
  0x8e   :  { %3337 = vmatmul.mubr.msk.f32.vlgmr.msra.gmra.mrb[0].mxu1 %vm180_vm1, %v3106_v10 }
  0x8f   :  { %3340 = vmatpush3.bf16.msra.mxu1 %v3726_v26  ;;  %3343 = vmatprep.mubr.msk.bf16.mxu1 %vm3920_vm5, %v3918_v4 }
  0x90   :  { %3341 = vmatprep.subr.bf16.mxu1 %v3918_v4 }
  0x93   :  { %3342 = vmatpush3.bf16.msra.mxu1 %v3727_v27 }
 0x161   :  { %v3984_v11 = vpop.f32.mrb[0].mxu1 }
 0x162   :  { %v3986_v12 = vpop.f32.mrb[1].mxu1  ;;  %v272_v15 = vsel %vm268_vm4, %v3984_v11, 0.0 }
 0x163   :  { %v269_v13 = vsel %vm268_vm4, %v3986_v12, 0.0  ;;  %v3992_v14 = vpack.c.bf16 %v3984_v11, %v3986_v12 }
 0x164   :  { %270 = vadd.xlane.f32.xlu1 %v269_v13 }
 0x168   :  { %273 = vadd.xlane.f32.xlu1 %v272_v15 }
 0x1f1   :  { %v271_v16 = vpop.xlane.xlu1 %270 }
 0x1f2   :  { %v276_v17 = vmul.f32 0.03125, %v271_v16 }
 0x1f4   :  { %v278_v18 = vsub.f32 %v3986_v12, %v276_v17 }
 0x1f5   :  { %v274_v19 = vpop.xlane.xlu1 %273 }
 0x1f6   :  { %v277_v20 = vmul.f32 0.03125, %v274_v19  ;;  %v280_v21 = vmul.f32 %v278_v18, %v278_v18 }
 0x1f8   :  { %v279_v22 = vsub.f32 %v3984_v11, %v277_v20  ;;  %v282_v23 = vsel %vm268_vm4, %v280_v21, 0.0 }
 0x1f9   :  { %283 = vadd.xlane.f32.xlu0 %v282_v23  ;;  %v509_v23 = vld [vmem:[%s4070_s3 + $0x8] sm:$0xff] }
 0x1fa   :  { %v281_v24 = vmul.f32 %v279_v22, %v279_v22 }
 0x1fc   :  { %v285_v25 = vsel %vm268_vm4, %v281_v24, 0.0  ;;  %v510_v24 = vld [vmem:[%s4070_s3 + $0x10] sm:$0xff] }
 0x1fd   :  { %286 = vadd.xlane.f32.xlu1 %v285_v25 }
 0x286   :  { %v284_v28 = vpop.xlane.xlu0 %283 }
 0x287   :  { %v288_v29 = vmul.f32 0.03125, %v284_v28 }
 0x289   :  { %v290_v30 = vadd.f32 1e-05, %v288_v29 }
 0x28a   :  { %v287_v31 = vpop.xlane.xlu1 %286 }
 0x28b   :  { %3770 = vrsqrt.f32 %v290_v30  ;;  %v289_v32 = vmul.f32 0.03125, %v287_v31  ;;  %v511_v31 = vld [vmem:[%s4070_s3 + $0x18] sm:$0xff] }
 0x28d   :  { %v291_v33 = vadd.f32 1e-05, %v289_v32 }
 0x28f   :  { %3772 = vrsqrt.f32 %v291_v33 }
 0x295   :  { %v3771_v34 = vpop.eup %3770 }
 0x296   :  { %v294_v35 = vmul.f32 %v3771_v34, %v278_v18  ;;  %v508_v18 = vld [vmem:[%s4070_s3] sm:$0xff] }
 0x298   :  { %v300_v38 = vmul.f32 %v3110_v36, %v294_v35 }
 0x299   :  { %v3773_v37 = vpop.eup %3772 }
 0x29a   :  { %v295_v39 = vmul.f32 %v3773_v37, %v279_v22  ;;  %v306_v42 = vadd.f32 %v3111_v40, %v300_v38 }
 0x29c   :  { %v301_v41 = vmul.f32 %v3110_v36, %v295_v39  ;;  %v512_v36 = vld [vmem:[%s4070_s3 + $0x20] sm:$0xff] }
 0x29e   :  { %v307_v43 = vadd.f32 %v3111_v40, %v301_v41 }
 0x2a0   :  { %v312_v44 = vpack.c.bf16 %v307_v43, %v306_v42  ;;  %v514_v42 = vld [vmem:[%s4070_s3 + $0x30] sm:$0xff]  ;;  %v513_v43 = vld [vmem:[%s4070_s3 + $0x28] sm:$0xff] }
 0x2a2   :  { %3344 = vmatmul.mubr.msk.bf16.vlgmr.msra.gmra.mrb[4].mxu1 %vm268_vm4, %v312_v44 }
 0x375   :  { %v367_v46 = vpop.f32.mrb[4].mxu1 }
 0x376   :  { %v3345_v47 = vpop.f32.mrb[5].mxu1  ;;  %v368_v49 = vadd.f32 %v3112_v45, %v367_v46 }
 0x377   :  { %v370_v48 = vpop.f32.mrb[6].mxu1 }
 0x378   :  { %v371_v50 = vadd.f32 %v3112_v45, %v370_v48  ;;  %v3346_v51 = vpop.f32.mrb[7].mxu1 }
 0x379   :  { %v515_v51 = vld [vmem:[%s4070_s3 + $0x38] sm:$0xff] }
 0x37a   :  { %v3655_v52 = vpack.i.bf16 %v371_v50, %v368_v49  ;;  %v4029_v53 = vpack.c.bf16 %v371_v50, %v368_v49 }
 0x37c   :  { %3656 = vrot.lane.b32.xlu1 %v3655_v52, %s3924_s26  ;;  %3355 = vmatprep.mubr.msk.bf16.mxu0 %vm410_vm6, %v4029_v53 }
 0x380   :  { %3661 = vrot.lane.b32.xlu1 %v3655_v52, %s3925_s27 }
 0x384   :  { %3666 = vrot.lane.b32.xlu1 %v3655_v52, %s3926_s28 }
 0x388   :  { %402 = vrot.lane.b32.xlu1 %v4029_v53, %s3927_s29 }
 0x3ee   :  { %v3657_v54 = vpop.permute.xlu1 %3656 }
 0x3ef   :  { %v3659_v55 = vunpack.i.h.bf16 %v3657_v54  ;;  %v3658_v56 = vunpack.i.l.bf16 %v3657_v54 }
 0x3f1   :  { %v4038_v57 = vpack.c.bf16 %v3659_v55, %v3658_v56 }
 0x3f2   :  { %v3662_v58 = vpop.permute.xlu1 %3661 }
 0x3f3   :  { %v3664_v59 = vunpack.i.h.bf16 %v3662_v58  ;;  %v3663_v60 = vunpack.i.l.bf16 %v3662_v58  ;;  %404 = vrot.lane.b32.xlu0 %v4038_v57, %s3927_s29 }
 0x3f5   :  { %v4042_v61 = vpack.c.bf16 %v3664_v59, %v3663_v60 }
 0x3f6   :  { %v3667_v62 = vpop.permute.xlu1 %3666 }
 0x3f7   :  { %v3669_v63 = vunpack.i.h.bf16 %v3667_v62  ;;  %v3668_v0 = vunpack.i.l.bf16 %v3667_v62  ;;  %406 = vrot.lane.b32.xlu1 %v4042_v61, %s3927_s29 }
 0x3f9   :  { %v4046_v1 = vpack.c.bf16 %v3669_v63, %v3668_v0 }
 0x3fa   :  { %v403_v2 = vpop.permute.xlu1 %402 }
 0x3fb   :  { %408 = vrot.lane.b32.xlu1 %v4046_v1, %s3927_s29  ;;  %3575 = vmatprep.subr.msk.bf16.mxu0 %vm410_vm6, %v403_v2  ;;  %v424_v3 = vsel %vm410_vm6, %v403_v2, 0 }
 0x3fc   :  { %3348 = vmatpush3.bf16.xpose.msra.mxu0 %v424_v3 }
 0x465   :  { %v405_v7 = vpop.permute.xlu0 %404 }
 0x466   :  { %3576 = vmatprep.subr.msk.bf16.mxu0 %vm410_vm6, %v405_v7  ;;  %v427_v8 = vsel %vm410_vm6, %v405_v7, 0 }
 0x467   :  { %3350 = vmatpush3.bf16.xpose.msra.mxu0 %v427_v8 }
 0x469   :  { %v407_v9 = vpop.permute.xlu1 %406 }
 0x46a   :  { %3577 = vmatprep.subr.msk.bf16.mxu0 %vm410_vm6, %v407_v9  ;;  %v430_v10 = vsel %vm410_vm6, %v407_v9, 0 }
 0x46d   :  { %v409_v13 = vpop.permute.xlu1 %408 }
 0x46e   :  { %v433_v15 = vsel %vm410_vm6, %v409_v13, 0 }
 0x46f   :  { %3352 = vmatpush3.bf16.xpose.msra.mxu0 %v430_v10 }
 0x470   :  { %3578 = vmatprep.subr.msk.bf16.mxu0 %vm410_vm6, %v409_v13 }
 0x477   :  { %3354 = vmatpush3.bf16.xpose.msra.mxu0 %v433_v15 }
 0x478   :  { %3395 = vmatprep.subr.bf16.mxu0 %v3918_v4 }
 0x47e   :  { %3356 = vmatmul.mubr.msk.bf16.vlgmr.msra.gmra.mrb[0].mxu0 %vm410_vm6, %v4038_v57 }
 0x47f   :  { %3359 = vmatprep.mubr.msk.bf16.mxu0 %vm410_vm6, %v4042_v61 }
 0x486   :  { %3360 = vmatmul.mubr.msk.bf16.gmra.mrb[4].mxu0 %vm410_vm6, %v4046_v1 }
 0x487   :  { %3411 = vmatprep.mubr.msk.bf16.mxu0 %vm3920_vm5, %v3918_v4 }
 0x551   :  { %v3357_v16 = vpop.f32.mrb[0].mxu0 }
 0x552   :  { %v469_v17 = vpop.f32.mrb[1].mxu0  ;;  %v502_v19 = vmul.f32 0.35355338, %v3357_v16 }
 0x553   :  { %v500_v20 = vmul.f32 0.35355338, %v469_v17  ;;  %v3358_v21 = vpop.f32.mrb[2].mxu0 }
 0x554   :  { %v472_v22 = vpop.f32.mrb[3].mxu0  ;;  %v503_v27 = vmul.f32 0.35355338, %v3358_v21  ;;  %v518_v30 = vadd.f32 %v510_v24, %v502_v19 }
 0x555   :  { %v501_v25 = vmul.f32 0.35355338, %v472_v22  ;;  %v516_v26 = vadd.f32 %v508_v18, %v500_v20 }
 0x556   :  { %v519_v35 = vadd.f32 %v511_v31, %v503_v27  ;;  %v531_v40 = vsel %vm524_vm7, %v518_v30, -inf }
 0x557   :  { %v525_v28 = vsel %vm524_vm7, %v516_v26, -inf  ;;  %v517_v29 = vadd.f32 %v509_v23, %v501_v25 }
 0x558   :  { %526 = vmax.xlane.f32.xlu1 %v525_v28  ;;  %v534_v46 = vsel %vm524_vm7, %v519_v35, -inf }
 0x559   :  { %v3361_v32 = vpop.f32.mrb[4].mxu0  ;;  %v528_v33 = vsel %vm524_vm7, %v517_v29, -inf }
 0x55a   :  { %529 = vmax.xlane.f32.xlu0 %v528_v33  ;;  %v485_v34 = vpop.f32.mrb[5].mxu0  ;;  %v506_v37 = vmul.f32 0.35355338, %v3361_v32 }
 0x55b   :  { %v504_v38 = vmul.f32 0.35355338, %v485_v34  ;;  %v3362_v39 = vpop.f32.mrb[6].mxu0 }
 0x55c   :  { %532 = vmax.xlane.f32.xlu1 %v531_v40  ;;  %v488_v41 = vpop.f32.mrb[7].mxu0  ;;  %v507_v47 = vmul.f32 0.35355338, %v3362_v39  ;;  %v522_v49 = vadd.f32 %v514_v42, %v506_v37 }
 0x55d   :  { %v505_v44 = vmul.f32 0.35355338, %v488_v41  ;;  %v520_v45 = vadd.f32 %v512_v36, %v504_v38 }
 0x55e   :  { %v543_v52 = vsel %vm524_vm7, %v522_v49, -inf  ;;  %v523_v55 = vadd.f32 %v515_v51, %v507_v47 }
 0x55f   :  { %v537_v48 = vsel %vm524_vm7, %v520_v45, -inf  ;;  %v521_v50 = vadd.f32 %v513_v43, %v505_v44 }
 0x560   :  { %535 = vmax.xlane.f32.xlu1 %v534_v46  ;;  %538 = vmax.xlane.f32.xlu0 %v537_v48  ;;  %v546_v56 = vsel %vm524_vm7, %v523_v55, -inf }
 0x561   :  { %v540_v54 = vsel %vm524_vm7, %v521_v50, -inf }
 0x564   :  { %544 = vmax.xlane.f32.xlu0 %v543_v52  ;;  %541 = vmax.xlane.f32.xlu1 %v540_v54 }
 0x568   :  { %547 = vmax.xlane.f32.xlu1 %v546_v56 }
 0x579   :  { %619 = vrot.lane.b32.xlu1 %v4038_v57, %s3929_s4 }
 0x57a   :  { %617 = vrot.lane.b32.xlu0 %v4029_v53, %s3929_s4 }
 0x5e5   :  { %v527_v58 = vpop.xlane.xlu1 %526 }
 0x5e6   :  { %v549_v59 = vsub.f32 %v516_v26, %v527_v58 }
 0x5e7   :  { %v530_v60 = vpop.xlane.xlu0 %529 }
 0x5e8   :  { %v557_v0 = vmul.f32 1.442695, %v549_v59  ;;  %v550_v2 = vsub.f32 %v517_v29, %v530_v60 }
 0x5e9   :  { %v533_v62 = vpop.xlane.xlu1 %532 }
 0x5ea   :  { %v551_v63 = vsub.f32 %v518_v30, %v533_v62  ;;  %v559_v10 = vmul.f32 1.442695, %v550_v2 }
 0x5ec   :  { %v561_v3 = vmul.f32 1.442695, %v551_v63 }
 0x5ed   :  { %v536_v7 = vpop.xlane.xlu1 %535  ;;  %v539_v8 = vpop.xlane.xlu0 %538 }
 0x5ee   :  { %3774 = vpow2.f32 %v561_v3  ;;  %v552_v9 = vsub.f32 %v519_v35, %v536_v7  ;;  %v553_v15 = vsub.f32 %v520_v45, %v539_v8 }
 0x5ef   :  { %3776 = vpow2.f32 %v557_v0 }
 0x5f0   :  { %v563_v13 = vmul.f32 1.442695, %v552_v9  ;;  %v565_v17 = vmul.f32 1.442695, %v553_v15 }
 0x5f1   :  { %v545_v57 = vpop.xlane.xlu0 %544  ;;  %v542_v16 = vpop.xlane.xlu1 %541 }
 0x5f2   :  { %3778 = vpow2.f32 %v563_v13  ;;  %v555_v53 = vsub.f32 %v522_v49, %v545_v57  ;;  %v554_v19 = vsub.f32 %v521_v50, %v542_v16  ;;  %v3728_v57 = vld [vmem:[%s4118_s8] sm:$0xff]  }
 0x5f3   :  { %3780 = vpow2.f32 %v559_v10 }
 0x5f4   :  { %v569_v18 = vmul.f32 1.442695, %v555_v53  ;;  %v567_v24 = vmul.f32 1.442695, %v554_v19 }
 0x5f5   :  { %v618_v20 = vpop.permute.xlu0 %617  ;;  %v548_v21 = vpop.xlane.xlu1 %547 }
 0x5f6   :  { %3782 = vpow2.f32 %v569_v18  ;;  %v556_v22 = vsub.f32 %v523_v55, %v548_v21  ;;  %3363 = vmatprep.subr.bf16.mxu1 %v618_v20 }
 0x5f7   :  { %3364 = vmatpush3.bf16.msra.mxu1 %v618_v20  ;;  %3784 = vpow2.f32 %v565_v17  ;;  %v3729_v17 = vld [vmem:[%s4118_s8 + $0x8] sm:$0xff]  }
 0x5f8   :  { %v4092_v23 = vpop.eup %3774  ;;  %v571_v25 = vmul.f32 1.442695, %v556_v22 }
 0x5f9   :  { %v620_v26 = vpop.permute.xlu1 %619  ;;  %v579_v27 = vsel %vm524_vm7, %v4092_v23, 0.0  ;;  %v3777_v28 = vpop.eup %3776 }
 0x5fa   :  { %3786 = vpow2.f32 %v571_v25  ;;  %580 = vadd.xlane.f32.xlu0 %v579_v27  ;;  %3365 = vmatprep.subr.bf16.mxu1 %v620_v26  ;;  %v573_v30 = vsel %vm524_vm7, %v3777_v28, 0.0 }
 0x5fb   :  { %3366 = vmatpush3.bf16.msra.mxu1 %v620_v26  ;;  %3788 = vpow2.f32 %v567_v24 }
 0x5fc   :  { %v3779_v29 = vpop.eup %3778 }
 0x5fd   :  { %v582_v31 = vsel %vm524_vm7, %v3779_v29, 0.0  ;;  %v3781_v32 = vpop.eup %3780 }
 0x5fe   :  { %574 = vadd.xlane.f32.xlu0 %v573_v30  ;;  %583 = vadd.xlane.f32.xlu1 %v582_v31  ;;  %v576_v35 = vsel %vm524_vm7, %v3781_v32, 0.0 }
 0x600   :  { %v3783_v33 = vpop.eup %3782 }
 0x601   :  { %v591_v34 = vsel %vm524_vm7, %v3783_v33, 0.0  ;;  %v3785_v36 = vpop.eup %3784 }
 0x602   :  { %592 = vadd.xlane.f32.xlu0 %v591_v34  ;;  %577 = vadd.xlane.f32.xlu1 %v576_v35  ;;  %v585_v38 = vsel %vm524_vm7, %v3785_v36, 0.0 }
 0x604   :  { %v3787_v37 = vpop.eup %3786 }
 0x605   :  { %v594_v39 = vsel %vm524_vm7, %v3787_v37, 0.0  ;;  %v3789_v40 = vpop.eup %3788 }
 0x606   :  { %586 = vadd.xlane.f32.xlu0 %v585_v38  ;;  %595 = vadd.xlane.f32.xlu1 %v594_v39  ;;  %v588_v41 = vsel %vm524_vm7, %v3789_v40, 0.0 }
 0x60a   :  { %589 = vadd.xlane.f32.xlu1 %v588_v41 }
 0x61b   :  { %621 = vrot.lane.b32.xlu1 %v4042_v61, %s3929_s4 }
 0x61c   :  { %623 = vrot.lane.b32.xlu0 %v4046_v1, %s3929_s4 }
 0x687   :  { %v581_v42 = vpop.xlane.xlu0 %580 }
 0x68b   :  { %v575_v43 = vpop.xlane.xlu0 %574  ;;  %v584_v44 = vpop.xlane.xlu1 %583 }
 0x68c   :  { %3790 = vrcp.f32 %v575_v43 }
 0x68d   :  { %3792 = vrcp.f32 %v584_v44  ;;  %v3127_v44 = vld [vmem:[%s4140_s15] ss:$0 sm:$0xff] }
 0x68f   :  { %v593_v45 = vpop.xlane.xlu0 %592  ;;  %v578_v46 = vpop.xlane.xlu1 %577 }
 0x690   :  { %3794 = vrcp.f32 %v578_v46 }
 0x691   :  { %3796 = vrcp.f32 %v581_v42 }
 0x693   :  { %v587_v47 = vpop.xlane.xlu0 %586  ;;  %v596_v48 = vpop.xlane.xlu1 %595 }
 0x694   :  { %3798 = vrcp.f32 %v587_v47 }
 0x696   :  { %v3791_v50 = vpop.eup %3790 }
 0x697   :  { %v590_v49 = vpop.xlane.xlu1 %589  ;;  %v3793_v61 = vpop.eup %3792  ;;  %v605_v52 = vmul.f32 %v3791_v50, %v3777_v28 }
 0x698   :  { %3800 = vrcp.f32 %v590_v49  ;;  %v624_v56 = vpop.permute.xlu0 %623  ;;  %v608_v58 = vmul.f32 %v3793_v61, %v3779_v29 }
 0x699   :  { %3802 = vrcp.f32 %v596_v48 }
 0x69a   :  { %v3795_v51 = vpop.eup %3794  ;;  %3804 = vrcp.f32 %v593_v45 }
 0x69b   :  { %v622_v1 = vpop.permute.xlu1 %621  ;;  %v606_v54 = vmul.f32 %v3795_v51, %v3781_v32  ;;  %v3797_v55 = vpop.eup %3796 }
 0x69c   :  { %3367 = vmatprep.subr.bf16.mxu1 %v622_v1  ;;  %v607_v62 = vmul.f32 %v3797_v55, %v4092_v23 }
 0x69d   :  { %3368 = vmatpush3.bf16.msra.mxu1 %v622_v1  ;;  %v613_v59 = vpack.c.bf16 %v606_v54, %v605_v52 }
 0x69e   :  { %3369 = vmatprep.subr.bf16.mxu1 %v624_v56  ;;  %v3799_v60 = vpop.eup %3798  ;;  %v614_v0 = vpack.c.bf16 %v608_v58, %v607_v62 }
 0x69f   :  { %3371 = vmatprep.mubr.msk.bf16.mxu1 %vm524_vm7, %v613_v59  ;;  %v609_v3 = vmul.f32 %v3799_v60, %v3785_v36 }
 0x6a1   :  { %3370 = vmatpush3.bf16.msra.mxu1 %v624_v56 }
 0x6a2   :  { %v3801_v63 = vpop.eup %3800  ;;  %3379 = vmatprep.subr.bf16.mxu1 %v3918_v4 }
 0x6a3   :  { %v3803_v2 = vpop.eup %3802  ;;  %v610_v7 = vmul.f32 %v3801_v63, %v3789_v40  ;;  %v3730_v63 = vld [vmem:[%s4160_s20] sm:$0xff]  }
 0x6a4   :  { %3372 = vmatmul.mubr.msk.bf16.vlgmr.msra.gmra.mrb[8].mxu1 %vm524_vm7, %v614_v0  ;;  %v3805_v8 = vpop.eup %3804  ;;  %v612_v10 = vmul.f32 %v3803_v2, %v3787_v37  ;;  %v3731_v0 = vld [vmem:[%s4160_s20 + $0x8] sm:$0xff]  }
 0x6a5   :  { %v615_v9 = vpack.c.bf16 %v610_v7, %v609_v3  ;;  %v611_v13 = vmul.f32 %v3805_v8, %v3783_v33  ;;  %3380 = vmatpush3.bf16.msra.mxu1 %v3728_v57  ;;  %v3128_v57 = vld [vmem:[%s4169_s30] ss:$0 sm:$0xff] }
 0x6a6   :  { %3381 = vmatprep.subr.bf16.mxu1 %v3918_v4 }
 0x6a7   :  { %3375 = vmatprep.mubr.msk.bf16.mxu1 %vm524_vm7, %v615_v9  ;;  %v616_v15 = vpack.c.bf16 %v612_v10, %v611_v13 }
 0x6a9   :  { %3382 = vmatpush3.bf16.msra.mxu1 %v3729_v17 }
 0x6aa   :  { %3387 = vmatprep.subr.bf16.mxu1 %v3918_v4 }
 0x6ac   :  { %3376 = vmatmul.mubr.msk.bf16.gmra.mrb[12].mxu1 %vm524_vm7, %v616_v15 }
 0x6ad   :  { %3383 = vmatprep.mubr.msk.bf16.mxu1 %vm3920_vm5, %v3918_v4 }
 0x777   :  { %v3373_v16 = vpop.f32.mrb[8].mxu1 }
 0x778   :  { %v675_v53 = vpop.f32.mrb[9].mxu1 }
 0x779   :  { %v3374_v18 = vpop.f32.mrb[10].mxu1 }
 0x77a   :  { %v3670_v19 = vpack.i.bf16 %v3374_v18, %v3373_v16  ;;  %v678_v20 = vpop.f32.mrb[11].mxu1  ;;  %v3129_v18 = vld [vmem:[%s4174_s6] ss:$0 sm:$0xff] }
 0x77c   :  { %3671 = vrot.lane.b32.xlu1 %v3670_v19, %s3931_s9 }
 0x77f   :  { %v3377_v21 = vpop.f32.mrb[12].mxu1 }
 0x780   :  { %v691_v22 = vpop.f32.mrb[13].mxu1 }
 0x781   :  { %v3378_v23 = vpop.f32.mrb[14].mxu1 }
 0x782   :  { %v3680_v24 = vpack.i.bf16 %v3378_v23, %v3377_v21  ;;  %v694_v25 = vpop.f32.mrb[15].mxu1  ;;  %v3732_v23 = vld [vmem:[%s4184_s16] sm:$0xff]  }
 0x783   :  { %v3675_v26 = vpack.i.bf16 %v694_v25, %v691_v22  ;;  %3396 = vmatpush3.bf16.msra.mxu0 %v3732_v23  ;;  %v3734_v25 = vld [vmem:[%s4184_s16 + $0x10] sm:$0xff]  }
 0x784   :  { %3681 = vrot.lane.b32.xlu1 %v3680_v24, %s3932_s10  ;;  %3397 = vmatprep.subr.bf16.mxu0 %v3918_v4  ;;  %v3733_v24 = vld [vmem:[%s4184_s16 + $0x8] sm:$0xff]  }
 0x785   :  { %3676 = vrot.lane.b32.xlu0 %v3675_v26, %s3933_s11  ;;  %v3735_v26 = vld [vmem:[%s4184_s16 + $0x18] sm:$0xff]  }
 0x787   :  { %3398 = vmatpush3.bf16.msra.mxu0 %v3733_v24 }
 0x788   :  { %3399 = vmatprep.subr.bf16.mxu0 %v3918_v4 }
 0x78b   :  { %3400 = vmatpush3.bf16.msra.mxu0 %v3734_v25 }
 0x78c   :  { %3401 = vmatprep.subr.bf16.mxu0 %v3918_v4 }
 0x78f   :  { %3402 = vmatpush3.bf16.msra.mxu0 %v3735_v26 }
 0x790   :  { %3403 = vmatprep.subr.bf16.mxu0 %v3918_v4 }
 0x7ee   :  { %v3672_v27 = vpop.permute.xlu1 %3671 }
 0x7ef   :  { %v3674_v28 = vunpack.i.h.bf16 %v3672_v27  ;;  %v3673_v29 = vunpack.i.l.bf16 %v3672_v27  ;;  %v3736_v27 = vld [vmem:[%s4184_s16 + $0x20] sm:$0xff]  }
 0x7f0   :  { %3404 = vmatpush3.bf16.msra.mxu0 %v3736_v27  ;;  %v3143_v27 = vld [vmem:[%s4013_s17 + $0x1] ss:$0 sm:$0xff] }
 0x7f1   :  { %v730_v34 = vsel %vm410_vm6, %v675_v53, %v3673_v29  ;;  %v731_v35 = vsel %vm410_vm6, %v678_v20, %v3674_v28  ;;  %v3737_v28 = vld [vmem:[%s4184_s16 + $0x28] sm:$0xff]   ;;  %3405 = vmatprep.subr.bf16.mxu0 %v3918_v4  ;;  %v3738_v29 = vld [vmem:[%s4184_s16 + $0x30] sm:$0xff]  }
 0x7f4   :  { %3406 = vmatpush3.bf16.msra.mxu0 %v3737_v28 }
 0x7f5   :  { %3407 = vmatprep.subr.bf16.mxu0 %v3918_v4 }
 0x7f6   :  { %v3682_v30 = vpop.permute.xlu1 %3681 }
 0x7f7   :  { %v3677_v31 = vpop.permute.xlu0 %3676  ;;  %v3684_v36 = vunpack.i.h.bf16 %v3682_v30  ;;  %v3683_v37 = vunpack.i.l.bf16 %v3682_v30  ;;  %v3739_v30 = vld [vmem:[%s4184_s16 + $0x38] sm:$0xff]  }
 0x7f8   :  { %v3679_v32 = vunpack.i.h.bf16 %v3677_v31  ;;  %v3678_v33 = vunpack.i.l.bf16 %v3677_v31  ;;  %3408 = vmatpush3.bf16.msra.mxu0 %v3738_v29  ;;  %v3130_v31 = vld [vmem:[%s4204_s23] ss:$0 sm:$0xff] }
 0x7f9   :  { %3409 = vmatprep.subr.bf16.mxu0 %v3918_v4 }
 0x7fa   :  { %v734_v38 = vsel %vm732_vm8, %v731_v35, %v3679_v32  ;;  %v733_v39 = vsel %vm732_vm8, %v730_v34, %v3678_v33 }
 0x7fb   :  { %v737_v40 = vsel %vm735_vm9, %v734_v38, %v3684_v36  ;;  %v736_v41 = vsel %vm735_vm9, %v733_v39, %v3683_v37 }
 0x7fc   :  { %v742_v42 = vpack.c.bf16 %v737_v40, %v736_v41  ;;  %3410 = vmatpush3.bf16.msra.mxu0 %v3739_v30 }
 0x7fe   :  { %3384 = vmatmul.mubr.msk.bf16.vlgmr.msra.gmra.mrb[16].mxu1 %vm268_vm4, %v742_v42 }
 0x7ff   :  { %3391 = vmatprep.mubr.msk.bf16.mxu1 %vm3920_vm5, %v3918_v4  ;;  %3388 = vmatpush3.bf16.msra.mxu1 %v3730_v63 }
 0x800   :  { %3389 = vmatprep.subr.bf16.mxu1 %v3918_v4 }
 0x803   :  { %3390 = vmatpush3.bf16.msra.mxu1 %v3731_v0 }
 0x804   :  { %3415 = vmatprep.subr.bf16.mxu1 %v3918_v4 }
 0x8d1   :  { %v792_v43 = vpop.f32.mrb[16].mxu1 }
 0x8d2   :  { %v799_v45 = vadd.f32 %v792_v43, %v3986_v12  ;;  %v3385_v46 = vpop.f32.mrb[17].mxu1 }
 0x8d3   :  { %v795_v47 = vpop.f32.mrb[18].mxu1 }
 0x8d4   :  { %v4144_v48 = vadd.f32 %v3127_v44, %v799_v45  ;;  %v800_v49 = vadd.f32 %v3984_v11, %v795_v47  ;;  %v3386_v50 = vpop.f32.mrb[19].mxu1 }
 0x8d6   :  { %v4147_v61 = vadd.f32 %v3127_v44, %v800_v49  ;;  %v810_v51 = vsel %vm268_vm4, %v4144_v48, 0.0 }
 0x8d7   :  { %811 = vadd.xlane.f32.xlu0 %v810_v51 }
 0x8d8   :  { %v813_v1 = vsel %vm268_vm4, %v4147_v61, 0.0 }
 0x8d9   :  { %814 = vadd.xlane.f32.xlu1 %v813_v1 }
 0x964   :  { %v812_v52 = vpop.xlane.xlu0 %811 }
 0x965   :  { %v816_v54 = vmul.f32 0.03125, %v812_v52 }
 0x966   :  { %v815_v12 = vpop.xlane.xlu1 %814 }
 0x967   :  { %v818_v55 = vsub.f32 %v4144_v48, %v816_v54  ;;  %v817_v56 = vmul.f32 0.03125, %v815_v12 }
 0x969   :  { %v819_v58 = vsub.f32 %v4147_v61, %v817_v56  ;;  %v820_v11 = vmul.f32 %v818_v55, %v818_v55 }
 0x96b   :  { %v822_v59 = vsel %vm268_vm4, %v820_v11, 0.0  ;;  %v821_v60 = vmul.f32 %v819_v58, %v819_v58  ;;  %v3142_v11 = vld [vmem:[%s4210_s5] ss:$0 sm:$0xff] }
 0x96c   :  { %823 = vadd.xlane.f32.xlu0 %v822_v59 }
 0x96d   :  { %v825_v62 = vsel %vm268_vm4, %v821_v60, 0.0 }
 0x970   :  { %826 = vadd.xlane.f32.xlu0 %v825_v62 }
 0x9f9   :  { %v824_v2 = vpop.xlane.xlu0 %823 }
 0x9fa   :  { %v828_v3 = vmul.f32 0.03125, %v824_v2 }
 0x9fc   :  { %v830_v7 = vadd.f32 1e-05, %v828_v3 }
 0x9fd   :  { %v827_v8 = vpop.xlane.xlu0 %826 }
 0x9fe   :  { %3806 = vrsqrt.f32 %v830_v7  ;;  %v829_v9 = vmul.f32 0.03125, %v827_v8 }
 0xa00   :  { %v831_v10 = vadd.f32 1e-05, %v829_v9 }
 0xa02   :  { %3808 = vrsqrt.f32 %v831_v10 }
 0xa08   :  { %v3807_v13 = vpop.eup %3806 }
 0xa09   :  { %v834_v15 = vmul.f32 %v3807_v13, %v818_v55 }
 0xa0b   :  { %v840_v53 = vmul.f32 %v3128_v57, %v834_v15 }
 0xa0c   :  { %v3809_v16 = vpop.eup %3808 }
 0xa0d   :  { %v835_v17 = vmul.f32 %v3809_v16, %v819_v58  ;;  %v846_v20 = vadd.f32 %v3129_v18, %v840_v53 }
 0xa0f   :  { %v841_v19 = vmul.f32 %v3128_v57, %v835_v17 }
 0xa11   :  { %v847_v21 = vadd.f32 %v3129_v18, %v841_v19  ;;  %v3740_v18 = vld [vmem:[%s4003_s13 + $0x10] sm:$0xff]   ;;  %v3741_v19 = vld [vmem:[%s4003_s13 + $0x18] sm:$0xff]   ;;  %s3940_s13 = smov 17  }
 0xa13   :  { %v852_v22 = vpack.c.bf16 %v847_v21, %v846_v20 }
 0xa15   :  { %3392 = vmatmul.mubr.msk.bf16.vlgmr.msra.gmra.mrb[20].mxu1 %vm268_vm4, %v852_v22 }
 0xa16   :  { %3419 = vmatprep.mubr.msk.bf16.mxu1 %vm3920_vm5, %v3918_v4  ;;  %3416 = vmatpush3.bf16.msra.mxu1 %v3740_v18 }
 0xa17   :  { %3417 = vmatprep.subr.bf16.mxu1 %v3918_v4 }
 0xa1a   :  { %3418 = vmatpush3.bf16.msra.mxu1 %v3741_v19 }
 0xae8   :  { %v907_v32 = vpop.f32.mrb[20].mxu1 }
 0xae9   :  { %v908_v33 = vadd.f32 %v3130_v31, %v907_v32  ;;  %v3393_v34 = vpop.f32.mrb[21].mxu1  ;;  %v3144_v32 = vld [vmem:[%s4018_s21 + $0x1] ss:$0 sm:$0xff]  ;;  %s3961_s21 = smov 36  }
 0xaea   :  { %v910_v35 = vpop.f32.mrb[22].mxu1 }
 0xaeb   :  { %v916_v36 = vmul.f32 0.044715, %v908_v33  ;;  %v911_v37 = vadd.f32 %v3130_v31, %v910_v35  ;;  %v3394_v38 = vpop.f32.mrb[23].mxu1  ;;  %v914_v1 = vmul.f32 0.5, %v908_v33 }
 0xaed   :  { %v918_v39 = vmul.f32 %v916_v36, %v908_v33  ;;  %v917_v40 = vmul.f32 0.044715, %v911_v37  ;;  %v915_v52 = vmul.f32 0.5, %v911_v37 }
 0xaef   :  { %v920_v41 = vmul.f32 %v918_v39, %v908_v33  ;;  %v919_v42 = vmul.f32 %v917_v40, %v911_v37 }
 0xaf1   :  { %v922_v43 = vadd.f32 %v920_v41, %v908_v33  ;;  %v921_v44 = vmul.f32 %v919_v42, %v911_v37 }
 0xaf3   :  { %v924_v45 = vmul.f32 0.7978846, %v922_v43  ;;  %v923_v46 = vadd.f32 %v921_v44, %v911_v37  ;;  %v3145_v37 = vld [vmem:[%s4026_s25 + $0x1] ss:$0 sm:$0xff]  ;;  %s4381_s25 = sld [smem:[%s4830_s0 + %s3940_s13]]   ;;  %s3953_s13 = smov 25  }
 0xaf5   :  { %3810 = vtanh.f32 %v924_v45  ;;  %v925_v47 = vmul.f32 0.7978846, %v923_v46 }
 0xaf7   :  { %3812 = vtanh.f32 %v925_v47 }
 0xaff   :  { %v3811_v49 = vpop.eup %3810 }
 0xb00   :  { %v928_v50 = vadd.f32 1.0, %v3811_v49 }
 0xb01   :  { %v3813_v51 = vpop.eup %3812 }
 0xb02   :  { %v929_v54 = vadd.f32 1.0, %v3813_v51  ;;  %v930_v12 = vmul.f32 %v928_v50, %v914_v1 }
 0xb04   :  { %v931_v55 = vmul.f32 %v929_v54, %v915_v52 }
 0xb06   :  { %v948_v56 = vpack.c.bf16 %v931_v55, %v930_v12 }
 0xb08   :  { %3412 = vmatmul.mubr.bf16.vlgmr.msra.gmra.mrb[8].mxu0 %v948_v56 }
 0xbdb   :  { %v1031_v58 = vpop.f32.mrb[8].mxu0 }
 0xbdc   :  { %v1038_v59 = vadd.f32 %v1031_v58, %v4144_v48  ;;  %v3413_v60 = vpop.f32.mrb[9].mxu0 }
 0xbdd   :  { %v1034_v62 = vpop.f32.mrb[10].mxu0 }
 0xbde   :  { %v4214_v63 = vadd.f32 %v3142_v11, %v1038_v59  ;;  %v1039_v0 = vadd.f32 %v1034_v62, %v4147_v61  ;;  %v3414_v2 = vpop.f32.mrb[11].mxu0 }
 0xbe0   :  { %v4217_v3 = vadd.f32 %v3142_v11, %v1039_v0  ;;  %v1049_v7 = vsel %vm268_vm4, %v4214_v63, 0.0 }
 0xbe1   :  { %1050 = vadd.xlane.f32.xlu1 %v1049_v7 }
 0xbe2   :  { %v1052_v8 = vsel %vm268_vm4, %v4217_v3, 0.0 }
 0xbe3   :  { %1053 = vadd.xlane.f32.xlu0 %v1052_v8 }
 0xc6e   :  { %v1051_v48 = vpop.xlane.xlu1 %1050 }
 0xc6f   :  { %v1055_v9 = vmul.f32 0.03125, %v1051_v48 }
 0xc70   :  { %v1054_v10 = vpop.xlane.xlu0 %1053 }
 0xc71   :  { %v1057_v13 = vsub.f32 %v4214_v63, %v1055_v9  ;;  %v1056_v15 = vmul.f32 0.03125, %v1054_v10  ;;  %v1286_v10 = vld [vmem:[%s4070_s3 + $0x40] sm:$0xff] }
 0xc73   :  { %v1058_v61 = vsub.f32 %v4217_v3, %v1056_v15  ;;  %v1059_v57 = vmul.f32 %v1057_v13, %v1057_v13 }
 0xc75   :  { %v1061_v16 = vsel %vm268_vm4, %v1059_v57, 0.0  ;;  %v1060_v53 = vmul.f32 %v1058_v61, %v1058_v61 }
 0xc76   :  { %1062 = vadd.xlane.f32.xlu1 %v1061_v16 }
 0xc77   :  { %v1064_v17 = vsel %vm268_vm4, %v1060_v53, 0.0 }
 0xc78   :  { %1065 = vadd.xlane.f32.xlu0 %v1064_v17  ;;  %v1287_v17 = vld [vmem:[%s4070_s3 + $0x48] sm:$0xff] }
 0xd03   :  { %v1063_v20 = vpop.xlane.xlu1 %1062 }
 0xd04   :  { %v1067_v21 = vmul.f32 0.03125, %v1063_v20  ;;  %v1288_v20 = vld [vmem:[%s4070_s3 + $0x50] sm:$0xff] }
 0xd05   :  { %v1066_v22 = vpop.xlane.xlu0 %1065 }
 0xd06   :  { %v1069_v23 = vadd.f32 1e-05, %v1067_v21  ;;  %v1068_v24 = vmul.f32 0.03125, %v1066_v22 }
 0xd08   :  { %3814 = vrsqrt.f32 %v1069_v23  ;;  %v1070_v25 = vadd.f32 1e-05, %v1068_v24 }
 0xd0a   :  { %3816 = vrsqrt.f32 %v1070_v25 }
 0xd12   :  { %v3815_v26 = vpop.eup %3814 }
 0xd13   :  { %v1073_v28 = vmul.f32 %v3815_v26, %v1057_v13 }
 0xd14   :  { %v3817_v29 = vpop.eup %3816 }
 0xd15   :  { %v1074_v30 = vmul.f32 %v3817_v29, %v1058_v61  ;;  %v1079_v31 = vmul.f32 %v3143_v27, %v1073_v28  ;;  %v1289_v61 = vld [vmem:[%s4070_s3 + $0x58] sm:$0xff]  ;;  %v1290_v28 = vld [vmem:[%s4070_s3 + $0x60] sm:$0xff] }
 0xd17   :  { %v1080_v33 = vmul.f32 %v3143_v27, %v1074_v30  ;;  %v1085_v34 = vadd.f32 %v3144_v32, %v1079_v31 }
 0xd19   :  { %v1086_v35 = vadd.f32 %v3144_v32, %v1080_v33 }
 0xd1b   :  { %v1091_v36 = vpack.c.bf16 %v1086_v35, %v1085_v34  ;;  %v1291_v34 = vld [vmem:[%s4070_s3 + $0x68] sm:$0xff] }
 0xd1d   :  { %3420 = vmatmul.mubr.msk.bf16.vlgmr.msra.gmra.mrb[24].mxu1 %vm268_vm4, %v1091_v36 }
 0xdf0   :  { %v1146_v38 = vpop.f32.mrb[24].mxu1 }
 0xdf1   :  { %v3421_v39 = vpop.f32.mrb[25].mxu1  ;;  %v1147_v41 = vadd.f32 %v3145_v37, %v1146_v38 }
 0xdf2   :  { %v1149_v40 = vpop.f32.mrb[26].mxu1  ;;  %v1292_v39 = vld [vmem:[%s4070_s3 + $0x70] sm:$0xff] }
 0xdf3   :  { %v1150_v42 = vadd.f32 %v3145_v37, %v1149_v40  ;;  %v3422_v43 = vpop.f32.mrb[27].mxu1  ;;  %v1293_v40 = vld [vmem:[%s4070_s3 + $0x78] sm:$0xff]  ;;  %s3942_s3 = smov 23  }
 0xdf5   :  { %v3690_v44 = vpack.i.bf16 %v1150_v42, %v1147_v41  ;;  %v4234_v45 = vpack.c.bf16 %v1150_v42, %v1147_v41 }
 0xdf7   :  { %3691 = vrot.lane.b32.xlu0 %v3690_v44, %s3925_s27  ;;  %3686 = vrot.lane.b32.xlu1 %v3690_v44, %s3924_s26  ;;  %s3941_s26 = smov 18  }
 0xdf8   :  { %3431 = vmatprep.mubr.msk.bf16.mxu1 %vm410_vm6, %v4234_v45 }
 0xdfb   :  { %3696 = vrot.lane.b32.xlu1 %v3690_v44, %s3926_s28 }
 0xdff   :  { %1181 = vrot.lane.b32.xlu1 %v4234_v45, %s3927_s29 }
 0xe69   :  { %v3692_v46 = vpop.permute.xlu0 %3691  ;;  %v3687_v47 = vpop.permute.xlu1 %3686 }
 0xe6a   :  { %v3694_v49 = vunpack.i.h.bf16 %v3692_v46  ;;  %v3693_v50 = vunpack.i.l.bf16 %v3692_v46  ;;  %v3689_v51 = vunpack.i.h.bf16 %v3687_v47  ;;  %v3688_v1 = vunpack.i.l.bf16 %v3687_v47 }
 0xe6c   :  { %v4243_v52 = vpack.c.bf16 %v3694_v49, %v3693_v50  ;;  %v4245_v54 = vpack.c.bf16 %v3689_v51, %v3688_v1 }
 0xe6d   :  { %v3697_v12 = vpop.permute.xlu1 %3696 }
 0xe6e   :  { %v3699_v55 = vunpack.i.h.bf16 %v3697_v12  ;;  %v3698_v56 = vunpack.i.l.bf16 %v3697_v12  ;;  %1183 = vrot.lane.b32.xlu0 %v4245_v54, %s3927_s29  ;;  %1185 = vrot.lane.b32.xlu1 %v4243_v52, %s3927_s29 }
 0xe70   :  { %v4251_v58 = vpack.c.bf16 %v3699_v55, %v3698_v56 }
 0xe71   :  { %v1182_v11 = vpop.permute.xlu1 %1181 }
 0xe72   :  { %v1202_v59 = vsel %vm410_vm6, %v1182_v11, 0  ;;  %1187 = vrot.lane.b32.xlu0 %v4251_v58, %s3927_s29  ;;  %3579 = vmatprep.subr.msk.bf16.mxu1 %vm410_vm6, %v1182_v11  ;;  %s4388_s29 = sld [smem:[%s4830_s0 + %s3941_s26]]  }
 0xe73   :  { %3424 = vmatpush3.bf16.xpose.msra.mxu1 %v1202_v59  ;;  %s3089_s26 = sld [smem:[%s4830_s0 + %s3932_s10]]  }
 0xee0   :  { %v1184_v60 = vpop.permute.xlu0 %1183  ;;  %v1186_v0 = vpop.permute.xlu1 %1185 }
 0xee1   :  { %v1205_v62 = vsel %vm410_vm6, %v1184_v60, 0  ;;  %3580 = vmatprep.subr.msk.bf16.mxu1 %vm410_vm6, %v1184_v60  ;;  %v1208_v2 = vsel %vm410_vm6, %v1186_v0, 0 }
 0xee2   :  { %3426 = vmatpush3.bf16.xpose.msra.mxu1 %v1205_v62 }
 0xee3   :  { %3581 = vmatprep.subr.msk.bf16.mxu1 %vm410_vm6, %v1186_v0 }
 0xee4   :  { %v1188_v7 = vpop.permute.xlu0 %1187 }
 0xee5   :  { %v1211_v8 = vsel %vm410_vm6, %v1188_v7, 0 }
 0xeea   :  { %3428 = vmatpush3.bf16.xpose.msra.mxu1 %v1208_v2 }
 0xeeb   :  { %3582 = vmatprep.subr.msk.bf16.mxu1 %vm410_vm6, %v1188_v7 }
 0xef2   :  { %3430 = vmatpush3.bf16.xpose.msra.mxu1 %v1211_v8 }
 0xef3   :  { %3463 = vmatprep.subr.bf16.mxu1 %v3918_v4 }
 0xef9   :  { %3432 = vmatmul.mubr.msk.bf16.vlgmr.msra.gmra.mrb[28].mxu1 %vm410_vm6, %v4245_v54 }
 0xefa   :  { %3435 = vmatprep.mubr.msk.bf16.mxu1 %vm410_vm6, %v4243_v52 }
 0xf01   :  { %3436 = vmatmul.mubr.msk.bf16.gmra.mrb[32].mxu1 %vm410_vm6, %v4251_v58 }
 0xf02   :  { %3467 = vmatprep.mubr.msk.bf16.mxu1 %vm3920_vm5, %v3918_v4 }
 0xfcc   :  { %v3433_v48 = vpop.f32.mrb[28].mxu1 }
 0xfcd   :  { %v1247_v9 = vpop.f32.mrb[29].mxu1  ;;  %v1280_v57 = vmul.f32 0.35355338, %v3433_v48 }
 0xfce   :  { %v1278_v13 = vmul.f32 0.35355338, %v1247_v9  ;;  %v3434_v15 = vpop.f32.mrb[30].mxu1 }
 0xfcf   :  { %v1281_v16 = vmul.f32 0.35355338, %v3434_v15  ;;  %v1250_v53 = vpop.f32.mrb[31].mxu1  ;;  %v1296_v24 = vadd.f32 %v1288_v20, %v1280_v57 }
 0xfd0   :  { %v1279_v18 = vmul.f32 0.35355338, %v1250_v53  ;;  %v1294_v19 = vadd.f32 %v1286_v10, %v1278_v13 }
 0xfd1   :  { %v1297_v23 = vadd.f32 %v1289_v61, %v1281_v16  ;;  %v1308_v33 = vsel %vm524_vm7, %v1296_v24, -inf }
 0xfd2   :  { %v1302_v21 = vsel %vm524_vm7, %v1294_v19, -inf  ;;  %v1295_v22 = vadd.f32 %v1287_v17, %v1279_v18 }
 0xfd3   :  { %1303 = vmax.xlane.f32.xlu1 %v1302_v21  ;;  %v1311_v31 = vsel %vm524_vm7, %v1297_v23, -inf }
 0xfd4   :  { %v3437_v25 = vpop.f32.mrb[32].mxu1  ;;  %v1305_v26 = vsel %vm524_vm7, %v1295_v22, -inf }
 0xfd5   :  { %1306 = vmax.xlane.f32.xlu0 %v1305_v26  ;;  %v1263_v27 = vpop.f32.mrb[33].mxu1  ;;  %v1284_v35 = vmul.f32 0.35355338, %v3437_v25 }
 0xfd6   :  { %v1282_v29 = vmul.f32 0.35355338, %v1263_v27  ;;  %v3438_v30 = vpop.f32.mrb[34].mxu1 }
 0xfd7   :  { %1312 = vmax.xlane.f32.xlu1 %v1311_v31  ;;  %v1266_v32 = vpop.f32.mrb[35].mxu1  ;;  %v1285_v36 = vmul.f32 0.35355338, %v3438_v30  ;;  %v1300_v44 = vadd.f32 %v1292_v39, %v1284_v35 }
 0xfd8   :  { %v1283_v37 = vmul.f32 0.35355338, %v1266_v32  ;;  %v1298_v38 = vadd.f32 %v1290_v28, %v1282_v29 }
 0xfd9   :  { %1309 = vmax.xlane.f32.xlu0 %v1308_v33  ;;  %v1301_v46 = vadd.f32 %v1293_v40, %v1285_v36  ;;  %v1320_v47 = vsel %vm524_vm7, %v1300_v44, -inf }
 0xfda   :  { %v1299_v41 = vadd.f32 %v1291_v34, %v1283_v37  ;;  %v1314_v42 = vsel %vm524_vm7, %v1298_v38, -inf }
 0xfdb   :  { %v1323_v49 = vsel %vm524_vm7, %v1301_v46, -inf }
 0xfdc   :  { %v1317_v43 = vsel %vm524_vm7, %v1299_v41, -inf }
 0xfdd   :  { %1315 = vmax.xlane.f32.xlu0 %v1314_v42  ;;  %1318 = vmax.xlane.f32.xlu1 %v1317_v43 }
 0xfe1   :  { %1321 = vmax.xlane.f32.xlu0 %v1320_v47  ;;  %1324 = vmax.xlane.f32.xlu1 %v1323_v49 }
 0xff2   :  { %1396 = vrot.lane.b32.xlu1 %v4245_v54, %s3929_s4 }
 0xff7   :  { %1394 = vrot.lane.b32.xlu0 %v4234_v45, %s3929_s4 }
0x1060   :  { %v1304_v50 = vpop.xlane.xlu1 %1303 }
0x1061   :  { %v1326_v55 = vsub.f32 %v1294_v19, %v1304_v50 }
0x1062   :  { %v1307_v51 = vpop.xlane.xlu0 %1306 }
0x1063   :  { %v1327_v1 = vsub.f32 %v1295_v22, %v1307_v51  ;;  %v1334_v0 = vmul.f32 1.442695, %v1326_v55 }
0x1064   :  { %v1313_v12 = vpop.xlane.xlu1 %1312 }
0x1065   :  { %v1329_v56 = vsub.f32 %v1297_v23, %v1313_v12  ;;  %v1336_v11 = vmul.f32 1.442695, %v1327_v1 }
0x1066   :  { %v1310_v59 = vpop.xlane.xlu0 %1309 }
0x1067   :  { %v1340_v60 = vmul.f32 1.442695, %v1329_v56  ;;  %v1328_v62 = vsub.f32 %v1296_v24, %v1310_v59 }
0x1069   :  { %3818 = vpow2.f32 %v1340_v60  ;;  %v1338_v2 = vmul.f32 1.442695, %v1328_v62 }
0x106a   :  { %3820 = vpow2.f32 %v1336_v11  ;;  %v1316_v7 = vpop.xlane.xlu0 %1315  ;;  %v1319_v8 = vpop.xlane.xlu1 %1318 }
0x106b   :  { %3822 = vpow2.f32 %v1338_v2  ;;  %v1330_v54 = vsub.f32 %v1298_v38, %v1316_v7  ;;  %v1331_v45 = vsub.f32 %v1299_v41, %v1319_v8 }
0x106c   :  { %3824 = vpow2.f32 %v1334_v0 }
0x106d   :  { %v1342_v15 = vmul.f32 1.442695, %v1330_v54  ;;  %v1344_v16 = vmul.f32 1.442695, %v1331_v45  ;;  %v3742_v54 = vld [vmem:[%s4118_s8 + $0x10] sm:$0xff]  }
0x106e   :  { %v1322_v48 = vpop.xlane.xlu0 %1321  ;;  %v1325_v9 = vpop.xlane.xlu1 %1324 }
0x106f   :  { %v1332_v10 = vsub.f32 %v1300_v44, %v1322_v48  ;;  %v1333_v13 = vsub.f32 %v1301_v46, %v1325_v9  ;;  %v3743_v48 = vld [vmem:[%s4118_s8 + $0x18] sm:$0xff]  }
0x1071   :  { %v1346_v61 = vmul.f32 1.442695, %v1332_v10  ;;  %v1348_v57 = vmul.f32 1.442695, %v1333_v13 }
0x1072   :  { %v1395_v53 = vpop.permute.xlu0 %1394  ;;  %v1397_v19 = vpop.permute.xlu1 %1396 }
0x1073   :  { %v4292_v17 = vpop.eup %3818  ;;  %3826 = vpow2.f32 %v1346_v61  ;;  %3439 = vmatprep.subr.bf16.mxu0 %v1395_v53 }
0x1074   :  { %v3821_v18 = vpop.eup %3820  ;;  %3828 = vpow2.f32 %v1348_v57  ;;  %3440 = vmatpush3.bf16.msra.mxu0 %v1395_v53  ;;  %v1359_v20 = vsel %vm524_vm7, %v4292_v17, 0.0 }
0x1075   :  { %v3823_v21 = vpop.eup %3822  ;;  %3830 = vpow2.f32 %v1342_v15  ;;  %1360 = vadd.xlane.f32.xlu1 %v1359_v20  ;;  %3441 = vmatprep.subr.bf16.mxu0 %v1397_v19  ;;  %v1353_v24 = vsel %vm524_vm7, %v3821_v18, 0.0 }
0x1076   :  { %3832 = vpow2.f32 %v1344_v16  ;;  %v1356_v22 = vsel %vm524_vm7, %v3823_v21, 0.0  ;;  %v3825_v23 = vpop.eup %3824 }
0x1077   :  { %1357 = vadd.xlane.f32.xlu0 %v1356_v22  ;;  %v1350_v25 = vsel %vm524_vm7, %v3825_v23, 0.0 }
0x1078   :  { %3442 = vmatpush3.bf16.msra.mxu0 %v1397_v19 }
0x1079   :  { %1354 = vadd.xlane.f32.xlu1 %v1353_v24 }
0x107b   :  { %1351 = vadd.xlane.f32.xlu0 %v1350_v25 }
0x107d   :  { %v3827_v26 = vpop.eup %3826 }
0x107e   :  { %v3829_v27 = vpop.eup %3828  ;;  %v1368_v28 = vsel %vm524_vm7, %v3827_v26, 0.0 }
0x107f   :  { %v3831_v29 = vpop.eup %3830  ;;  %1369 = vadd.xlane.f32.xlu0 %v1368_v28  ;;  %v1371_v30 = vsel %vm524_vm7, %v3829_v27, 0.0 }
0x1080   :  { %v3833_v31 = vpop.eup %3832  ;;  %1372 = vadd.xlane.f32.xlu1 %v1371_v30  ;;  %v1362_v32 = vsel %vm524_vm7, %v3831_v29, 0.0 }
0x1081   :  { %v1365_v33 = vsel %vm524_vm7, %v3833_v31, 0.0 }
0x1083   :  { %1363 = vadd.xlane.f32.xlu0 %v1362_v32 }
0x1084   :  { %1366 = vadd.xlane.f32.xlu1 %v1365_v33 }
0x1095   :  { %1398 = vrot.lane.b32.xlu1 %v4243_v52, %s3929_s4 }
0x1099   :  { %1400 = vrot.lane.b32.xlu0 %v4251_v58, %s3929_s4 }
0x1102   :  { %v1361_v34 = vpop.xlane.xlu1 %1360 }
0x1104   :  { %v1358_v35 = vpop.xlane.xlu0 %1357 }
0x1106   :  { %v1355_v36 = vpop.xlane.xlu1 %1354 }
0x1107   :  { %3834 = vrcp.f32 %v1355_v36  ;;  %v3160_v36 = vld [vmem:[%s4140_s15 + $0x1] ss:$0 sm:$0xff]  ;;  %s4393_s15 = sld [smem:[%s4830_s0 + %s3942_s3]]   ;;  %s3948_s3 = smov 22  }
0x1108   :  { %v1352_v37 = vpop.xlane.xlu0 %1351 }
0x1109   :  { %3836 = vrcp.f32 %v1352_v37 }
0x110a   :  { %3838 = vrcp.f32 %v1358_v35 }
0x110b   :  { %3840 = vrcp.f32 %v1361_v34 }
0x110c   :  { %v1370_v38 = vpop.xlane.xlu0 %1369 }
0x110d   :  { %v1373_v39 = vpop.xlane.xlu1 %1372  ;;  %3842 = vrcp.f32 %v1370_v38 }
0x1110   :  { %v1364_v40 = vpop.xlane.xlu0 %1363 }
0x1111   :  { %v3835_v41 = vpop.eup %3834  ;;  %3844 = vrcp.f32 %v1364_v40  ;;  %v1367_v42 = vpop.xlane.xlu1 %1366 }
0x1112   :  { %3846 = vrcp.f32 %v1367_v42  ;;  %v1383_v58 = vmul.f32 %v3835_v41, %v3821_v18 }
0x1113   :  { %v3837_v52 = vpop.eup %3836  ;;  %3848 = vrcp.f32 %v1373_v39 }
0x1114   :  { %v1382_v43 = vmul.f32 %v3837_v52, %v3825_v23  ;;  %v3839_v44 = vpop.eup %3838  ;;  %v1401_v50 = vpop.permute.xlu0 %1400 }
0x1115   :  { %v1399_v46 = vpop.permute.xlu1 %1398  ;;  %v3841_v49 = vpop.eup %3840  ;;  %v1384_v51 = vmul.f32 %v3839_v44, %v3823_v21 }
0x1116   :  { %3443 = vmatprep.subr.bf16.mxu0 %v1399_v46  ;;  %v1390_v47 = vpack.c.bf16 %v1383_v58, %v1382_v43  ;;  %v1385_v12 = vmul.f32 %v3841_v49, %v4292_v17 }
0x1117   :  { %3444 = vmatpush3.bf16.msra.mxu0 %v1399_v46  ;;  %v3843_v1 = vpop.eup %3842 }
0x1118   :  { %3445 = vmatprep.subr.bf16.mxu0 %v1401_v50  ;;  %3447 = vmatprep.mubr.msk.bf16.mxu0 %vm524_vm7, %v1390_v47  ;;  %v1391_v11 = vpack.c.bf16 %v1385_v12, %v1384_v51  ;;  %v1388_v2 = vmul.f32 %v3843_v1, %v3827_v26 }
0x111b   :  { %v3845_v55 = vpop.eup %3844  ;;  %3446 = vmatpush3.bf16.msra.mxu0 %v1401_v50 }
0x111c   :  { %v3847_v56 = vpop.eup %3846  ;;  %v1386_v59 = vmul.f32 %v3845_v55, %v3831_v29  ;;  %3455 = vmatprep.subr.bf16.mxu0 %v3918_v4  ;;  %v3744_v55 = vld [vmem:[%s4160_s20 + $0x10] sm:$0xff]  }
0x111d   :  { %v3849_v60 = vpop.eup %3848  ;;  %v1387_v62 = vmul.f32 %v3847_v56, %v3833_v31  ;;  %3464 = vmatpush3.bf16.msra.mxu1 %v3744_v55  ;;  %v3745_v56 = vld [vmem:[%s4160_s20 + $0x18] sm:$0xff]   ;;  %s3943_s20 = smov 15  }
0x111e   :  { %3448 = vmatmul.mubr.msk.bf16.vlgmr.msra.gmra.mrb[12].mxu0 %vm524_vm7, %v1391_v11  ;;  %v1389_v7 = vmul.f32 %v3849_v60, %v3829_v27  ;;  %3465 = vmatprep.subr.bf16.mxu1 %v3918_v4  ;;  %s3080_s7 = sld [smem:[%s4830_s0 + %s3943_s20]]   ;;  %s3949_s20 = smov 27  }
0x111f   :  { %v1392_v0 = vpack.c.bf16 %v1387_v62, %v1386_v59  ;;  %3456 = vmatpush3.bf16.msra.mxu0 %v3742_v54  ;;  %v3161_v54 = vld [vmem:[%s4169_s30 + $0x1] ss:$0 sm:$0xff] }
0x1120   :  { %v1393_v8 = vpack.c.bf16 %v1389_v7, %v1388_v2  ;;  %3457 = vmatprep.subr.bf16.mxu0 %v3918_v4 }
0x1121   :  { %3451 = vmatprep.mubr.msk.bf16.mxu0 %vm524_vm7, %v1392_v0  ;;  %3466 = vmatpush3.bf16.msra.mxu1 %v3745_v56 }
0x1123   :  { %3458 = vmatpush3.bf16.msra.mxu0 %v3743_v48 }
0x1124   :  { %3471 = vmatprep.subr.bf16.mxu0 %v3918_v4 }
0x1126   :  { %3452 = vmatmul.mubr.msk.bf16.gmra.mrb[16].mxu0 %vm524_vm7, %v1393_v8 }
0x1127   :  { %3459 = vmatprep.mubr.msk.bf16.mxu0 %vm3920_vm5, %v3918_v4 }
0x11f1   :  { %v3449_v45 = vpop.f32.mrb[12].mxu0 }
0x11f2   :  { %v1452_v9 = vpop.f32.mrb[13].mxu0 }
0x11f3   :  { %v3450_v10 = vpop.f32.mrb[14].mxu0 }
0x11f4   :  { %v3700_v13 = vpack.i.bf16 %v3450_v10, %v3449_v45  ;;  %v1455_v15 = vpop.f32.mrb[15].mxu0  ;;  %v3162_v10 = vld [vmem:[%s4174_s6 + $0x1] ss:$0 sm:$0xff]  ;;  %s3957_s6 = smov 31  }
0x11f5   :  { %s3096_s14 = sld [smem:[%s4830_s0 + %s3957_s6]]  }
0x11f6   :  { %3701 = vrot.lane.b32.xlu1 %v3700_v13, %s3931_s9 }
0x11f9   :  { %v3453_v61 = vpop.f32.mrb[16].mxu0 }
0x11fa   :  { %v1468_v57 = vpop.f32.mrb[17].mxu0 }
0x11fb   :  { %v3454_v16 = vpop.f32.mrb[18].mxu0 }
0x11fc   :  { %v3710_v53 = vpack.i.bf16 %v3454_v16, %v3453_v61  ;;  %v1471_v17 = vpop.f32.mrb[19].mxu0  ;;  %v3746_v16 = vld [vmem:[%s4184_s16 + $0x40] sm:$0xff]  }
0x11fd   :  { %v3705_v18 = vpack.i.bf16 %v1471_v17, %v1468_v57  ;;  %v3748_v17 = vld [vmem:[%s4184_s16 + $0x50] sm:$0xff]  }
0x11fe   :  { %3711 = vrot.lane.b32.xlu1 %v3710_v53, %s3932_s10  ;;  %v3747_v53 = vld [vmem:[%s4184_s16 + $0x48] sm:$0xff]   ;;  %s3947_s10 = smov 29  }
0x11ff   :  { %3706 = vrot.lane.b32.xlu0 %v3705_v18, %s3933_s11  ;;  %v3749_v18 = vld [vmem:[%s4184_s16 + $0x58] sm:$0xff]  }
0x1268   :  { %v3702_v19 = vpop.permute.xlu1 %3701 }
0x1269   :  { %v3704_v20 = vunpack.i.h.bf16 %v3702_v19  ;;  %v3703_v21 = vunpack.i.l.bf16 %v3702_v19  ;;  %v3750_v19 = vld [vmem:[%s4184_s16 + $0x60] sm:$0xff]  }
0x126b   :  { %v1507_v26 = vsel %vm410_vm6, %v1452_v9, %v3703_v21  ;;  %v1508_v27 = vsel %vm410_vm6, %v1455_v15, %v3704_v20  ;;  %v3751_v20 = vld [vmem:[%s4184_s16 + $0x68] sm:$0xff]   ;;  %v3752_v21 = vld [vmem:[%s4184_s16 + $0x70] sm:$0xff]  }
0x1270   :  { %v3712_v22 = vpop.permute.xlu1 %3711 }
0x1271   :  { %v3707_v23 = vpop.permute.xlu0 %3706  ;;  %v3714_v28 = vunpack.i.h.bf16 %v3712_v22  ;;  %v3713_v29 = vunpack.i.l.bf16 %v3712_v22  ;;  %v3753_v22 = vld [vmem:[%s4184_s16 + $0x78] sm:$0xff]   ;;  %s3081_s16 = sld [smem:[%s4830_s0 + %s3933_s11]]   ;;  %s3944_s11 = smov 32  }
0x1272   :  { %v3709_v24 = vunpack.i.h.bf16 %v3707_v23  ;;  %v3708_v25 = vunpack.i.l.bf16 %v3707_v23  ;;  %v3163_v23 = vld [vmem:[%s4204_s23 + $0x1] ss:$0 sm:$0xff]  ;;  %s4432_s22 = sld [smem:[%s4830_s0 + %s3944_s11]]   ;;  %s3945_s23 = smov 28  }
0x1273   :  { %s4437_s2 = sld [smem:[%s4830_s0 + %s3945_s23]]   ;;  %s3959_s23 = smov 34  }
0x1274   :  { %v1510_v30 = vsel %vm732_vm8, %v1508_v27, %v3709_v24  ;;  %v1509_v31 = vsel %vm732_vm8, %v1507_v26, %v3708_v25 }
0x1275   :  { %v1512_v32 = vsel %vm735_vm9, %v1510_v30, %v3714_v28  ;;  %v1511_v33 = vsel %vm735_vm9, %v1509_v31, %v3713_v29 }
0x1276   :  { %v1517_v34 = vpack.c.bf16 %v1512_v32, %v1511_v33 }
0x1278   :  { %3460 = vmatmul.mubr.msk.bf16.vlgmr.msra.gmra.mrb[20].mxu0 %vm268_vm4, %v1517_v34 }
0x1279   :  { %3487 = vmatprep.mubr.msk.bf16.mxu0 %vm3920_vm5, %v3918_v4  ;;  %3472 = vmatpush3.bf16.msra.mxu0 %v3746_v16 }
0x127a   :  { %3473 = vmatprep.subr.bf16.mxu0 %v3918_v4 }
0x127d   :  { %3474 = vmatpush3.bf16.msra.mxu0 %v3747_v53 }
0x127e   :  { %3475 = vmatprep.subr.bf16.mxu0 %v3918_v4 }
0x1281   :  { %3476 = vmatpush3.bf16.msra.mxu0 %v3748_v17 }
0x1282   :  { %3477 = vmatprep.subr.bf16.mxu0 %v3918_v4 }
0x1285   :  { %3478 = vmatpush3.bf16.msra.mxu0 %v3749_v18 }
0x1286   :  { %3479 = vmatprep.subr.bf16.mxu0 %v3918_v4 }
0x1289   :  { %3480 = vmatpush3.bf16.msra.mxu0 %v3750_v19  ;;  %v3176_v19 = vld [vmem:[%s3080_s7] ss:$0 sm:$0xff]  ;;  %s4503_s7 = sld [smem:[%s4830_s0 + %s3949_s20]]  }
0x128a   :  { %3481 = vmatprep.subr.bf16.mxu0 %v3918_v4 }
0x128d   :  { %3482 = vmatpush3.bf16.msra.mxu0 %v3751_v20 }
0x128e   :  { %3483 = vmatprep.subr.bf16.mxu0 %v3918_v4 }
0x1291   :  { %3484 = vmatpush3.bf16.msra.mxu0 %v3752_v21 }
0x1292   :  { %3485 = vmatprep.subr.bf16.mxu0 %v3918_v4 }
0x1295   :  { %3486 = vmatpush3.bf16.msra.mxu0 %v3753_v22 }
0x1296   :  { %3527 = vmatprep.subr.bf16.mxu0 %v3918_v4 }
0x134b   :  { %v1567_v35 = vpop.f32.mrb[20].mxu0 }
0x134c   :  { %v1574_v37 = vadd.f32 %v1567_v35, %v4214_v63  ;;  %v3461_v38 = vpop.f32.mrb[21].mxu0 }
0x134d   :  { %v1570_v39 = vpop.f32.mrb[22].mxu0 }
0x134e   :  { %v4333_v40 = vadd.f32 %v3160_v36, %v1574_v37  ;;  %v1575_v41 = vadd.f32 %v1570_v39, %v4217_v3  ;;  %v3462_v42 = vpop.f32.mrb[23].mxu0 }
0x1350   :  { %v4336_v52 = vadd.f32 %v3160_v36, %v1575_v41  ;;  %v1585_v43 = vsel %vm268_vm4, %v4333_v40, 0.0 }
0x1351   :  { %1586 = vadd.xlane.f32.xlu0 %v1585_v43 }
0x1352   :  { %v1588_v58 = vsel %vm268_vm4, %v4336_v52, 0.0 }
0x1353   :  { %1589 = vadd.xlane.f32.xlu1 %v1588_v58 }
0x13de   :  { %v1587_v63 = vpop.xlane.xlu0 %1586 }
0x13df   :  { %v1591_v44 = vmul.f32 0.03125, %v1587_v63 }
0x13e0   :  { %v1590_v46 = vpop.xlane.xlu1 %1589 }
0x13e1   :  { %v1593_v47 = vsub.f32 %v4333_v40, %v1591_v44  ;;  %v1592_v49 = vmul.f32 0.03125, %v1590_v46 }
0x13e3   :  { %v1594_v3 = vsub.f32 %v4336_v52, %v1592_v49  ;;  %v1595_v50 = vmul.f32 %v1593_v47, %v1593_v47 }
0x13e5   :  { %v1597_v51 = vsel %vm268_vm4, %v1595_v50, 0.0  ;;  %v1596_v1 = vmul.f32 %v1594_v3, %v1594_v3  ;;  %v3175_v50 = vld [vmem:[%s4210_s5 + $0x1] ss:$0 sm:$0xff]  ;;  %s3086_s5 = sld [smem:[%s4830_s0 + %s3952_s1]]  }
0x13e6   :  { %1598 = vadd.xlane.f32.xlu0 %v1597_v51 }
0x13e7   :  { %v1600_v12 = vsel %vm268_vm4, %v1596_v1, 0.0 }
0x13ea   :  { %1601 = vadd.xlane.f32.xlu0 %v1600_v12 }
0x1473   :  { %v1599_v11 = vpop.xlane.xlu0 %1598 }
0x1474   :  { %v1603_v59 = vmul.f32 0.03125, %v1599_v11 }
0x1476   :  { %v1605_v60 = vadd.f32 1e-05, %v1603_v59 }
0x1477   :  { %v1602_v62 = vpop.xlane.xlu0 %1601 }
0x1478   :  { %3850 = vrsqrt.f32 %v1605_v60  ;;  %v1604_v0 = vmul.f32 0.03125, %v1602_v62 }
0x147a   :  { %v1606_v2 = vadd.f32 1e-05, %v1604_v0 }
0x147c   :  { %3852 = vrsqrt.f32 %v1606_v2 }
0x1482   :  { %v3851_v7 = vpop.eup %3850 }
0x1483   :  { %v1609_v8 = vmul.f32 %v3851_v7, %v1593_v47 }
0x1485   :  { %v1615_v48 = vmul.f32 %v3161_v54, %v1609_v8 }
0x1486   :  { %v3853_v45 = vpop.eup %3852 }
0x1487   :  { %v1610_v9 = vmul.f32 %v3853_v45, %v1594_v3  ;;  %v1621_v15 = vadd.f32 %v3162_v10, %v1615_v48 }
0x1489   :  { %v1616_v13 = vmul.f32 %v3161_v54, %v1610_v9 }
0x148b   :  { %v1622_v61 = vadd.f32 %v3162_v10, %v1616_v13  ;;  %v1866_v10 = vld [vmem:[%s4381_s25] sm:$0xff] }
0x148c   :  { %v3755_v13 = vld [vmem:[%s4393_s15] sm:$0xff]  }
0x148d   :  { %v1627_v57 = vpack.c.bf16 %v1622_v61, %v1621_v15 }
0x148f   :  { %3468 = vmatmul.mubr.msk.bf16.vlgmr.msra.gmra.mrb[36].mxu1 %vm268_vm4, %v1627_v57 }
0x1490   :  { %3499 = vmatprep.mubr.msk.f32.mxu1 %vm268_vm4, %v1866_v10 }
0x1562   :  { %v1682_v24 = vpop.f32.mrb[36].mxu1 }
0x1563   :  { %v1683_v25 = vadd.f32 %v3163_v23, %v1682_v24  ;;  %v3469_v26 = vpop.f32.mrb[37].mxu1  ;;  %v3177_v24 = vld [vmem:[%s3081_s16] ss:$0 sm:$0xff]  ;;  %s3958_s16 = smov 33  }
0x1564   :  { %v1685_v27 = vpop.f32.mrb[38].mxu1  ;;  %s3098_s19 = sld [smem:[%s4830_s0 + %s3958_s16]]  }
0x1565   :  { %v1691_v28 = vmul.f32 0.044715, %v1683_v25  ;;  %v1686_v29 = vadd.f32 %v3163_v23, %v1685_v27  ;;  %v3470_v30 = vpop.f32.mrb[39].mxu1  ;;  %v1689_v58 = vmul.f32 0.5, %v1683_v25 }
0x1566   :  { %v3754_v30 = vld [vmem:[%s4388_s29] sm:$0xff]  }
0x1567   :  { %v1693_v31 = vmul.f32 %v1691_v28, %v1683_v25  ;;  %v1692_v32 = vmul.f32 0.044715, %v1686_v29  ;;  %v1690_v63 = vmul.f32 0.5, %v1686_v29 }
0x1569   :  { %v1695_v33 = vmul.f32 %v1693_v31, %v1683_v25  ;;  %v1694_v34 = vmul.f32 %v1692_v32, %v1686_v29  ;;  %v1868_v31 = vld [vmem:[%s4381_s25 + $0x10] sm:$0xff]  ;;  %v1869_v32 = vld [vmem:[%s4381_s25 + $0x18] sm:$0xff] }
0x156b   :  { %v1697_v35 = vadd.f32 %v1695_v33, %v1683_v25  ;;  %v1696_v36 = vmul.f32 %v1694_v34, %v1686_v29  ;;  %v1870_v33 = vld [vmem:[%s4381_s25 + $0x20] sm:$0xff]  ;;  %v1872_v34 = vld [vmem:[%s4381_s25 + $0x30] sm:$0xff] }
0x156d   :  { %v1699_v37 = vmul.f32 0.7978846, %v1697_v35  ;;  %v1698_v38 = vadd.f32 %v1696_v36, %v1686_v29  ;;  %v1867_v29 = vld [vmem:[%s4381_s25 + $0x8] sm:$0xff]  ;;  %v1873_v35 = vld [vmem:[%s4381_s25 + $0x38] sm:$0xff] }
0x156e   :  { %v3756_v36 = vld [vmem:[%s4388_s29 + $0x8] sm:$0xff]   ;;  %s3094_s29 = sld [smem:[%s4830_s0 + %s3947_s10]]  }
0x156f   :  { %3854 = vtanh.f32 %v1699_v37  ;;  %v1700_v39 = vmul.f32 0.7978846, %v1698_v38  ;;  %v3757_v37 = vld [vmem:[%s4393_s15 + $0x8] sm:$0xff]   ;;  %s3087_s15 = sld [smem:[%s4830_s0 + %s3948_s3]]  }
0x1570   :  { %s3101_s10 = sld [smem:[%s4830_s0 + %s3961_s21]]  }
0x1571   :  { %3856 = vtanh.f32 %v1700_v39 }
0x1579   :  { %v3855_v41 = vpop.eup %3854 }
0x157a   :  { %v1703_v42 = vadd.f32 1.0, %v3855_v41  ;;  %v3758_v41 = vld [vmem:[%s4437_s2] sm:$0xff]  }
0x157b   :  { %v3857_v43 = vpop.eup %3856 }
0x157c   :  { %v1704_v44 = vadd.f32 1.0, %v3857_v43  ;;  %v1705_v46 = vmul.f32 %v1703_v42, %v1689_v58 }
0x157e   :  { %v1706_v47 = vmul.f32 %v1704_v44, %v1690_v63  ;;  %v3759_v63 = vld [vmem:[%s4437_s2 + $0x8] sm:$0xff]  }
0x1580   :  { %v1723_v49 = vpack.c.bf16 %v1706_v47, %v1705_v46  ;;  %v3760_v47 = vld [vmem:[%s4437_s2 + $0x10] sm:$0xff]  }
0x1582   :  { %3488 = vmatmul.mubr.bf16.vlgmr.msra.gmra.mrb[24].mxu0 %v1723_v49 }
0x1583   :  { %3531 = vmatprep.mubr.msk.bf16.mxu0 %vm3920_vm5, %v3918_v4  ;;  %3528 = vmatpush3.bf16.msra.mxu0 %v3755_v13 }
0x1584   :  { %3529 = vmatprep.subr.bf16.mxu0 %v3918_v4 }
0x1587   :  { %3530 = vmatpush3.bf16.msra.mxu0 %v3757_v37 }
0x1588   :  { %3543 = vmatprep.subr.bf16.mxu0 %v3918_v4 }
0x1655   :  { %v1806_v3 = vpop.f32.mrb[24].mxu0 }
0x1656   :  { %v1813_v51 = vadd.f32 %v1806_v3, %v4333_v40  ;;  %v3489_v1 = vpop.f32.mrb[25].mxu0 }
0x1657   :  { %v1809_v12 = vpop.f32.mrb[26].mxu0 }
0x1658   :  { %v1814_v55 = vadd.f32 %v1809_v12, %v4336_v52  ;;  %v3490_v56 = vpop.f32.mrb[27].mxu0  ;;  %v1820_v11 = vadd.f32 %v3175_v50, %v1813_v51  ;;  %v3761_v51 = vld [vmem:[%s4437_s2 + $0x18] sm:$0xff]   ;;  %v3762_v12 = vld [vmem:[%s4437_s2 + $0x20] sm:$0xff]  }
0x165a   :  { %v1824_v59 = vsel %vm268_vm4, %v1820_v11, 0.0  ;;  %v1821_v60 = vadd.f32 %v3175_v50, %v1814_v55  ;;  %v3763_v55 = vld [vmem:[%s4437_s2 + $0x28] sm:$0xff]   ;;  %s3099_s2 = sld [smem:[%s4830_s0 + %s3959_s23]]   ;;  %s3962_s23 = smov 39  }
0x165b   :  { %1825 = vadd.xlane.f32.xlu1 %v1824_v59 }
0x165c   :  { %v1827_v62 = vsel %vm268_vm4, %v1821_v60, 0.0 }
0x165d   :  { %1828 = vadd.xlane.f32.xlu0 %v1827_v62 }
0x16e8   :  { %v1826_v0 = vpop.xlane.xlu1 %1825 }
0x16e9   :  { %v1830_v2 = vmul.f32 0.03125, %v1826_v0 }
0x16ea   :  { %v1829_v7 = vpop.xlane.xlu0 %1828 }
0x16eb   :  { %v1832_v8 = vsub.f32 %v1820_v11, %v1830_v2  ;;  %v1831_v54 = vmul.f32 0.03125, %v1829_v7 }
0x16ed   :  { %v1833_v45 = vsub.f32 %v1821_v60, %v1831_v54  ;;  %v1834_v40 = vmul.f32 %v1832_v8, %v1832_v8 }
0x16ef   :  { %v1836_v48 = vsel %vm268_vm4, %v1834_v40, 0.0  ;;  %v1835_v9 = vmul.f32 %v1833_v45, %v1833_v45 }
0x16f0   :  { %1837 = vadd.xlane.f32.xlu1 %v1836_v48  ;;  %v3195_v48 = vld [vmem:[%s3089_s26] ss:$0 sm:$0xff]  ;;  %s3954_s26 = smov 26  }
0x16f1   :  { %v1839_v52 = vsel %vm268_vm4, %v1835_v9, 0.0  ;;  %s3091_s28 = sld [smem:[%s4830_s0 + %s3954_s26]]  }
0x16f2   :  { %1840 = vadd.xlane.f32.xlu0 %v1839_v52 }
0x177d   :  { %v1838_v15 = vpop.xlane.xlu1 %1837 }
0x177e   :  { %v1842_v61 = vmul.f32 0.03125, %v1838_v15 }
0x177f   :  { %v1841_v57 = vpop.xlane.xlu0 %1840 }
0x1780   :  { %v1844_v16 = vadd.f32 1e-05, %v1842_v61  ;;  %v1843_v53 = vmul.f32 0.03125, %v1841_v57 }
0x1782   :  { %3858 = vrsqrt.f32 %v1844_v16  ;;  %v1845_v17 = vadd.f32 1e-05, %v1843_v53 }
0x1784   :  { %3860 = vrsqrt.f32 %v1845_v17 }
0x178c   :  { %v3859_v18 = vpop.eup %3858 }
0x178d   :  { %v1848_v20 = vmul.f32 %v3859_v18, %v1832_v8 }
0x178e   :  { %v3861_v21 = vpop.eup %3860 }
0x178f   :  { %v1849_v22 = vmul.f32 %v3861_v21, %v1833_v45  ;;  %v1856_v23 = vmul.f32 %v3176_v19, %v1848_v20 }
0x1791   :  { %v1857_v25 = vmul.f32 %v3176_v19, %v1849_v22  ;;  %v1864_v26 = vadd.f32 %v3177_v24, %v1856_v23 }
0x1793   :  { %v1865_v27 = vadd.f32 %v3177_v24, %v1857_v25 }
0x1795   :  { %v3567_v28 = vpack.c.bf16 %v1865_v27, %v1864_v26 }
0x1797   :  { %3568 = vmatprep.subr.bf16.mxu1 %v3567_v28 }
0x1798   :  { %3570 = vmatpush3.bf16.msra.mxu1 %v3567_v28 }
0x1799   :  { %3572 = vmatprep.subr.bf16.mxu1 %v3992_v14 }
0x179c   :  { %3574 = vmatpush3.bf16.msra.mxu1 %v3992_v14  ;;  %v1871_v14 = vld [vmem:[%s4381_s25 + $0x28] sm:$0xff]  ;;  %s3090_s25 = sld [smem:[%s4830_s0 + %s3953_s13]]  }
0x179d   :  { %3511 = vmatprep.subr.bf16.mxu1 %v3918_v4 }
0x179f   :  { %3500 = vmatmul.mubr.msk.f32.vlgmr.msra.gmra.mrb[2].mxu1 %vm268_vm4, %v1867_v29 }
0x17a0   :  { %3502 = vmatprep.mubr.msk.f32.mxu1 %vm268_vm4, %v1868_v31  ;;  %3512 = vmatpush3.bf16.msra.mxu1 %v3754_v30 }
0x17a1   :  { %3513 = vmatprep.subr.bf16.mxu1 %v3918_v4 }
0x17a3   :  { %3503 = vmatmul.mubr.msk.f32.gmra.mrb[40].mxu1 %vm268_vm4, %v1869_v32 }
0x17a4   :  { %3505 = vmatprep.mubr.msk.f32.mxu1 %vm268_vm4, %v1870_v33  ;;  %3514 = vmatpush3.bf16.msra.mxu1 %v3756_v36 }
0x17a5   :  { %3519 = vmatprep.subr.bf16.mxu1 %v3918_v4 }
0x17a7   :  { %3506 = vmatmul.mubr.msk.f32.gmra.mrb[42].mxu1 %vm268_vm4, %v1871_v14 }
0x17a8   :  { %3508 = vmatprep.mubr.msk.f32.mxu1 %vm268_vm4, %v1872_v34 }
0x17ab   :  { %3509 = vmatmul.mubr.msk.f32.gmra.mrb[44].mxu1 %vm268_vm4, %v1873_v35 }
0x17ac   :  { %3515 = vmatprep.mubr.msk.bf16.mxu1 %vm3920_vm5, %v3918_v4 }
0x1872   :  { %v3501_v38 = vpop.f32.mrb[2].mxu1 }
0x1873   :  { %v1964_v39 = vpop.f32.mrb[3].mxu1 }
0x1874   :  { %v2027_v42 = vpack.c.bf16 %v3501_v38, %v1964_v39 }
0x1876   :  { %v3504_v43 = vpop.f32.mrb[40].mxu1  ;;  %3516 = vmatmul.mubr.msk.bf16.vlgmr.msra.gmra.mrb[48].mxu1 %vm268_vm4, %v2027_v42  ;;  %3532 = vmatmul.mubr.msk.bf16.vlgmr.msra.gmra.mrb[28].mxu0 %vm268_vm4, %v2027_v42 }
0x1877   :  { %v1974_v58 = vpop.f32.mrb[41].mxu1  ;;  %3544 = vmatpush3.bf16.msra.mxu0 %v3758_v41  ;;  %3555 = vmatprep.mubr.msk.bf16.mxu0 %vm3920_vm5, %v3918_v4 }
0x1878   :  { %3545 = vmatprep.subr.bf16.mxu0 %v3918_v4  ;;  %3523 = vmatprep.mubr.msk.bf16.mxu1 %vm3920_vm5, %v3918_v4 }
0x187a   :  { %v3507_v44 = vpop.f32.mrb[42].mxu1 }
0x187b   :  { %v1984_v46 = vpop.f32.mrb[43].mxu1  ;;  %3546 = vmatpush3.bf16.msra.mxu0 %v3759_v63 }
0x187c   :  { %v3715_v49 = vpack.i.bf16 %v3507_v44, %v1984_v46  ;;  %3547 = vmatprep.subr.bf16.mxu0 %v3918_v4 }
0x187e   :  { %3716 = vrot.lane.b32.xlu1 %v3715_v49, %s3944_s11  ;;  %v3510_v3 = vpop.f32.mrb[44].mxu1  ;;  %s4520_s11 = sld [smem:[%s4830_s0 + %s3950_s12]]  }
0x187f   :  { %v1994_v50 = vpop.f32.mrb[45].mxu1  ;;  %3548 = vmatpush3.bf16.msra.mxu0 %v3760_v47 }
0x1880   :  { %v3720_v1 = vpack.i.bf16 %v3510_v3, %v1994_v50  ;;  %3549 = vmatprep.subr.bf16.mxu0 %v3918_v4 }
0x1882   :  { %3721 = vrot.lane.b32.xlu0 %v3720_v1, %s3929_s4  ;;  %s3946_s4 = smov 19  }
0x1883   :  { %3550 = vmatpush3.bf16.msra.mxu0 %v3761_v51  ;;  %s3084_s17 = sld [smem:[%s4830_s0 + %s3946_s4]]   ;;  %s3960_s4 = smov 35  }
0x1884   :  { %3551 = vmatprep.subr.bf16.mxu0 %v3918_v4 }
0x1887   :  { %3552 = vmatpush3.bf16.msra.mxu0 %v3762_v12 }
0x1888   :  { %3553 = vmatprep.subr.bf16.mxu0 %v3918_v4 }
0x1889   :  { %v3186_v40 = vld [vmem:[%s3084_s17] ss:$0 sm:$0xff]  ;;  %s3100_s17 = sld [smem:[%s4830_s0 + %s3960_s4]]  }
0x188b   :  { %3554 = vmatpush3.bf16.msra.mxu0 %v3763_v55 }
0x18f0   :  { %v3717_v56 = vpop.permute.xlu1 %3716 }
0x18f1   :  { %v3719_v11 = vunpack.i.h.bf16 %v3717_v56  ;;  %v3718_v59 = vunpack.i.l.bf16 %v3717_v56 }
0x18f3   :  { %v2020_v2 = vsel %vm268_vm4, %v3504_v43, %v3719_v11  ;;  %v2019_v7 = vsel %vm268_vm4, %v1974_v58, %v3718_v59 }
0x18f4   :  { %v3722_v60 = vpop.permute.xlu0 %3721 }
0x18f5   :  { %v3724_v62 = vunpack.i.h.bf16 %v3722_v60  ;;  %v3723_v0 = vunpack.i.l.bf16 %v3722_v60 }
0x18f7   :  { %v2022_v8 = vsel %vm524_vm7, %v2020_v2, %v3724_v62  ;;  %v2021_v54 = vsel %vm524_vm7, %v2019_v7, %v3723_v0  ;;  %v3204_v62 = vld [vmem:[%s3094_s29] ss:$0 sm:$0xff]  ;;  %s3955_s29 = smov 38  }
0x18f8   :  { %v2413_v45 = vpack.c.bf16 %v2022_v8, %v2021_v54  ;;  %s4562_s9 = sld [smem:[%s4830_s0 + %s3955_s29]]  }
0x18fa   :  { %3556 = vmatmul.mubr.msk.bf16.vlgmr.msra.gmra.mrb[32].mxu0 %vm2457_vm10, %v2413_v45 }
0x1949   :  { %v2084_v9 = vpop.f32.mrb[48].mxu1  ;;  %v2271_v52 = vpop.f32.mrb[28].mxu0 }
0x194a   :  { %v2085_v10 = vadd.f32 %v3186_v40, %v2084_v9  ;;  %v2272_v13 = vadd.f32 %v3195_v48, %v2271_v52  ;;  %v3517_v15 = vpop.f32.mrb[49].mxu1  ;;  %v3533_v61 = vpop.f32.mrb[29].mxu0 }
0x194b   :  { %v2087_v57 = vpop.f32.mrb[50].mxu1  ;;  %v2274_v16 = vpop.f32.mrb[30].mxu0 }
0x194c   :  { %v2093_v53 = vmul.f32 0.044715, %v2085_v10  ;;  %v2280_v17 = vmul.f32 0.044715, %v2272_v13  ;;  %v2088_v18 = vadd.f32 %v3186_v40, %v2087_v57  ;;  %v2275_v19 = vadd.f32 %v3195_v48, %v2274_v16  ;;  %v3518_v20 = vpop.f32.mrb[51].mxu1  ;;  %v3534_v21 = vpop.f32.mrb[31].mxu0 }
0x194d   :  { %v2091_v42 = vmul.f32 0.5, %v2085_v10  ;;  %v2278_v3 = vmul.f32 0.5, %v2272_v13 }
0x194e   :  { %v2094_v22 = vmul.f32 0.044715, %v2088_v18  ;;  %v2281_v23 = vmul.f32 0.044715, %v2275_v19  ;;  %v2095_v24 = vmul.f32 %v2093_v53, %v2085_v10  ;;  %v2282_v25 = vmul.f32 %v2280_v17, %v2272_v13 }
0x194f   :  { %v2092_v47 = vmul.f32 0.5, %v2088_v18  ;;  %v2279_v55 = vmul.f32 0.5, %v2275_v19 }
0x1950   :  { %v2097_v26 = vmul.f32 %v2095_v24, %v2085_v10  ;;  %v2096_v27 = vmul.f32 %v2094_v22, %v2088_v18  ;;  %v2283_v28 = vmul.f32 %v2281_v23, %v2275_v19  ;;  %v2284_v29 = vmul.f32 %v2282_v25, %v2272_v13 }
0x1952   :  { %v2099_v30 = vadd.f32 %v2097_v26, %v2085_v10  ;;  %v2098_v31 = vmul.f32 %v2096_v27, %v2088_v18  ;;  %v2285_v32 = vmul.f32 %v2283_v28, %v2275_v19  ;;  %v2286_v33 = vadd.f32 %v2284_v29, %v2272_v13 }
0x1954   :  { %v2101_v14 = vmul.f32 0.7978846, %v2099_v30  ;;  %v2100_v34 = vadd.f32 %v2098_v31, %v2088_v18  ;;  %v2287_v35 = vadd.f32 %v2285_v32, %v2275_v19  ;;  %v2288_v36 = vmul.f32 0.7978846, %v2286_v33 }
0x1956   :  { %3862 = vtanh.f32 %v2101_v14  ;;  %v2102_v37 = vmul.f32 0.7978846, %v2100_v34  ;;  %v2289_v38 = vmul.f32 0.7978846, %v2287_v35 }
0x1957   :  { %3864 = vtanh.f32 %v2288_v36 }
0x1958   :  { %3866 = vtanh.f32 %v2102_v37 }
0x1959   :  { %3868 = vtanh.f32 %v2289_v38 }
0x1960   :  { %v3863_v39 = vpop.eup %3862 }
0x1961   :  { %v3865_v41 = vpop.eup %3864  ;;  %v2105_v43 = vadd.f32 1.0, %v3863_v39 }
0x1962   :  { %v3867_v58 = vpop.eup %3866  ;;  %v2292_v63 = vadd.f32 1.0, %v3865_v41 }
0x1963   :  { %v3869_v44 = vpop.eup %3868  ;;  %v2107_v46 = vmul.f32 %v2105_v43, %v2091_v42  ;;  %v2106_v49 = vadd.f32 1.0, %v3867_v58 }
0x1964   :  { %v2293_v50 = vadd.f32 1.0, %v3869_v44  ;;  %v2294_v12 = vmul.f32 %v2292_v63, %v2278_v3  ;;  %v3764_v44 = vld [vmem:[%s3087_s15] sm:$0xff]  }
0x1965   :  { %v2111_v51 = vsel %vm268_vm4, %v2107_v46, 0.0  ;;  %v2108_v1 = vmul.f32 %v2106_v49, %v2092_v47  ;;  %3520 = vmatpush3.bf16.msra.mxu1 %v3764_v44 }
0x1966   :  { %2112 = vadd.xlane.f32.xlu1 %v2111_v51  ;;  %v2295_v11 = vmul.f32 %v2293_v50, %v2279_v55  ;;  %v2298_v59 = vsel %vm268_vm4, %v2294_v12, 0.0  ;;  %3521 = vmatprep.subr.bf16.mxu1 %v3918_v4 }
0x1967   :  { %v2114_v56 = vsel %vm268_vm4, %v2108_v1, 0.0 }
0x1968   :  { %2115 = vadd.xlane.f32.xlu0 %v2114_v56  ;;  %v2301_v60 = vsel %vm268_vm4, %v2295_v11, 0.0 }
0x196a   :  { %2299 = vadd.xlane.f32.xlu1 %v2298_v59 }
0x196c   :  { %2302 = vadd.xlane.f32.xlu0 %v2301_v60 }
0x19cd   :  { %v2495_v0 = vpop.f32.mrb[32].mxu0 }
0x19ce   :  { %v2496_v2 = vadd.f32 %v3204_v62, %v2495_v0  ;;  %v3557_v7 = vpop.f32.mrb[33].mxu0 }
0x19cf   :  { %v2498_v8 = vpop.f32.mrb[34].mxu0 }
0x19d0   :  { %v2504_v54 = vmul.f32 0.044715, %v2496_v2  ;;  %v2499_v45 = vadd.f32 %v3204_v62, %v2498_v8  ;;  %v3558_v40 = vpop.f32.mrb[35].mxu0  ;;  %v2502_v17 = vmul.f32 0.5, %v2496_v2 }
0x19d2   :  { %v2505_v48 = vmul.f32 0.044715, %v2499_v45  ;;  %v2506_v9 = vmul.f32 %v2504_v54, %v2496_v2  ;;  %v2503_v21 = vmul.f32 0.5, %v2499_v45 }
0x19d4   :  { %v2508_v52 = vmul.f32 %v2506_v9, %v2496_v2  ;;  %v2507_v10 = vmul.f32 %v2505_v48, %v2499_v45 }
0x19d6   :  { %v2510_v13 = vadd.f32 %v2508_v52, %v2496_v2  ;;  %v2509_v15 = vmul.f32 %v2507_v10, %v2499_v45  ;;  %v4529_v52 = vld [vmem:[%s4520_s11 + $0x8] sm:$0xff] }
0x19d8   :  { %v2512_v61 = vmul.f32 0.7978846, %v2510_v13  ;;  %v2511_v57 = vadd.f32 %v2509_v15, %v2499_v45  ;;  %v3190_v13 = vld [vmem:[%s3085_s24] ss:$0 sm:$0xff] }
0x19da   :  { %3870 = vtanh.f32 %v2512_v61  ;;  %v2513_v16 = vmul.f32 0.7978846, %v2511_v57 }
0x19dc   :  { %3872 = vtanh.f32 %v2513_v16 }
0x19e4   :  { %v3871_v53 = vpop.eup %3870 }
0x19e5   :  { %v2516_v18 = vadd.f32 1.0, %v3871_v53 }
0x19e6   :  { %v3873_v19 = vpop.eup %3872 }
0x19e7   :  { %v2518_v20 = vmul.f32 %v2516_v18, %v2502_v17  ;;  %v2517_v22 = vadd.f32 1.0, %v3873_v19  ;;  %v3191_v17 = vld [vmem:[%s3086_s5] ss:$0 sm:$0xff] }
0x19e9   :  { %v2522_v23 = vsel %vm268_vm4, %v2518_v20, 0.0  ;;  %v2519_v24 = vmul.f32 %v2517_v22, %v2503_v21 }
0x19ea   :  { %2523 = vadd.xlane.f32.xlu1 %v2522_v23 }
0x19eb   :  { %v2525_v25 = vsel %vm268_vm4, %v2519_v24, 0.0 }
0x19ec   :  { %2526 = vadd.xlane.f32.xlu0 %v2525_v25  ;;  %v3766_v25 = vld [vmem:[%s4503_s7] sm:$0xff]  }
0x19f3   :  { %v2113_v26 = vpop.xlane.xlu1 %2112 }
0x19f4   :  { %v2117_v27 = vmul.f32 0.03125, %v2113_v26 }
0x19f5   :  { %v2116_v28 = vpop.xlane.xlu0 %2115 }
0x19f6   :  { %v4477_v29 = vsub.f32 %v2107_v46, %v2117_v27  ;;  %v2118_v30 = vmul.f32 0.03125, %v2116_v28  ;;  %v3765_v46 = vld [vmem:[%s3087_s15 + $0x8] sm:$0xff]  }
0x19f7   :  { %v2300_v31 = vpop.xlane.xlu1 %2299  ;;  %3522 = vmatpush3.bf16.msra.mxu1 %v3765_v46 }
0x19f8   :  { %v4479_v32 = vsub.f32 %v2108_v1, %v2118_v30  ;;  %v2304_v33 = vmul.f32 0.03125, %v2300_v31  ;;  %v2121_v14 = vmul.f32 %v4477_v29, %v4477_v29  ;;  %3535 = vmatprep.subr.bf16.mxu1 %v3918_v4  ;;  %v3200_v30 = vld [vmem:[%s3091_s28] ss:$0 sm:$0xff] }
0x19f9   :  { %v2303_v34 = vpop.xlane.xlu0 %2302 }
0x19fa   :  { %v4483_v35 = vsub.f32 %v2294_v12, %v2304_v33  ;;  %v2305_v36 = vmul.f32 0.03125, %v2303_v34  ;;  %v2123_v37 = vsel %vm268_vm4, %v2121_v14, 0.0  ;;  %v2122_v38 = vmul.f32 %v4479_v32, %v4479_v32  ;;  %v4549_v33 = vld [vmem:[%s4520_s11] sm:$0xff] }
0x19fb   :  { %2124 = vadd.xlane.f32.xlu1 %v2123_v37  ;;  %v3768_v14 = vld [vmem:[%s4432_s22] sm:$0xff]  }
0x19fc   :  { %v4488_v39 = vsub.f32 %v2295_v11, %v2305_v36  ;;  %v2126_v41 = vsel %vm268_vm4, %v2122_v38, 0.0  ;;  %v2308_v42 = vmul.f32 %v4483_v35, %v4483_v35  ;;  %v4565_v36 = vld [vmem:[%s4562_s9] sm:$0xff] }
0x19fd   :  { %2127 = vadd.xlane.f32.xlu0 %v2126_v41 }
0x19fe   :  { %v2310_v43 = vsel %vm268_vm4, %v2308_v42, 0.0  ;;  %v2309_v58 = vmul.f32 %v4488_v39, %v4488_v39 }
0x19ff   :  { %2311 = vadd.xlane.f32.xlu1 %v2310_v43 }
0x1a00   :  { %v2313_v63 = vsel %vm268_vm4, %v2309_v58, 0.0 }
0x1a01   :  { %2314 = vadd.xlane.f32.xlu0 %v2313_v63 }
0x1a77   :  { %v2524_v47 = vpop.xlane.xlu1 %2523 }
0x1a78   :  { %v2528_v49 = vmul.f32 0.03125, %v2524_v47 }
0x1a79   :  { %v2527_v3 = vpop.xlane.xlu0 %2526 }
0x1a7a   :  { %v4507_v50 = vsub.f32 %v2518_v20, %v2528_v49  ;;  %v2529_v51 = vmul.f32 0.03125, %v2527_v3  ;;  %v3213_v3 = vld [vmem:[%s3096_s14] ss:$0 sm:$0xff] }
0x1a7c   :  { %v4509_v1 = vsub.f32 %v2519_v24, %v2529_v51  ;;  %v2532_v12 = vmul.f32 %v4507_v50, %v4507_v50  ;;  %v3199_v24 = vld [vmem:[%s3090_s25] ss:$0 sm:$0xff] }
0x1a7e   :  { %v2534_v55 = vsel %vm268_vm4, %v2532_v12, 0.0  ;;  %v2533_v56 = vmul.f32 %v4509_v1, %v4509_v1 }
0x1a7f   :  { %2535 = vadd.xlane.f32.xlu1 %v2534_v55 }
0x1a80   :  { %v2537_v11 = vsel %vm268_vm4, %v2533_v56, 0.0 }
0x1a81   :  { %2538 = vadd.xlane.f32.xlu0 %v2537_v11 }
0x1a88   :  { %v2125_v59 = vpop.xlane.xlu1 %2124 }
0x1a89   :  { %v2129_v60 = vmul.f32 0.03125, %v2125_v59 }
0x1a8a   :  { %v2128_v62 = vpop.xlane.xlu0 %2127 }
0x1a8b   :  { %v2131_v0 = vadd.f32 1e-05, %v2129_v60  ;;  %v2130_v2 = vmul.f32 0.03125, %v2128_v62 }
0x1a8c   :  { %v2312_v7 = vpop.xlane.xlu1 %2311 }
0x1a8d   :  { %3874 = vrsqrt.f32 %v2131_v0  ;;  %v2132_v8 = vadd.f32 1e-05, %v2130_v2  ;;  %v2316_v54 = vmul.f32 0.03125, %v2312_v7 }
0x1a8e   :  { %v2315_v45 = vpop.xlane.xlu0 %2314 }
0x1a8f   :  { %3876 = vrsqrt.f32 %v2132_v8  ;;  %v2318_v40 = vadd.f32 1e-05, %v2316_v54  ;;  %v2317_v48 = vmul.f32 0.03125, %v2315_v45 }
0x1a90   :  { %2630 = vperm.xlu1 %3725, %v4549_v33  }
0x1a91   :  { %3878 = vrsqrt.f32 %v2318_v40  ;;  %v2319_v9 = vadd.f32 1e-05, %v2317_v48 }
0x1a93   :  { %3880 = vrsqrt.f32 %v2319_v9 }
0x1a94   :  { %2643 = vperm.xlu1 %3725, %v4565_v36  }
0x1a97   :  { %v3875_v10 = vpop.eup %3874  ;;  %2633 = vperm.xlu0 %3654, %v4529_v52  }
0x1a98   :  { %v2135_v15 = vmul.f32 %v3875_v10, %v4477_v29  ;;  %v3767_v29 = vld [vmem:[%s4503_s7 + $0x8] sm:$0xff]  }
0x1a99   :  { %v3877_v61 = vpop.eup %3876  ;;  %v4599_v10 = vld [vmem:[%s4562_s9 + $0x8] sm:$0xff] }
0x1a9a   :  { %v2143_v57 = vmul.f32 %v3190_v13, %v2135_v15  ;;  %v2136_v16 = vmul.f32 %v3877_v61, %v4479_v32 }
0x1a9b   :  { %v3879_v53 = vpop.eup %3878 }
0x1a9c   :  { %v2144_v18 = vmul.f32 %v3190_v13, %v2136_v16  ;;  %v2322_v20 = vmul.f32 %v3879_v53, %v4483_v35  ;;  %v2151_v22 = vadd.f32 %v3191_v17, %v2143_v57  ;;  %v3769_v35 = vld [vmem:[%s4432_s22 + $0x8] sm:$0xff]   ;;  %s3956_s22 = smov 30  }
0x1a9d   :  { %v3881_v19 = vpop.eup %3880  ;;  %s3095_s30 = sld [smem:[%s4830_s0 + %s3956_s22]]   ;;  %v4602_v13 = vld [vmem:[%s3098_s19 + $0x8] sm:$0xff] }
0x1a9e   :  { %v2323_v21 = vmul.f32 %v3881_v19, %v4488_v39  ;;  %v2152_v23 = vadd.f32 %v3191_v17, %v2144_v18  ;;  %v2330_v28 = vmul.f32 %v3199_v24, %v2322_v20  ;;  %v4616_v20 = vld [vmem:[%s3098_s19] sm:$0xff] }
0x1aa0   :  { %v2331_v26 = vmul.f32 %v3199_v24, %v2323_v21  ;;  %v2157_v27 = vpack.c.bf16 %v2152_v23, %v2151_v22  ;;  %v2338_v32 = vadd.f32 %v3200_v30, %v2330_v28  ;;  %v4619_v21 = vld [vmem:[%s3099_s2] sm:$0xff]  ;;  %v4622_v22 = vld [vmem:[%s3099_s2 + $0x8] sm:$0xff]  ;;  %v2712_v23 = vsel %vm2711_vm14, %v4565_v36, 0.0  ;;  %s3104_s2 = sld [smem:[%s4830_s0 + %s3962_s23]]  }
0x1aa1   :  { %v2713_v24 = vsel %vm2711_vm14, %v4599_v10, 0.0 }
0x1aa2   :  { %3524 = vmatmul.mubr.msk.bf16.vlgmr.msra.gmra.mrb[52].mxu1 %vm268_vm4, %v2157_v27  ;;  %v2339_v31 = vadd.f32 %v3200_v30, %v2331_v26 }
0x1aa3   :  { %3536 = vmatpush3.bf16.msra.mxu1 %v3766_v25  ;;  %3539 = vmatprep.mubr.msk.bf16.mxu1 %vm3920_vm5, %v3918_v4  ;;  %v3212_v63 = vld [vmem:[%s3095_s30] ss:$0 sm:$0xff]  ;;  %v2714_v25 = vadd.f32 %v2713_v24, %v2712_v23 }
0x1aa4   :  { %3537 = vmatprep.subr.bf16.mxu1 %v3918_v4  ;;  %v2344_v34 = vpack.c.bf16 %v2339_v31, %v2338_v32 }
0x1aa7   :  { %3538 = vmatpush3.bf16.msra.mxu1 %v3767_v29 }
0x1aa8   :  { %3559 = vmatprep.subr.bf16.mxu1 %v3918_v4 }
0x1aaa   :  { %3540 = vmatmul.mubr.msk.bf16.vlgmr.msra.gmra.mrb[56].mxu1 %vm268_vm4, %v2344_v34 }
0x1aab   :  { %3560 = vmatpush3.bf16.msra.mxu1 %v3768_v14  ;;  %3563 = vmatprep.mubr.msk.bf16.mxu1 %vm3920_vm5, %v3918_v4  ;;  %v4641_v14 = vcvt.s32.f32 %v3976_v6 }
0x1aac   :  { %3561 = vmatprep.subr.bf16.mxu1 %v3918_v4 }
0x1aaf   :  { %3562 = vmatpush3.bf16.msra.mxu1 %v3769_v35 }
0x1b0c   :  { %v2536_v37 = vpop.xlane.xlu1 %2535 }
0x1b0d   :  { %v2540_v38 = vmul.f32 0.03125, %v2536_v37 }
0x1b0e   :  { %v2539_v39 = vpop.xlane.xlu0 %2538 }
0x1b0f   :  { %v2542_v41 = vadd.f32 1e-05, %v2540_v38  ;;  %v2541_v42 = vmul.f32 0.03125, %v2539_v39 }
0x1b10   :  { %v2631_v15 = vpop.permute.xlu1 %2630 }
0x1b11   :  { %3882 = vrsqrt.f32 %v2542_v41  ;;  %v2543_v43 = vadd.f32 1e-05, %v2541_v42  ;;  %vm2635_vm12 = vcmp.eq.s32.totalorder %v3976_v6, %v2631_v15 }
0x1b12   :  { %v3217_v61 = vsel %vm2635_vm12, 1.0, %v3918_v4 }
0x1b13   :  { %3884 = vrsqrt.f32 %v2543_v43 }
0x1b14   :  { %v2644_v57 = vpop.permute.xlu1 %2643 }
0x1b15   :  { %v2651_v16 = vmul.f32 %v3217_v61, %v2644_v57 }
0x1b16   :  { %v2634_v27 = vpop.permute.xlu0 %2633 }
0x1b17   :  { %vm2636_vm15 = vcmp.eq.s32.totalorder %v3976_v6, %v2634_v27 }
0x1b18   :  { %v3218_v35 = vsel %vm2636_vm15, 1.0, %v3918_v4 }
0x1b1b   :  { %v3883_v58 = vpop.eup %3882 }
0x1b1c   :  { %v2546_v44 = vmul.f32 %v3883_v58, %v4507_v50 }
0x1b1d   :  { %v3885_v46 = vpop.eup %3884 }
0x1b1e   :  { %v2554_v47 = vmul.f32 %v3212_v63, %v2546_v44  ;;  %v2547_v49 = vmul.f32 %v3885_v46, %v4509_v1  ;;  %v4658_v46 = vld [vmem:[%s3100_s17] sm:$0xff] }
0x1b20   :  { %v2555_v51 = vmul.f32 %v3212_v63, %v2547_v49  ;;  %v2562_v12 = vadd.f32 %v3213_v3, %v2554_v47 }
0x1b22   :  { %v2563_v55 = vadd.f32 %v3213_v3, %v2555_v51 }
0x1b24   :  { %v2568_v56 = vpack.c.bf16 %v2563_v55, %v2562_v12 }
0x1b26   :  { %3564 = vmatmul.mubr.msk.bf16.vlgmr.msra.gmra.mrb[60].mxu1 %vm268_vm4, %v2568_v56 }
0x1b75   :  { %v4577_v11 = vpop.f32.mrb[52].mxu1 }
0x1b76   :  { %v3525_v59 = vpop.f32.mrb[53].mxu1  ;;  %v2784_v60 = vsel %vm180_vm1, %v4577_v11, -inf }
0x1b77   :  { %2785 = vmax.xlane.f32.xlu0 %v2784_v60  ;;  %v4581_v62 = vpop.f32.mrb[54].mxu1 }
0x1b78   :  { %v3526_v50 = vpop.f32.mrb[55].mxu1  ;;  %v2787_v53 = vsel %vm180_vm1, %v4581_v62, -inf }
0x1b7d   :  { %v4583_v0 = vpop.f32.mrb[56].mxu1 }
0x1b7e   :  { %v3541_v1 = vpop.f32.mrb[57].mxu1  ;;  %v2913_v17 = vsel %vm2912_vm13, %v4583_v0, -inf }
0x1b7f   :  { %v4585_v2 = vpop.f32.mrb[58].mxu1 }
0x1b80   :  { %v3542_v7 = vpop.f32.mrb[59].mxu1  ;;  %v2916_v26 = vsel %vm2912_vm13, %v4585_v2, -inf }
0x1bf9   :  { %v4587_v8 = vpop.f32.mrb[60].mxu1 }
0x1bfa   :  { %v3565_v54 = vpop.f32.mrb[61].mxu1  ;;  %v2654_v45 = vsel %vm2653_vm11, %v4587_v8, -inf  ;;  %v2678_v18 = vmul.f32 %v2651_v16, %v4587_v8 }
0x1bfb   :  { %2655 = vmax.xlane.f32.xlu1 %v2654_v45  ;;  %v4591_v40 = vpop.f32.mrb[62].mxu1  ;;  %v4675_v54 = vld [vmem:[%s3100_s17 + $0x8] sm:$0xff]  ;;  %v4678_v45 = vld [vmem:[%s3101_s10] sm:$0xff] }
0x1bfc   :  { %v3566_v48 = vpop.f32.mrb[63].mxu1  ;;  %v2657_v9 = vsel %vm2653_vm11, %v4591_v40, -inf  ;;  %v2680_v19 = vsel %vm2653_vm11, %v2678_v18, 0.0 }
0x1bfd   :  { %2658 = vmax.xlane.f32.xlu0 %v2657_v9 }
0x1c04   :  { %v4631_v28 = vpop.xlane.xlu0 %2785 }
0x1c05   :  { %v2790_v29 = vsub.f32 %v4577_v11, %v4631_v28  ;;  %vm2820_vm5 = vcmp.ge.f32.partialorder %v4577_v11, %v4631_v28 }
0x1c07   :  { %v2792_v30 = vmul.f32 1.442695, %v2790_v29 }
0x1c09   :  { %3886 = vpow2.f32 %v2792_v30 }
0x1c0c   :  { %2648 = vperm.xlu1 %3725, %v4599_v10  }
0x1c13   :  { %2764 = vperm.xlu0 %3654, %v4602_v13   ;;  %v3887_v43 = vpop.eup %3886 }
0x1c14   :  { %v2796_v58 = vsel %vm180_vm1, %v3887_v43, 0.0 }
0x1c30   :  { %2788 = vmax.xlane.f32.xlu1 %v2787_v53 }
0x1c32   :  { %2914 = vmax.xlane.f32.xlu0 %v2913_v17 }
0x1c36   :  { %2681 = vadd.xlane.f32.xlu0 %v2680_v19 }
0x1c41   :  { %2761 = vperm.xlu1 %3725, %v4616_v20  }
0x1c45   :  { %2774 = vperm.xlu1 %3725, %v4619_v21  }
0x1c49   :  { %2779 = vperm.xlu1 %3725, %v4622_v22  }
0x1c6d   :  { %2715 = vadd.xlane.f32.xlu1 %v2714_v25 }
0x1c71   :  { %2917 = vmax.xlane.f32.xlu1 %v2916_v26  ;;  %v2822_v26 = vsel %vm2820_vm5, %v4641_v14, 6.0  ;;  %vm3013_vm5 = vcmp.eq.s32.totalorder %v3976_v6, 0 }
0x1c88   :  { %v4635_v31 = vpop.xlane.xlu1 %2655 }
0x1c89   :  { %vm2691_vm2 = vcmp.ge.f32.partialorder %v4587_v8, %v4635_v31  ;;  %v2660_v47 = vsub.f32 %v4587_v8, %v4635_v31 }
0x1c8a   :  { %v4638_v32 = vpop.xlane.xlu0 %2658  ;;  %v2693_v63 = vsel %vm2691_vm2, %v4641_v14, 4.0 }
0x1c8b   :  { %vm2692_vm0 = vcmp.ge.f32.partialorder %v4591_v40, %v4638_v32  ;;  %v2695_v44 = vsel %vm2653_vm11, %v2693_v63, inf  ;;  %v2662_v49 = vmul.f32 1.442695, %v2660_v47  ;;  %v2661_v3 = vsub.f32 %v4591_v40, %v4638_v32 }
0x1c8c   :  { %v2649_v34 = vpop.permute.xlu1 %2648  ;;  %v2694_v37 = vsel %vm2692_vm0, %v4641_v14, 4.0  ;;  %v2702_v63 = vcvt.s32.f32 %v4529_v52 }
0x1c8d   :  { %v2652_v38 = vmul.f32 %v3218_v35, %v2649_v34  ;;  %v2698_v39 = vsel %vm2653_vm11, %v2694_v37, inf  ;;  %3888 = vpow2.f32 %v2662_v49  ;;  %v2664_v56 = vmul.f32 1.442695, %v2661_v3 }
0x1c8e   :  { %2699 = vmin.xlane.f32.xlu1 %v2698_v39  ;;  %v2824_v35 = vsel %vm180_vm1, %v2822_v26, inf }
0x1c8f   :  { %v2679_v41 = vmul.f32 %v2652_v38, %v4591_v40  ;;  %v4681_v40 = vld [vmem:[%s3101_s10 + $0x8] sm:$0xff] }
0x1c91   :  { %v2683_v42 = vsel %vm2653_vm11, %v2679_v41, 0.0 }
0x1c92   :  { %2684 = vadd.xlane.f32.xlu0 %v2683_v42  ;;  %v2765_v57 = vpop.permute.xlu0 %2764 }
0x1c93   :  { %vm2767_vm3 = vcmp.eq.s32.totalorder %v3976_v6, %v2765_v57 }
0x1c94   :  { %v3222_v18 = vsel %vm2767_vm3, 1.0, %v3918_v4 }
0x1c96   :  { %2797 = vadd.xlane.f32.xlu0 %v2796_v58  ;;  %v3038_v58 = vshrl.u32 %v165_v5, 7 }
0x1c97   :  { %v3889_v59 = vpop.eup %3888 }
0x1c98   :  { %v2666_v1 = vsel %vm2653_vm11, %v3889_v59, 0.0  ;;  %vm3040_vm9 = vcmp.eq.s32.totalorder %v3038_v58, %v3976_v6 }
0x1c9a   :  { %2696 = vmin.xlane.f32.xlu0 %v2695_v44  ;;  %v3039_v44 = vadd.s32 8, %v3038_v58 }
0x1cb0   :  { %2889 = vperm.xlu0 %3654, %v4658_v46  }
0x1cbd   :  { %v4665_v51 = vpop.xlane.xlu1 %2788 }
0x1cbe   :  { %v2791_v12 = vsub.f32 %v4581_v62, %v4665_v51  ;;  %vm2821_vm6 = vcmp.ge.f32.partialorder %v4581_v62, %v4665_v51 }
0x1cbf   :  { %v2823_v29 = vsel %vm2821_vm6, %v4641_v14, 6.0  ;;  %v4700_v42 = vpop.xlane.xlu0 %2914  ;;  %vm3021_vm6 = vcmp.eq.s32.totalorder %v3976_v6, 2 }
0x1cc0   :  { %v2794_v55 = vmul.f32 1.442695, %v2791_v12  ;;  %v2827_v38 = vsel %vm180_vm1, %v2823_v29, inf  ;;  %vm2949_vm12 = vcmp.ge.f32.partialorder %v4583_v0, %v4700_v42 }
0x1cc1   :  { %v2762_v48 = vpop.permute.xlu1 %2761 }
0x1cc2   :  { %3890 = vpow2.f32 %v2794_v55  ;;  %vm2766_vm4 = vcmp.eq.s32.totalorder %v3976_v6, %v2762_v48  ;;  %v2701_v55 = vcvt.s32.f32 %v4549_v33 }
0x1cc3   :  { %3892 = vpow2.f32 %v2664_v56  ;;  %v3221_v23 = vsel %vm2766_vm4, 1.0, %v3918_v4  ;;  %v4702_v43 = vpop.xlane.xlu0 %2681 }
0x1cc5   :  { %v2775_v9 = vpop.permute.xlu1 %2774 }
0x1cc6   :  { %v2782_v25 = vmul.f32 %v3221_v23, %v2775_v9 }
0x1cc8   :  { %v2808_v37 = vmul.f32 %v2782_v25, %v4577_v11  ;;  %v2919_v11 = vsub.f32 %v4583_v0, %v4700_v42 }
0x1cc9   :  { %v2780_v15 = vpop.permute.xlu1 %2779 }
0x1cca   :  { %v2783_v24 = vmul.f32 %v3222_v18, %v2780_v15  ;;  %v2810_v41 = vsel %vm180_vm1, %v2808_v37, 0.0  ;;  %v2921_v3 = vmul.f32 1.442695, %v2919_v11 }
0x1ccc   :  { %v3891_v60 = vpop.eup %3890  ;;  %v2809_v34 = vmul.f32 %v2783_v24, %v4581_v62  ;;  %3894 = vpow2.f32 %v2921_v3 }
0x1ccd   :  { %v2799_v50 = vsel %vm180_vm1, %v3891_v60, 0.0  ;;  %v3893_v7 = vpop.eup %3892 }
0x1cce   :  { %2800 = vadd.xlane.f32.xlu1 %v2799_v50  ;;  %v2669_v8 = vsel %vm2653_vm11, %v3893_v7, 0.0  ;;  %v2813_v39 = vsel %vm180_vm1, %v2809_v34, 0.0  ;;  %vm3041_vm1 = vcmp.eq.s32.totalorder %v3039_v44, %v3976_v6 }
0x1ccf   :  { %2667 = vadd.xlane.f32.xlu0 %v2666_v1 }
0x1cd3   :  { %2670 = vadd.xlane.f32.xlu0 %v2669_v8 }
0x1cdf   :  { %2892 = vperm.xlu1 %3725, %v4675_v54  }
0x1ce3   :  { %2902 = vperm.xlu1 %3725, %v4678_v45  }
0x1ce9   :  { %2907 = vperm.xlu0 %3654, %v4681_v40  }
0x1cfa   :  { %v2716_v61 = vpop.xlane.xlu1 %2715 }
0x1cfb   :  { %v2717_v16 = vrot.slane %v2716_v61, 4 }
0x1cfd   :  { %v2718_v53 = vadd.f32 %v2717_v16, %v2716_v61  ;;  %v3895_v61 = vpop.eup %3894 }
0x1cfe   :  { %v4704_v62 = vpop.xlane.xlu1 %2917  ;;  %v2925_v57 = vsel %vm2912_vm13, %v3895_v61, 0.0  ;;  %v2831_v61 = vcvt.s32.f32 %v4602_v13 }
0x1cff   :  { %v2719_v17 = vrot.slane %v2718_v53, 2  ;;  %v2920_v34 = vsub.f32 %v4585_v2, %v4704_v62  ;;  %vm2950_vm0 = vcmp.ge.f32.partialorder %v4585_v2, %v4704_v62 }
0x1d01   :  { %v2720_v19 = vadd.f32 %v2719_v17, %v2718_v53  ;;  %v2923_v11 = vmul.f32 1.442695, %v2920_v34 }
0x1d03   :  { %v2721_v27 = vrot.slane %v2720_v19, 1 }
0x1d05   :  { %v2722_v30 = vadd.f32 %v2721_v27, %v2720_v19 }
0x1d07   :  { %2825 = vmin.xlane.f32.xlu1 %v2824_v35  ;;  %3583 = vpush %v2722_v30  ;;  %v2951_v35 = vsel %vm2949_vm12, %v4641_v14, 3.0 }
0x1d08   :  { %2828 = vmin.xlane.f32.xlu0 %v2827_v38  ;;  %v2953_v58 = vsel %vm2912_vm13, %v2951_v35, inf }
0x1d0b   :  { %2814 = vadd.xlane.f32.xlu1 %v2813_v39 }
0x1d0c   :  { %2811 = vadd.xlane.f32.xlu0 %v2810_v41 }
0x1d1b   :  { %v2700_v47 = vpop.xlane.xlu1 %2699 }
0x1d1c   :  { %vm2704_vm7 = vcmp.eq.f32.partialorder %v2700_v47, %v2702_v63  ;;  %v3043_v5 = vsel %vm3041_vm1, %v2700_v47, 0.0  ;;  %vm3029_vm1 = vcmp.eq.s32.totalorder %v3976_v6, 4 }
0x1d1d   :  { %v3220_v56 = vsel %vm2704_vm7, 1.0, %v3918_v4  ;;  %v3045_v50 = vsel %vm732_vm8, %v3043_v5, 0.0  ;;  %vm3025_vm7 = vcmp.eq.s32.totalorder %v3976_v6, 3 }
0x1d1e   :  { %v2710_v52 = vmul.f32 %v3220_v56, %v4599_v10 }
0x1d1f   :  { %v2685_v49 = vpop.xlane.xlu0 %2684 }
0x1d20   :  { %v2741_v9 = vsel %vm2711_vm14, %v2710_v52, 0.0 }
0x1d23   :  { %v4711_v12 = vpop.xlane.xlu0 %2797 }
0x1d27   :  { %v2697_v59 = vpop.xlane.xlu0 %2696 }
0x1d28   :  { %vm2703_vm10 = vcmp.eq.f32.partialorder %v2697_v59, %v2701_v55  ;;  %v3042_v60 = vsel %vm3040_vm9, %v2697_v59, 0.0  ;;  %v2841_v55 = vsel %vm2711_vm14, %v4622_v22, 0.0  ;;  %vm3033_vm9 = vcmp.eq.s32.totalorder %v3976_v6, 5 }
0x1d29   :  { %v3219_v1 = vsel %vm2703_vm10, 1.0, %v3918_v4  ;;  %v3044_v7 = vsel %vm732_vm8, %v3042_v60, 0.0  ;;  %vm3057_vm10 = vcmask 1040384  }
0x1d2a   :  { %v2709_v8 = vmul.f32 %v3219_v1, %v4565_v36  ;;  %v4721_v33 = vadd.f32 %v3045_v50, %v3044_v7  ;;  %v2952_v50 = vsel %vm2950_vm0, %v4641_v14, 3.0 }
0x1d2b   :  { %v2956_v1 = vsel %vm2912_vm13, %v2952_v50, inf }
0x1d2c   :  { %v2740_v48 = vsel %vm2711_vm14, %v2709_v8, 0.0 }
0x1d2d   :  { %v2742_v15 = vadd.f32 %v2741_v9, %v2740_v48 }
0x1d2f   :  { %2743 = vadd.xlane.f32.xlu1 %v2742_v15  ;;  %v2890_v16 = vpop.permute.xlu0 %2889  ;;  %v2830_v15 = vcvt.s32.f32 %v4616_v20 }
0x1d30   :  { %vm2894_vm11 = vcmp.eq.s32.totalorder %v3976_v6, %v2890_v16 }
0x1d31   :  { %v3225_v24 = vsel %vm2894_vm11, 1.0, %v3918_v4  ;;  %vm3059_vm11 = vcmask 1041408  }
0x1d33   :  { %2926 = vadd.xlane.f32.xlu1 %v2925_v57 }
0x1d38   :  { %s3584_s27 = spop %3583 }
0x1d5b   :  { %v2801_v53 = vpop.xlane.xlu1 %2800 }
0x1d5c   :  { %v2668_v17 = vpop.xlane.xlu0 %2667 }
0x1d5d   :  { %3896 = vlog2.f32 %v2668_v17 }
0x1d5f   :  { %v2893_v18 = vpop.permute.xlu1 %2892 }
0x1d60   :  { %v2671_v19 = vpop.xlane.xlu0 %2670  ;;  %vm2895_vm15 = vcmp.eq.s32.totalorder %v3976_v6, %v2893_v18 }
0x1d61   :  { %3898 = vlog2.f32 %v2671_v19 }
0x1d62   :  { %3900 = vpow2.f32 %v2923_v11 }
0x1d63   :  { %v2903_v23 = vpop.permute.xlu1 %2902  ;;  %3902 = vlog2.f32 %v2801_v53 }
0x1d64   :  { %v2910_v25 = vmul.f32 %v3225_v24, %v2903_v23  ;;  %3904 = vlog2.f32 %v4711_v12 }
0x1d66   :  { %v2937_v26 = vmul.f32 %v2910_v25, %v4583_v0 }
0x1d67   :  { %v3897_v27 = vpop.eup %3896 }
0x1d68   :  { %v2673_v29 = vmul.f32 0.6931472, %v3897_v27  ;;  %v2939_v30 = vsel %vm2912_vm13, %v2937_v26, 0.0 }
0x1d69   :  { %2940 = vadd.xlane.f32.xlu1 %v2939_v30  ;;  %v2969_v30 = vsel %vm2711_vm14, %v4678_v45, 0.0 }
0x1d6a   :  { %v2676_v37 = vadd.f32 %v2673_v29, %v4635_v31 }
0x1d6b   :  { %v3899_v38 = vpop.eup %3898 }
0x1d6c   :  { %v2686_v39 = vmul.f32 %v2676_v37, %v4565_v36  ;;  %v2675_v41 = vmul.f32 0.6931472, %v3899_v38  ;;  %v2840_v36 = vsel %vm2711_vm14, %v4619_v21, 0.0 }
0x1d6d   :  { %2954 = vmin.xlane.f32.xlu1 %v2953_v58 }
0x1d6e   :  { %v2677_v0 = vadd.f32 %v2675_v41, %v4638_v32  ;;  %v2688_v44 = vsub.f32 %v2686_v39, %v4702_v43  ;;  %v2908_v32 = vpop.permute.xlu0 %2907  ;;  %v3226_v43 = vsel %vm2895_vm15, 1.0, %v3918_v4  ;;  %v2736_v41 = vstv %s3584_s27 }
0x1d6f   :  { %v2911_v5 = vmul.f32 %v3226_v43, %v2908_v32 }
0x1d70   :  { %v2687_v63 = vmul.f32 %v2677_v0, %v4599_v10  ;;  %v2724_v3 = vsel %vm2711_vm14, %v2688_v44, 0.0  ;;  %v2842_v10 = vadd.f32 %v2841_v55, %v2840_v36  ;;  %v2959_v55 = vcvt.s32.f32 %v4658_v46 }
0x1d71   :  { %v2938_v59 = vmul.f32 %v2911_v5, %v4585_v2 }
0x1d72   :  { %v2689_v47 = vsub.f32 %v2687_v63, %v2685_v49  ;;  %v3901_v49 = vpop.eup %3900 }
0x1d73   :  { %v2928_v52 = vsel %vm2912_vm13, %v3901_v49, 0.0  ;;  %v2942_v60 = vsel %vm2912_vm13, %v2938_v59, 0.0  ;;  %v3903_v7 = vpop.eup %3902 }
0x1d74   :  { %v2725_v31 = vsel %vm2711_vm14, %v2689_v47, 0.0  ;;  %v3905_v8 = vpop.eup %3904  ;;  %v2805_v48 = vmul.f32 0.6931472, %v3903_v7 }
0x1d75   :  { %v2726_v56 = vadd.f32 %v2725_v31, %v2724_v3  ;;  %v2803_v9 = vmul.f32 0.6931472, %v3905_v8 }
0x1d76   :  { %v2807_v2 = vadd.f32 %v2805_v48, %v4665_v51  ;;  %v2960_v48 = vcvt.s32.f32 %v4675_v54 }
0x1d77   :  { %2727 = vadd.xlane.f32.xlu0 %v2726_v56  ;;  %v2806_v16 = vadd.f32 %v2803_v9, %v4631_v28 }
0x1d78   :  { %v2817_v18 = vmul.f32 %v2807_v2, %v4622_v22 }
0x1d79   :  { %v2816_v13 = vmul.f32 %v2806_v16, %v4619_v21 }
0x1d7b   :  { %2843 = vadd.xlane.f32.xlu0 %v2842_v10 }
0x1d7f   :  { %2929 = vadd.xlane.f32.xlu0 %v2928_v52 }
0x1d83   :  { %2943 = vadd.xlane.f32.xlu0 %v2942_v60 }
0x1d87   :  { %2957 = vmin.xlane.f32.xlu0 %v2956_v1 }
0x1d94   :  { %v2826_v57 = vpop.xlane.xlu1 %2825 }
0x1d95   :  { %vm2832_vm2 = vcmp.eq.f32.partialorder %v2826_v57, %v2830_v15  ;;  %v2829_v12 = vpop.xlane.xlu0 %2828 }
0x1d96   :  { %v3223_v14 = vsel %vm2832_vm2, 1.0, %v3918_v4  ;;  %vm2833_vm3 = vcmp.eq.f32.partialorder %v2829_v12, %v2831_v61 }
0x1d97   :  { %v2838_v53 = vmul.f32 %v3223_v14, %v4619_v21  ;;  %v3224_v17 = vsel %vm2833_vm3, 1.0, %v3918_v4 }
0x1d98   :  { %v2839_v20 = vmul.f32 %v3224_v17, %v4622_v22  ;;  %v2815_v19 = vpop.xlane.xlu1 %2814  ;;  %v2970_v22 = vsel %vm2711_vm14, %v4681_v40, 0.0 }
0x1d99   :  { %v2868_v51 = vsel %vm2711_vm14, %v2838_v53, 0.0  ;;  %v2819_v23 = vsub.f32 %v2817_v18, %v2815_v19  ;;  %v2812_v28 = vpop.xlane.xlu0 %2811  ;;  %v2971_v21 = vadd.f32 %v2970_v22, %v2969_v30 }
0x1d9a   :  { %v2869_v24 = vsel %vm2711_vm14, %v2839_v20, 0.0  ;;  %v2818_v25 = vsub.f32 %v2816_v13, %v2812_v28 }
0x1d9b   :  { %v2853_v26 = vsel %vm2711_vm14, %v2819_v23, 0.0  ;;  %v2870_v27 = vadd.f32 %v2869_v24, %v2868_v51 }
0x1d9c   :  { %v2852_v29 = vsel %vm2711_vm14, %v2818_v25, 0.0 }
0x1d9d   :  { %v2854_v34 = vadd.f32 %v2853_v26, %v2852_v29  ;;  %2871 = vadd.xlane.f32.xlu0 %v2870_v27 }
0x1d9f   :  { %2855 = vadd.xlane.f32.xlu1 %v2854_v34 }
0x1da3   :  { %2972 = vadd.xlane.f32.xlu1 %v2971_v21 }
0x1dbc   :  { %v2744_v35 = vpop.xlane.xlu1 %2743 }
0x1dbd   :  { %v2745_v37 = vrot.slane %v2744_v35, 4 }
0x1dbf   :  { %v2746_v38 = vadd.f32 %v2745_v37, %v2744_v35 }
0x1dc0   :  { %v2927_v39 = vpop.xlane.xlu1 %2926 }
0x1dc1   :  { %v2747_v11 = vrot.slane %v2746_v38, 2  ;;  %3906 = vlog2.f32 %v2927_v39 }
0x1dc2   :  { %3908 = vrcp.f32 %v2736_v41 }
0x1dc3   :  { %v2748_v36 = vadd.f32 %v2747_v11, %v2746_v38 }
0x1dc5   :  { %v2749_v59 = vrot.slane %v2748_v36, 1 }
0x1dc7   :  { %v2750_v8 = vadd.f32 %v2749_v59, %v2748_v36 }
0x1dcb   :  { %v3907_v52 = vpop.eup %3906 }
0x1dcc   :  { %v3909_v7 = vpop.eup %3908  ;;  %v2932_v46 = vmul.f32 0.6931472, %v3907_v52 }
0x1dce   :  { %v2935_v16 = vadd.f32 %v2932_v46, %v4700_v42 }
0x1dd0   :  { %v2945_v20 = vmul.f32 %v2935_v16, %v4678_v45 }
0x1df6   :  { %v2941_v63 = vpop.xlane.xlu1 %2940 }
0x1df7   :  { %v2947_v51 = vsub.f32 %v2945_v20, %v2941_v63 }
0x1dfa   :  { %v2955_v10 = vpop.xlane.xlu1 %2954 }
0x1dfb   :  { %vm2961_vm13 = vcmp.eq.f32.partialorder %v2955_v10, %v2959_v55 }
0x1dfc   :  { %v3227_v15 = vsel %vm2961_vm13, 1.0, %v3918_v4 }
0x1dfd   :  { %v2967_v57 = vmul.f32 %v3227_v15, %v4678_v45 }
0x1dff   :  { %v2997_v17 = vsel %vm2711_vm14, %v2967_v57, 0.0 }
0x1e04   :  { %v2728_v58 = vpop.xlane.xlu0 %2727 }
0x1e05   :  { %v2729_v0 = vrot.slane %v2728_v58, 4 }
0x1e07   :  { %v2730_v44 = vadd.f32 %v2729_v0, %v2728_v58 }
0x1e08   :  { %v2844_v47 = vpop.xlane.xlu0 %2843 }
0x1e09   :  { %v2731_v3 = vrot.slane %v2730_v44, 2  ;;  %v2845_v31 = vrot.slane %v2844_v47, 4 }
0x1e0b   :  { %v2846_v56 = vadd.f32 %v2845_v31, %v2844_v47  ;;  %v2732_v32 = vadd.f32 %v2731_v3, %v2730_v44 }
0x1e0c   :  { %v2930_v43 = vpop.xlane.xlu0 %2929 }
0x1e0d   :  { %v2847_v5 = vrot.slane %v2846_v56, 2  ;;  %3910 = vlog2.f32 %v2930_v43  ;;  %v2733_v49 = vrot.slane %v2732_v32, 1 }
0x1e0f   :  { %v2734_v60 = vadd.f32 %v2733_v49, %v2732_v32  ;;  %v2848_v50 = vadd.f32 %v2847_v5, %v2846_v56 }
0x1e10   :  { %v2944_v1 = vpop.xlane.xlu0 %2943 }
0x1e11   :  { %3585 = vpush %v2734_v60  ;;  %v2849_v9 = vrot.slane %v2848_v50, 1 }
0x1e12   :  { %3587 = vpush %v3909_v7 }
0x1e13   :  { %3589 = vpush %v2750_v8  ;;  %v2850_v61 = vadd.f32 %v2849_v9, %v2848_v50 }
0x1e14   :  { %v2958_v2 = vpop.xlane.xlu0 %2957 }
0x1e15   :  { %vm2962_vm4 = vcmp.eq.f32.partialorder %v2958_v2, %v2960_v48  ;;  %3591 = vpush %v2850_v61  ;;  %v3047_v48 = vrot.slane %v4721_v33, 4 }
0x1e16   :  { %v3228_v12 = vsel %vm2962_vm4, 1.0, %v3918_v4  ;;  %v2981_v4 = vsel %vm2711_vm14, %v2947_v51, 0.0 }
0x1e17   :  { %v3911_v14 = vpop.eup %3910  ;;  %v2968_v53 = vmul.f32 %v3228_v12, %v4681_v40  ;;  %v3048_v9 = vadd.f32 %v3047_v48, %v4721_v33 }
0x1e18   :  { %v2934_v54 = vmul.f32 0.6931472, %v3911_v14 }
0x1e19   :  { %v2998_v18 = vsel %vm2711_vm14, %v2968_v53, 0.0  ;;  %v3049_v46 = vrot.slane %v3048_v9, 2 }
0x1e1a   :  { %v2936_v19 = vadd.f32 %v2934_v54, %v4704_v62  ;;  %v2999_v13 = vadd.f32 %v2998_v18, %v2997_v17 }
0x1e1b   :  { %v3050_v15 = vadd.f32 %v3049_v46, %v3048_v9 }
0x1e1c   :  { %v2946_v23 = vmul.f32 %v2936_v19, %v4681_v40  ;;  %3000 = vadd.xlane.f32.xlu1 %v2999_v13 }
0x1e1d   :  { %v3051_v57 = vrot.slane %v3050_v15, 1 }
0x1e1e   :  { %v2948_v42 = vsub.f32 %v2946_v23, %v2944_v1 }
0x1e1f   :  { %v3052_v54 = vadd.f32 %v3051_v57, %v3050_v15 }
0x1e20   :  { %v2982_v28 = vsel %vm2711_vm14, %v2948_v42, 0.0  ;;  %vm3017_vm14 = vcmp.eq.s32.totalorder %v3976_v6, 1 }
0x1e21   :  { %v2983_v24 = vadd.f32 %v2982_v28, %v2981_v4  ;;  %v3053_v23 = vsel %vm732_vm8, %v3052_v54, 0.0 }
0x1e23   :  { %2984 = vadd.xlane.f32.xlu0 %v2983_v24 }
0x1e2a   :  { %v2872_v34 = vpop.xlane.xlu0 %2871 }
0x1e2b   :  { %v2873_v40 = vrot.slane %v2872_v34, 4 }
0x1e2c   :  { %v2856_v25 = vpop.xlane.xlu1 %2855 }
0x1e2d   :  { %v2857_v26 = vrot.slane %v2856_v25, 4  ;;  %v2874_v37 = vadd.f32 %v2873_v40, %v2872_v34 }
0x1e2f   :  { %v2858_v27 = vadd.f32 %v2857_v26, %v2856_v25  ;;  %v2875_v39 = vrot.slane %v2874_v37, 2  ;;  %v3055_v25 = vrot.slane %v3053_v23, 7 }
0x1e30   :  { %v2973_v62 = vpop.xlane.xlu1 %2972 }
0x1e31   :  { %v2859_v29 = vrot.slane %v2858_v27, 2  ;;  %v2974_v21 = vrot.slane %v2973_v62, 4  ;;  %v2876_v11 = vadd.f32 %v2875_v39, %v2874_v37 }
0x1e33   :  { %v2860_v30 = vadd.f32 %v2859_v29, %v2858_v27  ;;  %v2975_v35 = vadd.f32 %v2974_v21, %v2973_v62  ;;  %v2877_v63 = vrot.slane %v2876_v11, 1 }
0x1e35   :  { %v2861_v45 = vrot.slane %v2860_v30, 1  ;;  %v2976_v38 = vrot.slane %v2975_v35, 2  ;;  %v2878_v3 = vadd.f32 %v2877_v63, %v2876_v11 }
0x1e37   :  { %v2862_v22 = vadd.f32 %v2861_v45, %v2860_v30  ;;  %v2977_v58 = vadd.f32 %v2976_v38, %v2975_v35 }
0x1e39   :  { %3593 = vpush %v2862_v22  ;;  %v2978_v0 = vrot.slane %v2977_v58, 1 }
0x1e3b   :  { %v2979_v44 = vadd.f32 %v2978_v0, %v2977_v58 }
0x1e42   :  { %s4789_s28 = spop %3585 }
0x1e43   :  { %s4791_s29 = spop %3587 }
0x1e44   :  { %s2739_s3 = smul.f32 %s4791_s29, %s4789_s28  ;;  %s4795_s8 = spop %3589 }
0x1e45   :  { %s2755_s9 = smul.f32 %s4795_s8, %s4791_s29 }
0x1e46   :  { %s3592_s22 = spop %3591  ;;  %v3014_v2 = vstv %s2739_s3 }
0x1e47   :  { %v2864_v41 = vstv %s3592_s22  ;;  %v3015_v33 = vsel %vm3013_vm5, %v3014_v2, 0.0  ;;  %v3026_v12 = vstv %s2755_s9 }
0x1e48   :  { %3912 = vrcp.f32 %v2864_v41  ;;  %v3027_v19 = vsel %vm3025_vm7, %v3026_v12, 0.0 }
0x1e52   :  { %v3913_v47 = vpop.eup %3912 }
0x1e53   :  { %3595 = vpush %v3913_v47 }
0x1e54   :  { %3597 = vpush %v2878_v3 }
0x1e55   :  { %3599 = vpush %v2979_v44 }
0x1e6a   :  { %s4799_s15 = spop %3593 }
0x1e84   :  { %s4801_s20 = spop %3595 }
0x1e85   :  { %s4803_s30 = spop %3597  ;;  %s2867_s12 = smul.f32 %s4801_s20, %s4799_s15 }
0x1e86   :  { %s2883_s6 = smul.f32 %s4803_s30, %s4801_s20  ;;  %s3600_s7 = spop %3599 }
0x1e87   :  { %v2993_v56 = vstv %s3600_s7  ;;  %v3018_v61 = vstv %s2867_s12 }
0x1e88   :  { %3914 = vrcp.f32 %v2993_v56  ;;  %v3019_v16 = vsel %vm3017_vm14, %v3018_v61, 0.0  ;;  %v3030_v18 = vstv %s2883_s6 }
0x1e89   :  { %v3020_v14 = vadd.f32 %v3019_v16, %v3015_v33  ;;  %v3031_v42 = vsel %vm3029_vm1, %v3030_v18, 0.0 }
0x1e92   :  { %v3915_v7 = vpop.eup %3914 }
0x1ea9   :  { %v3001_v31 = vpop.xlane.xlu1 %3000 }
0x1eaa   :  { %v3002_v36 = vrot.slane %v3001_v31, 4 }
0x1eac   :  { %v3003_v55 = vadd.f32 %v3002_v36, %v3001_v31 }
0x1eae   :  { %v3004_v10 = vrot.slane %v3003_v55, 2 }
0x1eb0   :  { %v2985_v32 = vpop.xlane.xlu0 %2984  ;;  %v3005_v49 = vadd.f32 %v3004_v10, %v3003_v55 }
0x1eb1   :  { %v2986_v43 = vrot.slane %v2985_v32, 4 }
0x1eb2   :  { %v3006_v50 = vrot.slane %v3005_v49, 1 }
0x1eb3   :  { %v2987_v5 = vadd.f32 %v2986_v43, %v2985_v32 }
0x1eb4   :  { %v3007_v8 = vadd.f32 %v3006_v50, %v3005_v49 }
0x1eb5   :  { %v2988_v59 = vrot.slane %v2987_v5, 2 }
0x1eb7   :  { %v2989_v52 = vadd.f32 %v2988_v59, %v2987_v5 }
0x1eb9   :  { %v2990_v60 = vrot.slane %v2989_v52, 1 }
0x1ebb   :  { %v2991_v1 = vadd.f32 %v2990_v60, %v2989_v52 }
0x1ebd   :  { %3601 = vpush %v2991_v1 }
0x1ebe   :  { %3603 = vpush %v3915_v7 }
0x1ebf   :  { %3605 = vpush %v3007_v8 }
0x1eee   :  { %s3602_s14 = spop %3601 }
0x1eef   :  { %s3604_s16 = spop %3603 }
0x1ef0   :  { %s2996_s11 = smul.f32 %s3604_s16, %s3602_s14  ;;  %s3606_s18 = spop %3605 }
0x1ef1   :  { %s3012_s19 = smul.f32 %s3606_s18, %s3604_s16 }
0x1ef2   :  { %v3022_v53 = vstv %s2996_s11 }
0x1ef3   :  { %v3023_v17 = vsel %vm3021_vm6, %v3022_v53, 0.0  ;;  %v3034_v51 = vstv %s3012_s19 }
0x1ef4   :  { %v3024_v20 = vadd.f32 %v3023_v17, %v3020_v14  ;;  %v3035_v28 = vsel %vm3033_vm9, %v3034_v51, 0.0 }
0x1ef6   :  { %v3028_v13 = vadd.f32 %v3027_v19, %v3024_v20 }
0x1ef8   :  { %v3032_v4 = vadd.f32 %v3031_v42, %v3028_v13 }
0x1efa   :  { %v3036_v24 = vadd.f32 %v3035_v28, %v3032_v4 }
0x1efc   :  { %v3058_v26 = vsel %vm3057_vm10, %v3036_v24, %v3055_v25 }
0x1efd   :  { %v3060_v27 = vsel %vm3059_vm11, %v3058_v26, 0.0 }
0x1efe   :  { %3061 = vst [vmem:[%s3104_s2] sm:$0xff] %v3060_v27 }

</bundles_post_ra>
